<compile_context>
chip_gen: v6e
topology: v6e:2x2x1
jax: 0.10.0
libtpu: 0.0.40
codegen_flags: <defaults>
</compile_context>

<pallas_src>
import functools

import jax
import jax.numpy as jnp
from jax.experimental import pallas as pl
from jax.experimental.pallas import tpu as pltpu


# ---------------------------------------------------------------------------
# small helpers
# ---------------------------------------------------------------------------
def _pick_tile(n, unit, max_tile):
    """Largest multiple of `unit` that divides n and is <= max_tile (else the full n)."""
    if n % unit != 0:
        return n
    best = unit
    t = unit
    limit = min(n, max_tile)
    while t <= limit:
        if n % t == 0:
            best = t
        t += unit
    return best


def _parity_fold(shape, col_axis, ch_axis, n_ch):
    """0/1 matrix mapping (parity-group, channel) columns <-> channels (4 groups)."""
    col = jax.lax.broadcasted_iota(jnp.int32, shape, col_axis)
    ch = jax.lax.broadcasted_iota(jnp.int32, shape, ch_axis)
    m = col == ch
    for g in range(1, 4):
        m = m | (col == ch + g * n_ch)
    return m.astype(jnp.float32)


# ---------------------------------------------------------------------------
# kernel A: fused Linear + BatchNorm1d(training stats) + ReLU, tiled over output columns
# ---------------------------------------------------------------------------
def _linear_bn_relu_kernel(x_ref, w_ref, b_ref, g_ref, be_ref, o_ref, *, eps):
    y = jnp.dot(x_ref[...], w_ref[...], preferred_element_type=jnp.float32) + b_ref[...]
    mean = jnp.mean(y, axis=0, keepdims=True)          # per-column stats over the batch
    d = y - mean
    var = jnp.mean(d * d, axis=0, keepdims=True)       # biased variance (PyTorch training mode)
    yn = d * jax.lax.rsqrt(var + eps)
    o_ref[...] = jnp.maximum(yn * g_ref[...] + be_ref[...], 0.0)


def linear_bn_relu(x, w, b, gamma, beta, eps=1e-5, max_tile=1024):
    M, K = x.shape
    K2, N = w.shape
    assert K == K2
    tn = _pick_tile(N, unit=128, max_tile=max_tile)
    grid = (N // tn,)
    return pl.pallas_call(
        functools.partial(_linear_bn_relu_kernel, eps=eps),
        out_shape=jax.ShapeDtypeStruct((M, N), jnp.float32),
        grid=grid,
        in_specs=[
            pl.BlockSpec((M, K), lambda j: (0, 0)),     # batch kept whole (BN over batch)
            pl.BlockSpec((K, tn), lambda j: (0, j)),
            pl.BlockSpec((1, tn), lambda j: (0, j)),
            pl.BlockSpec((1, tn), lambda j: (0, j)),
            pl.BlockSpec((1, tn), lambda j: (0, j)),
        ],
        out_specs=pl.BlockSpec((M, tn), lambda j: (0, j)),
        compiler_params=pltpu.CompilerParams(dimension_semantics=("parallel",)),
    )(x, w, b.reshape(1, N), gamma.reshape(1, N), beta.reshape(1, N))


# ---------------------------------------------------------------------------
# kernel B: layer2 sub-pixel ConvTranspose matmul + bias, output resident in VMEM,
#           BatchNorm2d(training stats over all pixels & parities) + ReLU in the last step
# ---------------------------------------------------------------------------
def _convt_bn_relu_kernel(p_ref, w_ref, b_ref, g_ref, be_ref, o_ref, *, eps, n_ch, tm):
    i = pl.program_id(0)
    y = jnp.dot(p_ref[...], w_ref[...], preferred_element_type=jnp.float32) + b_ref[...]
    start = pl.multiple_of(i * tm, tm)
    o_ref[pl.ds(start, tm), :] = y                      # raw (pre-BN) rows into resident output

    @pl.when(i == pl.num_programs(0) - 1)
    def _():
        yf = o_ref[...]                                 # (M, 4*n_ch): cols = (dh, dw, channel)
        m_rows = yf.shape[0]
        cnt = jnp.float32(m_rows * 4)                   # elements per channel = B*Hout*Wout
        col_s = jnp.sum(yf, axis=0, keepdims=True)      # (1, 4*n_ch)
        col_sq = jnp.sum(yf * yf, axis=0, keepdims=True)
        # fold the 4 parity column-groups onto channels (tiny MXU matmuls, no lane reshapes)
        fold = _parity_fold((4 * n_ch, n_ch), 0, 1, n_ch)       # (4*n_ch, n_ch)
        fold_t = _parity_fold((n_ch, 4 * n_ch), 1, 0, n_ch)     # (n_ch, 4*n_ch)
        ch_s = jnp.dot(col_s, fold, preferred_element_type=jnp.float32)
        ch_sq = jnp.dot(col_sq, fold, preferred_element_type=jnp.float32)
        mean = ch_s / cnt
        var = jnp.maximum(ch_sq / cnt - mean * mean, 0.0)
        inv = jax.lax.rsqrt(var + eps)
        mean_cols = jnp.dot(mean, fold_t, preferred_element_type=jnp.float32)
        inv_cols = jnp.dot(inv, fold_t, preferred_element_type=jnp.float32)
        yn = (yf - mean_cols) * inv_cols
        o_ref[...] = jnp.maximum(yn * g_ref[...] + be_ref[...], 0.0)


def convt_bn_relu(patches, w, b_cols, g_cols, be_cols, n_ch, eps=1e-5, max_rows=512):
    M, K = patches.shape
    K2, N = w.shape
    assert K == K2 and N == 4 * n_ch
    tm = _pick_tile(M, unit=8, max_tile=max_rows)
    grid = (M // tm,)
    return pl.pallas_call(
        functools.partial(_convt_bn_relu_kernel, eps=eps, n_ch=n_ch, tm=tm),
        out_shape=jax.ShapeDtypeStruct((M, N), jnp.float32),
        grid=grid,
        in_specs=[
            pl.BlockSpec((tm, K), lambda i: (i, 0)),    # stream patch rows
            pl.BlockSpec((K, N), lambda i: (0, 0)),
            pl.BlockSpec((1, N), lambda i: (0, 0)),
            pl.BlockSpec((1, N), lambda i: (0, 0)),
            pl.BlockSpec((1, N), lambda i: (0, 0)),
        ],
        out_specs=pl.BlockSpec((M, N), lambda i: (0, 0)),   # whole output stays in VMEM
        compiler_params=pltpu.CompilerParams(dimension_semantics=("arbitrary",)),
    )(patches, w, b_cols.reshape(1, N), g_cols.reshape(1, N), be_cols.reshape(1, N))


# ---------------------------------------------------------------------------
# kernel C: layer3 sub-pixel ConvTranspose (Cout=1) computed transposed + fused sigmoid
#           -> output last dim is the flattened spatial axis (lane-dense stores)
# ---------------------------------------------------------------------------
def _convt_sigmoid_kernel(wt_ref, pt_ref, b_ref, o_ref):
    bias = b_ref[0, 0]
    y = jnp.dot(wt_ref[...], pt_ref[...], preferred_element_type=jnp.float32) + bias
    o_ref[...] = jax.nn.sigmoid(y)


def convt_sigmoid_lanes(w_t, patches_t, bias, max_tile=2048):
    P, K = w_t.shape                  # (4, 9*Cin)
    K2, M = patches_t.shape
    assert K == K2
    tn = _pick_tile(M, unit=128, max_tile=max_tile)
    grid = (M // tn,)
    return pl.pallas_call(
        _convt_sigmoid_kernel,
        out_shape=jax.ShapeDtypeStruct((P, M), jnp.float32),
        grid=grid,
        in_specs=[
            pl.BlockSpec((P, K), lambda j: (0, 0)),
            pl.BlockSpec((K, tn), lambda j: (0, j)),
            pl.BlockSpec(memory_space=pltpu.MemorySpace.SMEM),   # scalar bias
        ],
        out_specs=pl.BlockSpec((P, tn), lambda j: (0, j)),
        compiler_params=pltpu.CompilerParams(dimension_semantics=("parallel",)),
    )(w_t, patches_t, bias.reshape(1, 1))


# ---------------------------------------------------------------------------
# ConvTranspose2d(k=4, s=2, p=1) sub-pixel lowering helpers (plain-JAX glue)
# ---------------------------------------------------------------------------
def subpixel_weight_matrix(w_pt):
    """(Cin, Cout, 4, 4) PyTorch ConvTranspose2d weight -> (9*Cin, 4*Cout).

    Rows ordered (th, tw, ci) over a 3x3 input window (padded by 1); columns ordered
    (dh, dw, co) over the 2x2 output sub-pixel block at (2*ih + dh, 2*iw + dw).
    kh = dh + 3 - 2*th, kw = dw + 3 - 2*tw (taps outside [0,4) contribute zero).
    """
    c_in, c_out, ksz, _ = w_pt.shape
    zeros = jnp.zeros((c_in, c_out), w_pt.dtype)
    row_blocks = []
    for th in range(3):
        for tw in range(3):
            col_blocks = []
            for dh in range(2):
                for dw in range(2):
                    kh = dh + 3 - 2 * th
                    kw = dw + 3 - 2 * tw
                    if 0 <= kh < ksz and 0 <= kw < ksz:
                        col_blocks.append(w_pt[:, :, kh, kw])
                    else:
                        col_blocks.append(zeros)
            row_blocks.append(jnp.concatenate(col_blocks, axis=1))   # (Cin, 4*Cout)
    return jnp.concatenate(row_blocks, axis=0)                       # (9*Cin, 4*Cout)


# TODO(synk): the 3x3 window extraction + pixel-shuffle below stay as thin XLA reshapes; they
# could be folded into the kernels via index_map / manual-DMA gathers for zero HBM overhead.
def window3x3_patches(x_nhwc):
    """(B, H, W, C) NHWC -> (B*H*W, 9*C) patches, K ordered (th, tw, c)."""
    B, H, W, C = x_nhwc.shape
    xp = jnp.pad(x_nhwc, ((0, 0), (1, 1), (1, 1), (0, 0)))
    cols = [xp[:, th:th + H, tw:tw + W, :] for th in range(3) for tw in range(3)]
    return jnp.concatenate(cols, axis=-1).reshape(B * H * W, 9 * C)


def window3x3_patches_t(x_nhwc):
    """(B, H, W, C) NHWC -> (9*C, B*H*W) transposed patches (lane axis = spatial)."""
    B, H, W, C = x_nhwc.shape
    xp = jnp.pad(x_nhwc, ((0, 0), (1, 1), (1, 1), (0, 0)))
    cols = [xp[:, th:th + H, tw:tw + W, :] for th in range(3) for tw in range(3)]
    p = jnp.stack(cols, axis=0)                     # (9, B, H, W, C)
    p = p.transpose(0, 4, 1, 2, 3)                  # (9, C, B, H, W)
    return p.reshape(9 * C, B * H * W)


# ---------------------------------------------------------------------------
# Decoder_VAE forward
# ---------------------------------------------------------------------------
def decoder_vae_forward(x, params, image_size):
    assert image_size % 4 == 0
    s4 = image_size // 4
    B = x.shape[0]
    S2 = 2 * s4
    S = 2 * S2

    # layer0: Linear(62 -> 512) + BatchNorm1d + ReLU   (fused)
    h = linear_bn_relu(x, params["w0"].T, params["b0"], params["g0"], params["be0"])

    # layer1: Linear(512 -> 128*s4*s4) + BatchNorm1d + ReLU   (fused, tiled over columns)
    h = linear_bn_relu(h, params["w1"].T, params["b1"], params["g1"], params["be1"])

    # view(-1, 128, s4, s4) then NHWC (channels on the 128-lane axis)
    h = h.reshape(B, 128, s4, s4).transpose(0, 2, 3, 1)            # (B, s4, s4, 128)

    # layer2: ConvTranspose2d(128 -> 32, 4, 2, 1) + BatchNorm2d + ReLU   (one fused kernel)
    w2 = subpixel_weight_matrix(params["wt2"])                     # (1152, 128)
    p2 = window3x3_patches(h)                                      # (B*s4*s4, 1152)
    y2 = convt_bn_relu(
        p2, w2,
        jnp.tile(params["bt2"], 4),
        jnp.tile(params["g2"], 4),
        jnp.tile(params["be2"], 4),
        n_ch=32,
    )                                                              # (B*s4*s4, 128)
    # pixel shuffle: rows (b, qh, qw) x cols (dh, dw, c)  ->  NHWC (B, 2*s4, 2*s4, 32)
    h = (y2.reshape(B, s4, s4, 2, 2, 32)
           .transpose(0, 1, 3, 2, 4, 5)
           .reshape(B, S2, S2, 32))

    # layer3: ConvTranspose2d(32 -> 1, 4, 2, 1) + Sigmoid, computed transposed (lane-dense out)
    w3 = subpixel_weight_matrix(params["wt3"])                     # (288, 4)
    p3t = window3x3_patches_t(h)                                   # (288, B*S2*S2)
    y3 = convt_sigmoid_lanes(w3.T, p3t, params["bt3"])             # (4, B*S2*S2)
    out = (y3.reshape(2, 2, B, S2, S2)
             .transpose(2, 3, 0, 4, 1)                             # (B, qh, dh, qw, dw)
             .reshape(B, S, S))
    return out[:, None, :, :]                                      # NCHW (B, 1, S, S)


def init_params(key, image_size):
    s4 = image_size // 4
    d1 = 128 * s4 * s4
    ks = jax.random.split(key, 4)
    std = 0.02
    f32 = jnp.float32
    return {
        # Linear weights in PyTorch layout (out_features, in_features), bias zero
        "w0": (jax.random.normal(ks[0], (512, 62)) * std).astype(f32),
        "b0": jnp.zeros((512,), f32),
        "w1": (jax.random.normal(ks[1], (d1, 512)) * std).astype(f32),
        "b1": jnp.zeros((d1,), f32),
        # ConvTranspose2d weights in PyTorch layout (Cin, Cout, K, K), bias zero
        "wt2": (jax.random.normal(ks[2], (128, 32, 4, 4)) * std).astype(f32),
        "bt2": jnp.zeros((32,), f32),
        "wt3": (jax.random.normal(ks[3], (32, 1, 4, 4)) * std).astype(f32),
        "bt3": jnp.zeros((1,), f32),
        # BatchNorm affine params (PyTorch default init: weight=1, bias=0)
        "g0": jnp.ones((512,), f32), "be0": jnp.zeros((512,), f32),
        "g1": jnp.ones((d1,), f32), "be1": jnp.zeros((d1,), f32),
        "g2": jnp.ones((32,), f32), "be2": jnp.zeros((32,), f32),
    }


if __name__ == "__main__":
    IMAGE_SIZE = 16   # small, divisible by 4 (module default is 28; semantics identical)
    BATCH = 2

    key = jax.random.PRNGKey(0)
    kx, kp = jax.random.split(key)
    x = jax.random.normal(kx, (BATCH, 62), dtype=jnp.float32)
    params = init_params(kp, IMAGE_SIZE)

    fwd = jax.jit(functools.partial(decoder_vae_forward, image_size=IMAGE_SIZE))
    out = jax.block_until_ready(fwd(x, params))

    assert out.shape == (BATCH, 1, IMAGE_SIZE, IMAGE_SIZE), out.shape
    assert bool(jnp.all(jnp.isfinite(out)))
    assert bool(jnp.all((out >= 0.0) & (out <= 1.0)))  # sigmoid output range
    print("KERNEL_OK")
</pallas_src>

<mosaic_0001>
module attributes {stable_mosaic.version = 11 : i64} {
  func.func @_linear_bn_relu_kernel(%arg0: i32, %arg1: memref<2x512xf32, #tpu.memory_space<vmem>>, %arg2: memref<512x1024xf32, #tpu.memory_space<vmem>>, %arg3: memref<1x1024xf32, #tpu.memory_space<vmem>>, %arg4: memref<1x1024xf32, #tpu.memory_space<vmem>>, %arg5: memref<1x1024xf32, #tpu.memory_space<vmem>>, %arg6: memref<2x1024xf32, #tpu.memory_space<vmem>>) attributes {dimension_semantics = [#tpu.dimension_semantics<parallel>], iteration_bounds = array<i64: 2>, scalar_prefetch = 0 : i64, scratch_operands = 0 : i64, tpu.core_type = #tpu.core_type<tc>, window_params = [{pipeline_mode = #tpu.pipeline_mode<synchronous>, transform_indices = @transform_0, window_bounds = array<i64: 2, 512>}, {transform_indices = @transform_1, window_bounds = array<i64: 512, 1024>}, {transform_indices = @transform_2, window_bounds = array<i64: 1, 1024>}, {transform_indices = @transform_3, window_bounds = array<i64: 1, 1024>}, {transform_indices = @transform_4, window_bounds = array<i64: 1, 1024>}, {transform_indices = @transform_5, window_bounds = array<i64: 2, 1024>}]} {
    %c0 = arith.constant 0 : index
    %c0_0 = arith.constant 0 : index
    %0 = vector.load %arg1[%c0, %c0_0] : memref<2x512xf32, #tpu.memory_space<vmem>>, vector<2x512xf32>
    %c0_1 = arith.constant 0 : index
    %c0_2 = arith.constant 0 : index
    %1 = vector.load %arg2[%c0_1, %c0_2] : memref<512x1024xf32, #tpu.memory_space<vmem>>, vector<512x1024xf32>
    %cst = arith.constant dense<0.000000e+00> : vector<2x1024xf32>
    %2 = tpu.matmul %0, %1, %cst {dimension_numbers = #tpu.dot_dimension_numbers<[1], [0], [0], [1], [0, 0, 1, 1], [], []>} : vector<2x512xf32>, vector<512x1024xf32>, vector<2x1024xf32> -> vector<2x1024xf32>
    %c0_3 = arith.constant 0 : index
    %c0_4 = arith.constant 0 : index
    %3 = vector.load %arg3[%c0_3, %c0_4] : memref<1x1024xf32, #tpu.memory_space<vmem>>, vector<1x1024xf32>
    %4 = vector.broadcast %3 : vector<1x1024xf32> to vector<2x1024xf32>
    %5 = arith.addf %2, %4 : vector<2x1024xf32>
    %cst_5 = arith.constant dense<0.000000e+00> : vector<1024xf32>
    %6 = vector.multi_reduction <add>, %5, %cst_5 [0] : vector<2x1024xf32> to vector<1024xf32>
    %7 = vector.shape_cast %6 : vector<1024xf32> to vector<1x1024xf32>
    %cst_6 = arith.constant 2.000000e+00 : f32
    %8 = vector.broadcast %cst_6 : f32 to vector<1x1024xf32>
    %9 = arith.divf %7, %8 : vector<1x1024xf32>
    %10 = vector.broadcast %9 : vector<1x1024xf32> to vector<2x1024xf32>
    %11 = arith.subf %5, %10 : vector<2x1024xf32>
    %12 = arith.mulf %11, %11 : vector<2x1024xf32>
    %cst_7 = arith.constant dense<0.000000e+00> : vector<1024xf32>
    %13 = vector.multi_reduction <add>, %12, %cst_7 [0] : vector<2x1024xf32> to vector<1024xf32>
    %14 = vector.shape_cast %13 : vector<1024xf32> to vector<1x1024xf32>
    %cst_8 = arith.constant 2.000000e+00 : f32
    %15 = vector.broadcast %cst_8 : f32 to vector<1x1024xf32>
    %16 = arith.divf %14, %15 : vector<1x1024xf32>
    %cst_9 = arith.constant 9.99999974E-6 : f32
    %17 = vector.broadcast %cst_9 : f32 to vector<1x1024xf32>
    %18 = arith.addf %16, %17 : vector<1x1024xf32>
    %19 = math.rsqrt %18 : vector<1x1024xf32>
    %20 = vector.broadcast %19 : vector<1x1024xf32> to vector<2x1024xf32>
    %21 = arith.mulf %11, %20 : vector<2x1024xf32>
    %c0_10 = arith.constant 0 : index
    %c0_11 = arith.constant 0 : index
    %22 = vector.load %arg4[%c0_10, %c0_11] : memref<1x1024xf32, #tpu.memory_space<vmem>>, vector<1x1024xf32>
    %23 = vector.broadcast %22 : vector<1x1024xf32> to vector<2x1024xf32>
    %24 = arith.mulf %21, %23 : vector<2x1024xf32>
    %c0_12 = arith.constant 0 : index
    %c0_13 = arith.constant 0 : index
    %25 = vector.load %arg5[%c0_12, %c0_13] : memref<1x1024xf32, #tpu.memory_space<vmem>>, vector<1x1024xf32>
    %26 = vector.broadcast %25 : vector<1x1024xf32> to vector<2x1024xf32>
    %27 = arith.addf %24, %26 : vector<2x1024xf32>
    %cst_14 = arith.constant 0.000000e+00 : f32
    %28 = vector.broadcast %cst_14 : f32 to vector<2x1024xf32>
    %29 = arith.maximumf %27, %28 : vector<2x1024xf32>
    %c0_15 = arith.constant 0 : index
    %c0_16 = arith.constant 0 : index
    %30 = vector.load %arg6[%c0_15, %c0_16] : memref<2x1024xf32, #tpu.memory_space<vmem>>, vector<2x1024xf32>
    tpu.vector_store %arg6[%c0_15, %c0_16], %29 {strides = array<i32>} : memref<2x1024xf32, #tpu.memory_space<vmem>>, vector<2x1024xf32>,
    return
  }
  func.func @transform_0(%arg0: i32) -> (i32, i32) {
    %c0_i32 = arith.constant 0 : i32
    %c0_i32_0 = arith.constant 0 : i32
    %c0_i32_1 = arith.constant 0 : i32
    return %c0_i32, %c0_i32_0 : i32, i32
  }
  func.func @transform_1(%arg0: i32) -> (i32, i32) {
    %c0_i32 = arith.constant 0 : i32
    %c0_i32_0 = arith.constant 0 : i32
    return %c0_i32, %arg0 : i32, i32
  }
  func.func @transform_2(%arg0: i32) -> (i32, i32) {
    %c0_i32 = arith.constant 0 : i32
    %c0_i32_0 = arith.constant 0 : i32
    return %c0_i32, %arg0 : i32, i32
  }
  func.func @transform_3(%arg0: i32) -> (i32, i32) {
    %c0_i32 = arith.constant 0 : i32
    %c0_i32_0 = arith.constant 0 : i32
    return %c0_i32, %arg0 : i32, i32
  }
  func.func @transform_4(%arg0: i32) -> (i32, i32) {
    %c0_i32 = arith.constant 0 : i32
    %c0_i32_0 = arith.constant 0 : i32
    return %c0_i32, %arg0 : i32, i32
  }
  func.func @transform_5(%arg0: i32) -> (i32, i32) {
    %c0_i32 = arith.constant 0 : i32
    %c0_i32_0 = arith.constant 0 : i32
    return %c0_i32, %arg0 : i32, i32
  }
}

module attributes {stable_mosaic.version = 11 : i64} {
  func.func @_linear_bn_relu_kernel(%arg0: i32, %arg1: memref<2x62xf32, #tpu.memory_space<vmem>>, %arg2: memref<62x512xf32, #tpu.memory_space<vmem>>, %arg3: memref<1x512xf32, #tpu.memory_space<vmem>>, %arg4: memref<1x512xf32, #tpu.memory_space<vmem>>, %arg5: memref<1x512xf32, #tpu.memory_space<vmem>>, %arg6: memref<2x512xf32, #tpu.memory_space<vmem>>) attributes {dimension_semantics = [#tpu.dimension_semantics<parallel>], iteration_bounds = array<i64: 1>, scalar_prefetch = 0 : i64, scratch_operands = 0 : i64, tpu.core_type = #tpu.core_type<tc>, window_params = [{pipeline_mode = #tpu.pipeline_mode<synchronous>, transform_indices = @transform_0, window_bounds = array<i64: 2, 62>}, {transform_indices = @transform_1, window_bounds = array<i64: 62, 512>}, {transform_indices = @transform_2, window_bounds = array<i64: 1, 512>}, {transform_indices = @transform_3, window_bounds = array<i64: 1, 512>}, {transform_indices = @transform_4, window_bounds = array<i64: 1, 512>}, {transform_indices = @transform_5, window_bounds = array<i64: 2, 512>}]} {
    %c0 = arith.constant 0 : index
    %c0_0 = arith.constant 0 : index
    %0 = vector.load %arg1[%c0, %c0_0] : memref<2x62xf32, #tpu.memory_space<vmem>>, vector<2x62xf32>
    %c0_1 = arith.constant 0 : index
    %c0_2 = arith.constant 0 : index
    %1 = vector.load %arg2[%c0_1, %c0_2] : memref<62x512xf32, #tpu.memory_space<vmem>>, vector<62x512xf32>
    %cst = arith.constant dense<0.000000e+00> : vector<2x512xf32>
    %2 = tpu.matmul %0, %1, %cst {dimension_numbers = #tpu.dot_dimension_numbers<[1], [0], [0], [1], [0, 0, 1, 1], [], []>} : vector<2x62xf32>, vector<62x512xf32>, vector<2x512xf32> -> vector<2x512xf32>
    %c0_3 = arith.constant 0 : index
    %c0_4 = arith.constant 0 : index
    %3 = vector.load %arg3[%c0_3, %c0_4] : memref<1x512xf32, #tpu.memory_space<vmem>>, vector<1x512xf32>
    %4 = vector.broadcast %3 : vector<1x512xf32> to vector<2x512xf32>
    %5 = arith.addf %2, %4 : vector<2x512xf32>
    %cst_5 = arith.constant dense<0.000000e+00> : vector<512xf32>
    %6 = vector.multi_reduction <add>, %5, %cst_5 [0] : vector<2x512xf32> to vector<512xf32>
    %7 = vector.shape_cast %6 : vector<512xf32> to vector<1x512xf32>
    %cst_6 = arith.constant 2.000000e+00 : f32
    %8 = vector.broadcast %cst_6 : f32 to vector<1x512xf32>
    %9 = arith.divf %7, %8 : vector<1x512xf32>
    %10 = vector.broadcast %9 : vector<1x512xf32> to vector<2x512xf32>
    %11 = arith.subf %5, %10 : vector<2x512xf32>
    %12 = arith.mulf %11, %11 : vector<2x512xf32>
    %cst_7 = arith.constant dense<0.000000e+00> : vector<512xf32>
    %13 = vector.multi_reduction <add>, %12, %cst_7 [0] : vector<2x512xf32> to vector<512xf32>
    %14 = vector.shape_cast %13 : vector<512xf32> to vector<1x512xf32>
    %cst_8 = arith.constant 2.000000e+00 : f32
    %15 = vector.broadcast %cst_8 : f32 to vector<1x512xf32>
    %16 = arith.divf %14, %15 : vector<1x512xf32>
    %cst_9 = arith.constant 9.99999974E-6 : f32
    %17 = vector.broadcast %cst_9 : f32 to vector<1x512xf32>
    %18 = arith.addf %16, %17 : vector<1x512xf32>
    %19 = math.rsqrt %18 : vector<1x512xf32>
    %20 = vector.broadcast %19 : vector<1x512xf32> to vector<2x512xf32>
    %21 = arith.mulf %11, %20 : vector<2x512xf32>
    %c0_10 = arith.constant 0 : index
    %c0_11 = arith.constant 0 : index
    %22 = vector.load %arg4[%c0_10, %c0_11] : memref<1x512xf32, #tpu.memory_space<vmem>>, vector<1x512xf32>
    %23 = vector.broadcast %22 : vector<1x512xf32> to vector<2x512xf32>
    %24 = arith.mulf %21, %23 : vector<2x512xf32>
    %c0_12 = arith.constant 0 : index
    %c0_13 = arith.constant 0 : index
    %25 = vector.load %arg5[%c0_12, %c0_13] : memref<1x512xf32, #tpu.memory_space<vmem>>, vector<1x512xf32>
    %26 = vector.broadcast %25 : vector<1x512xf32> to vector<2x512xf32>
    %27 = arith.addf %24, %26 : vector<2x512xf32>
    %cst_14 = arith.constant 0.000000e+00 : f32
    %28 = vector.broadcast %cst_14 : f32 to vector<2x512xf32>
    %29 = arith.maximumf %27, %28 : vector<2x512xf32>
    %c0_15 = arith.constant 0 : index
    %c0_16 = arith.constant 0 : index
    %30 = vector.load %arg6[%c0_15, %c0_16] : memref<2x512xf32, #tpu.memory_space<vmem>>, vector<2x512xf32>
    tpu.vector_store %arg6[%c0_15, %c0_16], %29 {strides = array<i32>} : memref<2x512xf32, #tpu.memory_space<vmem>>, vector<2x512xf32>,
    return
  }
  func.func @transform_0(%arg0: i32) -> (i32, i32) {
    %c0_i32 = arith.constant 0 : i32
    %c0_i32_0 = arith.constant 0 : i32
    %c0_i32_1 = arith.constant 0 : i32
    return %c0_i32, %c0_i32_0 : i32, i32
  }
  func.func @transform_1(%arg0: i32) -> (i32, i32) {
    %c0_i32 = arith.constant 0 : i32
    %c0_i32_0 = arith.constant 0 : i32
    return %c0_i32, %arg0 : i32, i32
  }
  func.func @transform_2(%arg0: i32) -> (i32, i32) {
    %c0_i32 = arith.constant 0 : i32
    %c0_i32_0 = arith.constant 0 : i32
    return %c0_i32, %arg0 : i32, i32
  }
  func.func @transform_3(%arg0: i32) -> (i32, i32) {
    %c0_i32 = arith.constant 0 : i32
    %c0_i32_0 = arith.constant 0 : i32
    return %c0_i32, %arg0 : i32, i32
  }
  func.func @transform_4(%arg0: i32) -> (i32, i32) {
    %c0_i32 = arith.constant 0 : i32
    %c0_i32_0 = arith.constant 0 : i32
    return %c0_i32, %arg0 : i32, i32
  }
  func.func @transform_5(%arg0: i32) -> (i32, i32) {
    %c0_i32 = arith.constant 0 : i32
    %c0_i32_0 = arith.constant 0 : i32
    return %c0_i32, %arg0 : i32, i32
  }
}

module attributes {stable_mosaic.version = 11 : i64} {
  func.func @_convt_bn_relu_kernel(%arg0: i32, %arg1: memref<32x1152xf32, #tpu.memory_space<vmem>>, %arg2: memref<1152x128xf32, #tpu.memory_space<vmem>>, %arg3: memref<1x128xf32, #tpu.memory_space<vmem>>, %arg4: memref<1x128xf32, #tpu.memory_space<vmem>>, %arg5: memref<1x128xf32, #tpu.memory_space<vmem>>, %arg6: memref<32x128xf32, #tpu.memory_space<vmem>>) attributes {dimension_semantics = [#tpu.dimension_semantics<arbitrary>], iteration_bounds = array<i64: 1>, scalar_prefetch = 0 : i64, scratch_operands = 0 : i64, tpu.core_type = #tpu.core_type<tc>, window_params = [{transform_indices = @transform_0, window_bounds = array<i64: 32, 1152>}, {pipeline_mode = #tpu.pipeline_mode<synchronous>, transform_indices = @transform_1, window_bounds = array<i64: 1152, 128>}, {pipeline_mode = #tpu.pipeline_mode<synchronous>, transform_indices = @transform_2, window_bounds = array<i64: 1, 128>}, {pipeline_mode = #tpu.pipeline_mode<synchronous>, transform_indices = @transform_3, window_bounds = array<i64: 1, 128>}, {pipeline_mode = #tpu.pipeline_mode<synchronous>, transform_indices = @transform_4, window_bounds = array<i64: 1, 128>}, {pipeline_mode = #tpu.pipeline_mode<synchronous>, transform_indices = @transform_5, window_bounds = array<i64: 32, 128>}]} {
    %c0 = arith.constant 0 : index
    %c0_0 = arith.constant 0 : index
    %0 = vector.load %arg1[%c0, %c0_0] : memref<32x1152xf32, #tpu.memory_space<vmem>>, vector<32x1152xf32>
    %c0_1 = arith.constant 0 : index
    %c0_2 = arith.constant 0 : index
    %1 = vector.load %arg2[%c0_1, %c0_2] : memref<1152x128xf32, #tpu.memory_space<vmem>>, vector<1152x128xf32>
    %cst = arith.constant dense<0.000000e+00> : vector<32x128xf32>
    %2 = tpu.matmul %0, %1, %cst {dimension_numbers = #tpu.dot_dimension_numbers<[1], [0], [0], [1], [0, 0, 1, 1], [], []>} : vector<32x1152xf32>, vector<1152x128xf32>, vector<32x128xf32> -> vector<32x128xf32>
    %c0_3 = arith.constant 0 : index
    %c0_4 = arith.constant 0 : index
    %3 = vector.load %arg3[%c0_3, %c0_4] : memref<1x128xf32, #tpu.memory_space<vmem>>, vector<1x128xf32>
    %4 = vector.broadcast %3 : vector<1x128xf32> to vector<32x128xf32>
    %5 = arith.addf %2, %4 : vector<32x128xf32>
    %c32_i32 = arith.constant 32 : i32
    %6 = arith.muli %arg0, %c32_i32 : i32
    %7 = tpu.assume_multiple %6, 32 : i32
    %8 = arith.index_cast %7 : i32 to index
    %c0_5 = arith.constant 0 : index
    %9 = vector.load %arg6[%8, %c0_5] : memref<32x128xf32, #tpu.memory_space<vmem>>, vector<32x128xf32>
    tpu.vector_store %arg6[%8, %c0_5], %5 {strides = array<i32>} : memref<32x128xf32, #tpu.memory_space<vmem>>, vector<32x128xf32>,
    %c0_i32 = arith.constant 0 : i32
    %10 = arith.cmpi eq, %arg0, %c0_i32 : i32
    %11 = arith.extui %10 : i1 to i32
    %c0_i32_6 = arith.constant 0 : i32
    %12 = arith.cmpi ne, %11, %c0_i32_6 : i32
    scf.if %12 {
      %c0_7 = arith.constant 0 : index
      %c0_8 = arith.constant 0 : index
      %13 = vector.load %arg6[%c0_7, %c0_8] : memref<32x128xf32, #tpu.memory_space<vmem>>, vector<32x128xf32>
      %cst_9 = arith.constant dense<0.000000e+00> : vector<128xf32>
      %14 = vector.multi_reduction <add>, %13, %cst_9 [0] : vector<32x128xf32> to vector<128xf32>
      %15 = vector.shape_cast %14 : vector<128xf32> to vector<1x128xf32>
      %16 = arith.mulf %13, %13 : vector<32x128xf32>
      %cst_10 = arith.constant dense<0.000000e+00> : vector<128xf32>
      %17 = vector.multi_reduction <add>, %16, %cst_10 [0] : vector<32x128xf32> to vector<128xf32>
      %18 = vector.shape_cast %17 : vector<128xf32> to vector<1x128xf32>
      %19 = tpu.iota {dimensions = array<i32: 0>} : vector<128x32xi32>
      %20 = tpu.iota {dimensions = array<i32: 1>} : vector<128x32xi32>
      %21 = arith.cmpi eq, %19, %20 : vector<128x32xi32>
      %c32_i32_11 = arith.constant 32 : i32
      %22 = vector.broadcast %c32_i32_11 : i32 to vector<128x32xi32>
      %23 = arith.addi %20, %22 : vector<128x32xi32>
      %24 = arith.cmpi eq, %19, %23 : vector<128x32xi32>
      %25 = arith.ori %21, %24 : vector<128x32xi1>
      %c64_i32 = arith.constant 64 : i32
      %26 = vector.broadcast %c64_i32 : i32 to vector<128x32xi32>
      %27 = arith.addi %20, %26 : vector<128x32xi32>
      %28 = arith.cmpi eq, %19, %27 : vector<128x32xi32>
      %29 = arith.ori %25, %28 : vector<128x32xi1>
      %c96_i32 = arith.constant 96 : i32
      %30 = vector.broadcast %c96_i32 : i32 to vector<128x32xi32>
      %31 = arith.addi %20, %30 : vector<128x32xi32>
      %32 = arith.cmpi eq, %19, %31 : vector<128x32xi32>
      %33 = arith.ori %29, %32 : vector<128x32xi1>
      %34 = arith.extui %33 : vector<128x32xi1> to vector<128x32xi32>
      %35 = arith.sitofp %34 : vector<128x32xi32> to vector<128x32xf32>
      %36 = tpu.iota {dimensions = array<i32: 1>} : vector<32x128xi32>
      %37 = tpu.iota {dimensions = array<i32: 0>} : vector<32x128xi32>
      %38 = arith.cmpi eq, %36, %37 : vector<32x128xi32>
      %c32_i32_12 = arith.constant 32 : i32
      %39 = vector.broadcast %c32_i32_12 : i32 to vector<32x128xi32>
      %40 = arith.addi %37, %39 : vector<32x128xi32>
      %41 = arith.cmpi eq, %36, %40 : vector<32x128xi32>
      %42 = arith.ori %38, %41 : vector<32x128xi1>
      %c64_i32_13 = arith.constant 64 : i32
      %43 = vector.broadcast %c64_i32_13 : i32 to vector<32x128xi32>
      %44 = arith.addi %37, %43 : vector<32x128xi32>
      %45 = arith.cmpi eq, %36, %44 : vector<32x128xi32>
      %46 = arith.ori %42, %45 : vector<32x128xi1>
      %c96_i32_14 = arith.constant 96 : i32
      %47 = vector.broadcast %c96_i32_14 : i32 to vector<32x128xi32>
      %48 = arith.addi %37, %47 : vector<32x128xi32>
      %49 = arith.cmpi eq, %36, %48 : vector<32x128xi32>
      %50 = arith.ori %46, %49 : vector<32x128xi1>
      %51 = arith.extui %50 : vector<32x128xi1> to vector<32x128xi32>
      %52 = arith.sitofp %51 : vector<32x128xi32> to vector<32x128xf32>
      %cst_15 = arith.constant dense<0.000000e+00> : vector<1x32xf32>
      %53 = tpu.matmul %15, %35, %cst_15 {dimension_numbers = #tpu.dot_dimension_numbers<[1], [0], [0], [1], [0, 0, 1, 1], [], []>} : vector<1x128xf32>, vector<128x32xf32>, vector<1x32xf32> -> vector<1x32xf32>
      %cst_16 = arith.constant dense<0.000000e+00> : vector<1x32xf32>
      %54 = tpu.matmul %18, %35, %cst_16 {dimension_numbers = #tpu.dot_dimension_numbers<[1], [0], [0], [1], [0, 0, 1, 1], [], []>} : vector<1x128xf32>, vector<128x32xf32>, vector<1x32xf32> -> vector<1x32xf32>
      %cst_17 = arith.constant 1.280000e+02 : f32
      %55 = vector.broadcast %cst_17 : f32 to vector<1x32xf32>
      %56 = arith.divf %53, %55 : vector<1x32xf32>
      %cst_18 = arith.constant 1.280000e+02 : f32
      %57 = vector.broadcast %cst_18 : f32 to vector<1x32xf32>
      %58 = arith.divf %54, %57 : vector<1x32xf32>
      %59 = arith.mulf %56, %56 : vector<1x32xf32>
      %60 = arith.subf %58, %59 : vector<1x32xf32>
      %cst_19 = arith.constant 0.000000e+00 : f32
      %61 = vector.broadcast %cst_19 : f32 to vector<1x32xf32>
      %62 = arith.maximumf %60, %61 : vector<1x32xf32>
      %cst_20 = arith.constant 9.99999974E-6 : f32
      %63 = vector.broadcast %cst_20 : f32 to vector<1x32xf32>
      %64 = arith.addf %62, %63 : vector<1x32xf32>
      %65 = math.rsqrt %64 : vector<1x32xf32>
      %cst_21 = arith.constant dense<0.000000e+00> : vector<1x128xf32>
      %66 = tpu.matmul %56, %52, %cst_21 {dimension_numbers = #tpu.dot_dimension_numbers<[1], [0], [0], [1], [0, 0, 1, 1], [], []>} : vector<1x32xf32>, vector<32x128xf32>, vector<1x128xf32> -> vector<1x128xf32>
      %cst_22 = arith.constant dense<0.000000e+00> : vector<1x128xf32>
      %67 = tpu.matmul %65, %52, %cst_22 {dimension_numbers = #tpu.dot_dimension_numbers<[1], [0], [0], [1], [0, 0, 1, 1], [], []>} : vector<1x32xf32>, vector<32x128xf32>, vector<1x128xf32> -> vector<1x128xf32>
      %68 = vector.broadcast %66 : vector<1x128xf32> to vector<32x128xf32>
      %69 = arith.subf %13, %68 : vector<32x128xf32>
      %70 = vector.broadcast %67 : vector<1x128xf32> to vector<32x128xf32>
      %71 = arith.mulf %69, %70 : vector<32x128xf32>
      %c0_23 = arith.constant 0 : index
      %c0_24 = arith.constant 0 : index
      %72 = vector.load %arg4[%c0_23, %c0_24] : memref<1x128xf32, #tpu.memory_space<vmem>>, vector<1x128xf32>
      %73 = vector.broadcast %72 : vector<1x128xf32> to vector<32x128xf32>
      %74 = arith.mulf %71, %73 : vector<32x128xf32>
      %c0_25 = arith.constant 0 : index
      %c0_26 = arith.constant 0 : index
      %75 = vector.load %arg5[%c0_25, %c0_26] : memref<1x128xf32, #tpu.memory_space<vmem>>, vector<1x128xf32>
      %76 = vector.broadcast %75 : vector<1x128xf32> to vector<32x128xf32>
      %77 = arith.addf %74, %76 : vector<32x128xf32>
      %cst_27 = arith.constant 0.000000e+00 : f32
      %78 = vector.broadcast %cst_27 : f32 to vector<32x128xf32>
      %79 = arith.maximumf %77, %78 : vector<32x128xf32>
      %c0_28 = arith.constant 0 : index
      %c0_29 = arith.constant 0 : index
      %80 = vector.load %arg6[%c0_28, %c0_29] : memref<32x128xf32, #tpu.memory_space<vmem>>, vector<32x128xf32>
      tpu.vector_store %arg6[%c0_28, %c0_29], %79 {strides = array<i32>} : memref<32x128xf32, #tpu.memory_space<vmem>>, vector<32x128xf32>,
    } else {
    }
    return
  }
  func.func @transform_0(%arg0: i32) -> (i32, i32) {
    %c0_i32 = arith.constant 0 : i32
    %c0_i32_0 = arith.constant 0 : i32
    return %arg0, %c0_i32 : i32, i32
  }
  func.func @transform_1(%arg0: i32) -> (i32, i32) {
    %c0_i32 = arith.constant 0 : i32
    %c0_i32_0 = arith.constant 0 : i32
    %c0_i32_1 = arith.constant 0 : i32
    return %c0_i32, %c0_i32_0 : i32, i32
  }
  func.func @transform_2(%arg0: i32) -> (i32, i32) {
    %c0_i32 = arith.constant 0 : i32
    %c0_i32_0 = arith.constant 0 : i32
    %c0_i32_1 = arith.constant 0 : i32
    return %c0_i32, %c0_i32_0 : i32, i32
  }
  func.func @transform_3(%arg0: i32) -> (i32, i32) {
    %c0_i32 = arith.constant 0 : i32
    %c0_i32_0 = arith.constant 0 : i32
    %c0_i32_1 = arith.constant 0 : i32
    return %c0_i32, %c0_i32_0 : i32, i32
  }
  func.func @transform_4(%arg0: i32) -> (i32, i32) {
    %c0_i32 = arith.constant 0 : i32
    %c0_i32_0 = arith.constant 0 : i32
    %c0_i32_1 = arith.constant 0 : i32
    return %c0_i32, %c0_i32_0 : i32, i32
  }
  func.func @transform_5(%arg0: i32) -> (i32, i32) {
    %c0_i32 = arith.constant 0 : i32
    %c0_i32_0 = arith.constant 0 : i32
    %c0_i32_1 = arith.constant 0 : i32
    return %c0_i32, %c0_i32_0 : i32, i32
  }
}

module attributes {stable_mosaic.version = 11 : i64} {
  func.func @_convt_sigmoid_kernel(%arg0: i32, %arg1: memref<4x288xf32, #tpu.memory_space<vmem>>, %arg2: memref<288x128xf32, #tpu.memory_space<vmem>>, %arg3: memref<1x1xf32, #tpu.memory_space<smem>>, %arg4: memref<4x128xf32, #tpu.memory_space<vmem>>) attributes {dimension_semantics = [#tpu.dimension_semantics<parallel>], iteration_bounds = array<i64: 1>, scalar_prefetch = 0 : i64, scratch_operands = 0 : i64, tpu.core_type = #tpu.core_type<tc>, window_params = [{pipeline_mode = #tpu.pipeline_mode<synchronous>, transform_indices = @transform_0, window_bounds = array<i64: 4, 288>}, {transform_indices = @transform_1, window_bounds = array<i64: 288, 128>}, {transform_indices = @transform_2, window_bounds = array<i64: 1, 1>}, {transform_indices = @transform_3, window_bounds = array<i64: 4, 128>}]} {
    %c0 = arith.constant 0 : index
    %c0_0 = arith.constant 0 : index
    %0 = memref.load %arg3[%c0, %c0_0] : memref<1x1xf32, #tpu.memory_space<smem>>
    %c0_1 = arith.constant 0 : index
    %c0_2 = arith.constant 0 : index
    %1 = vector.load %arg1[%c0_1, %c0_2] : memref<4x288xf32, #tpu.memory_space<vmem>>, vector<4x288xf32>
    %c0_3 = arith.constant 0 : index
    %c0_4 = arith.constant 0 : index
    %2 = vector.load %arg2[%c0_3, %c0_4] : memref<288x128xf32, #tpu.memory_space<vmem>>, vector<288x128xf32>
    %cst = arith.constant dense<0.000000e+00> : vector<4x128xf32>
    %3 = tpu.matmul %1, %2, %cst {dimension_numbers = #tpu.dot_dimension_numbers<[1], [0], [0], [1], [0, 0, 1, 1], [], []>} : vector<4x288xf32>, vector<288x128xf32>, vector<4x128xf32> -> vector<4x128xf32>
    %4 = vector.broadcast %0 : f32 to vector<4x128xf32>
    %5 = arith.addf %3, %4 : vector<4x128xf32>
    %6 = arith.negf %5 : vector<4x128xf32>
    %7 = math.exp %6 : vector<4x128xf32>
    %cst_5 = arith.constant 1.000000e+00 : f32
    %8 = vector.broadcast %cst_5 : f32 to vector<4x128xf32>
    %9 = arith.addf %8, %7 : vector<4x128xf32>
    %10 = arith.divf %8, %9 : vector<4x128xf32>
    %c0_6 = arith.constant 0 : index
    %c0_7 = arith.constant 0 : index
    %11 = vector.load %arg4[%c0_6, %c0_7] : memref<4x128xf32, #tpu.memory_space<vmem>>, vector<4x128xf32>
    tpu.vector_store %arg4[%c0_6, %c0_7], %10 {strides = array<i32>} : memref<4x128xf32, #tpu.memory_space<vmem>>, vector<4x128xf32>,
    return
  }
  func.func @transform_0(%arg0: i32) -> (i32, i32) {
    %c0_i32 = arith.constant 0 : i32
    %c0_i32_0 = arith.constant 0 : i32
    %c0_i32_1 = arith.constant 0 : i32
    return %c0_i32, %c0_i32_0 : i32, i32
  }
  func.func @transform_1(%arg0: i32) -> (i32, i32) {
    %c0_i32 = arith.constant 0 : i32
    %c0_i32_0 = arith.constant 0 : i32
    return %c0_i32, %arg0 : i32, i32
  }
  func.func @transform_2(%arg0: i32) -> (i32, i32) {
    %c0_i32 = arith.constant 0 : i32
    %c0_i32_0 = arith.constant 0 : i32
    %c0_i32_1 = arith.constant 0 : i32
    return %c0_i32, %c0_i32_0 : i32, i32
  }
  func.func @transform_3(%arg0: i32) -> (i32, i32) {
    %c0_i32 = arith.constant 0 : i32
    %c0_i32_0 = arith.constant 0 : i32
    return %c0_i32, %arg0 : i32, i32
  }
}

</mosaic_0001>

<bundles_post_ra>
// kernel: decoder_vae_forward.4
= control target key start
LH: loop header
LB: loop body
LE: loop exit
PB: predicated region body
PF: predicated region fallthrough
CT: control target
= control target key end

     0   :  { %10 = vsyncpa [#allocation3], 0  ;;  %s692_s0 = inlined_call_operand.hbm [shape: f32[2,62], index: 0, kind: input, shape index: {}]   ;;  %s693_s1 = inlined_call_operand.hbm [shape: f32[62,512], index: 1, kind: input, shape index: {}]   ;;  %s694_s2 = inlined_call_operand.hbm [shape: f32[1,512], index: 2, kind: input, shape index: {}]   ;;  %s695_s3 = inlined_call_operand.hbm [shape: f32[1,512], index: 3, kind: input, shape index: {}]   ;;  %s696_s4 = inlined_call_operand.hbm [shape: f32[1,512], index: 4, kind: input, shape index: {}]   ;;  %s697_s5 = inlined_call_operand.vmem [shape: f32[2,512], index: 5, kind: output, shape index: {}]  }
   0x1   :  { %11 = vsyncpa [#allocation5], 0 }
   0x2   :  { %12 = vsyncpa [#allocation8], 0  ;;  %s595_s18 = smov [#allocation4]  }
   0x3   :  { %s28_s19 = sshll.u32 %s595_s18, 4  ;;  %s29_s19 = int_to_ptr.vmem [resolvable:$true] %s28_s19 }
   0x4   :  { %s497_s20 = scalar_lea.vmem %s29_s19, 4096  ;;  %p502_p1 = scmp.lt.s32.totalorder %s29_s19, %s29_s19 }
   0x5   :  { %p498_p0 = scmp.ne.s32.totalorder %s29_s19, %s497_s20  ;;  %p503_p2 = scmp.lt.s32.totalorder %s497_s20, %s497_s20 }
   0x7   :  { %p504_p3 = por %p503_p2, %p502_p1 }
   0x9   :  { %p505_p4 = pnand %p504_p3, %p498_p0 }
   0xb   :  { %508 = shalt.err (!%p505_p4)
}
   0xc   :  { %s596_s21 = smov 512   ;;  %s597_s22 = smov 32  }
   0xd   :  { %34 = dma.hbm_to_vmem [thread:$0]  %s693_s1, 4096, %s29_s19, [#allocation5], %s596_s21, %s596_s21, %s597_s22  }
   0xe   :  { %s598_s25 = smov [#allocation7]   ;;  %s599_s27 = smov [#allocation2]  }
   0xf   :  { %s51_s26 = sshll.u32 %s598_s25, 4  ;;  %s19_s28 = sshll.u32 %s599_s27, 4  ;;  %s52_s26 = int_to_ptr.vmem [resolvable:$true] %s51_s26  ;;  %s20_s28 = int_to_ptr.vmem [resolvable:$true] %s19_s28 }
  0x10   :  { %s517_s29 = scalar_lea.vmem %s52_s26, 64  ;;  %p522_p6 = scmp.lt.s32.totalorder %s52_s26, %s52_s26 }
  0x11   :  { %p518_p5 = scmp.ne.s32.totalorder %s52_s26, %s517_s29  ;;  %p523_p7 = scmp.lt.s32.totalorder %s517_s29, %s517_s29 }
  0x13   :  { %p524_p8 = por %p523_p7, %p522_p6 }
  0x15   :  { %p525_p9 = pnand %p524_p8, %p518_p5 }
  0x17   :  { %528 = shalt.err (!%p525_p9)
}
  0x18   :  { %54 = dma.hbm_to_vmem [thread:$0]  %s695_s3, 64, %s52_s26, [#allocation8]  }
  0x19   :  { %s537_s7 = scalar_lea.vmem %s20_s28, 32  ;;  %p542_p11 = scmp.lt.s32.totalorder %s20_s28, %s20_s28 }
  0x1a   :  { %p538_p10 = scmp.ne.s32.totalorder %s20_s28, %s537_s7  ;;  %p543_p12 = scmp.lt.s32.totalorder %s537_s7, %s537_s7 }
  0x1c   :  { %p544_p13 = por %p543_p12, %p542_p11 }
  0x1e   :  { %p545_p0 = pnand %p544_p13, %p538_p10 }
  0x20   :  { %548 = shalt.err (!%p545_p0)
}
  0x21   :  { %22 = dma.hbm_to_vmem [thread:$0]  %s692_s0, 32, %s20_s28, [#allocation3]  }
  0x22   :  { %s600_s9 = smov [#allocation6]   ;;  %s601_s11 = smov [#allocation9]  }
  0x23   :  { %s41_s10 = sshll.u32 %s600_s9, 4  ;;  %s61_s12 = sshll.u32 %s601_s11, 4  ;;  %s42_s10 = int_to_ptr.vmem [resolvable:$true] %s41_s10  ;;  %s62_s12 = int_to_ptr.vmem [resolvable:$true] %s61_s12 }
  0x24   :  { %s557_s13 = scalar_lea.vmem %s42_s10, 64  ;;  %p562_p2 = scmp.lt.s32.totalorder %s42_s10, %s42_s10 }
  0x25   :  { %p558_p1 = scmp.ne.s32.totalorder %s42_s10, %s557_s13  ;;  %p563_p3 = scmp.lt.s32.totalorder %s557_s13, %s557_s13 }
  0x27   :  { %p564_p4 = por %p563_p3, %p562_p2 }
  0x29   :  { %p565_p5 = pnand %p564_p4, %p558_p1 }
  0x2b   :  { %568 = shalt.err (!%p565_p5)
}
  0x2c   :  { %44 = dma.hbm_to_vmem [thread:$0]  %s694_s2, 64, %s42_s10, [#allocation5]  }
  0x2d   :  { %s577_s15 = scalar_lea.vmem %s62_s12, 64  ;;  %p582_p7 = scmp.lt.s32.totalorder %s62_s12, %s62_s12 }
  0x2e   :  { %p578_p6 = scmp.ne.s32.totalorder %s62_s12, %s577_s15  ;;  %p583_p8 = scmp.lt.s32.totalorder %s577_s15, %s577_s15 }
  0x30   :  { %p584_p9 = por %p583_p8, %p582_p7 }
  0x32   :  { %p585_p10 = pnand %p584_p9, %p578_p6 }
  0x34   :  { %588 = shalt.err (!%p585_p10)
}
  0x35   :  { %64 = dma.hbm_to_vmem [thread:$0]  %s696_s4, 64, %s62_s12, [#allocation8]  }
  0x36   :  { %589 = dma.done.wait [#allocation3], 32  }
  0x37   :  { %590 = vsyncadd [#allocation3], 4294967264 }
  0x38   :  { %591 = dma.done.wait [#allocation5], 4160  }
  0x39   :  { %592 = vsyncadd [#allocation5], 4294963136 }
  0x3a   :  { %593 = dma.done.wait [#allocation8], 128  }
  0x3b   :  { %594 = vsyncadd [#allocation8], 4294967168  ;;  %v602_v0 = vmov 0.0   ;;  %vm139_vm0 = vcmask 1045504   ;;  %v110_v1 = vld [vmem:[#allocation4 + $0xe8] sm:$0x3f]  ;;  %v115_v34 = vlaneseq }
  0x3c   :  { %216 = vmatprep.mubr.f32.mxu0 %v602_v0  ;;  %287 = vmatprep.mubr.f32.mxu1 %v602_v0  ;;  %v112_v2 = vld [vmem:[#allocation4 + $0xf8] sm:$0x3f]  ;;  %v109_v3 = vld [vmem:[#allocation4 + $0xe0] sm:$0x3f]  ;;  %v111_v4 = vld [vmem:[#allocation4 + $0xf0] sm:$0x3f] }
  0x3d   :  { %466 = vmatprep.subr.msk.mxu0 %vm139_vm0, %v110_v1  ;;  %469 = vmatprep.subr.msk.mxu1 %vm139_vm0, %v112_v2  ;;  %v106_v5 = vld [vmem:[#allocation4 + $0xc8] sm:$0xff]  ;;  %v108_v6 = vld [vmem:[#allocation4 + $0xd8] sm:$0xff]  ;;  %v105_v7 = vld [vmem:[#allocation4 + $0xc0] sm:$0xff]  ;;  %vm135_vm1 = vcmask 506880   ;;  %v649_v35 = vshrl.u32 %v115_v34, 7  ;;  %vm294_vm2 = vcmask 1041408  }
  0x3e   :  { %467 = vmatpush1.msk.msra.mxu0 %vm139_vm0, %v109_v3  ;;  %470 = vmatpush1.msk.msra.mxu1 %vm139_vm0, %v111_v4  ;;  %v107_v8 = vld [vmem:[#allocation4 + $0xd0] sm:$0xff]  ;;  %v102_v9 = vld [vmem:[#allocation4 + $0xa8] sm:$0xff]  ;;  %v104_v10 = vld [vmem:[#allocation4 + $0xb8] sm:$0xff] }
  0x3f   :  { %170 = vmatprep.subr.mxu0 %v106_v5  ;;  %241 = vmatprep.subr.mxu1 %v108_v6  ;;  %v101_v11 = vld [vmem:[#allocation4 + $0xa0] sm:$0xff]  ;;  %v103_v12 = vld [vmem:[#allocation4 + $0xb0] sm:$0xff]  ;;  %v98_v13 = vld [vmem:[#allocation4 + $0x88] sm:$0xff]  ;;  %v652_v36 = vsub.s32 0, %v649_v35  ;;  %v655_v37 = vsub.s32 2, %v649_v35  ;;  %v658_v39 = vsub.s32 1, %v649_v35 }
  0x40   :  { %171 = vmatpush1.msra.mxu0 %v105_v7  ;;  %242 = vmatpush1.msra.mxu1 %v107_v8  ;;  %v100_v14 = vld [vmem:[#allocation4 + $0x98] sm:$0xff]  ;;  %v97_v15 = vld [vmem:[#allocation4 + $0x80] sm:$0xff]  ;;  %v99_v16 = vld [vmem:[#allocation4 + $0x90] sm:$0xff]  ;;  %v661_v40 = vsub.s32 3, %v649_v35 }
  0x41   :  { %172 = vmatprep.subr.mxu0 %v102_v9  ;;  %243 = vmatprep.subr.mxu1 %v104_v10  ;;  %v94_v17 = vld [vmem:[#allocation4 + $0x68] sm:$0xff]  ;;  %v96_v18 = vld [vmem:[#allocation4 + $0x78] sm:$0xff]  ;;  %v93_v19 = vld [vmem:[#allocation4 + $0x60] sm:$0xff] }
  0x42   :  { %173 = vmatpush1.msra.mxu0 %v101_v11  ;;  %244 = vmatpush1.msra.mxu1 %v103_v12  ;;  %v95_v20 = vld [vmem:[#allocation4 + $0x70] sm:$0xff]  ;;  %v90_v21 = vld [vmem:[#allocation4 + $0x48] sm:$0xff]  ;;  %v92_v22 = vld [vmem:[#allocation4 + $0x58] sm:$0xff] }
  0x43   :  { %174 = vmatprep.subr.mxu0 %v98_v13  ;;  %245 = vmatprep.subr.mxu1 %v100_v14  ;;  %v89_v23 = vld [vmem:[#allocation4 + $0x40] sm:$0xff]  ;;  %v91_v24 = vld [vmem:[#allocation4 + $0x50] sm:$0xff]  ;;  %v86_v25 = vld [vmem:[#allocation4 + $0x28] sm:$0xff] }
  0x44   :  { %175 = vmatpush1.msra.mxu0 %v97_v15  ;;  %246 = vmatpush1.msra.mxu1 %v99_v16  ;;  %v88_v26 = vld [vmem:[#allocation4 + $0x38] sm:$0xff]  ;;  %v85_v27 = vld [vmem:[#allocation4 + $0x20] sm:$0xff]  ;;  %v87_v28 = vld [vmem:[#allocation4 + $0x30] sm:$0xff] }
  0x45   :  { %176 = vmatprep.subr.mxu0 %v94_v17  ;;  %247 = vmatprep.subr.mxu1 %v96_v18  ;;  %v82_v29 = vld [vmem:[#allocation4 + $0x8] sm:$0xff]  ;;  %v84_v30 = vld [vmem:[#allocation4 + $0x18] sm:$0xff]  ;;  %v81_v31 = vld [vmem:[#allocation4] sm:$0xff] }
  0x46   :  { %177 = vmatpush1.msra.mxu0 %v93_v19  ;;  %248 = vmatpush1.msra.mxu1 %v95_v20  ;;  %v83_v32 = vld [vmem:[#allocation4 + $0x10] sm:$0xff]  ;;  %v80_v33 = vld [vmem:[#allocation2] sm:$0x3]  ;;  %v113_v38 = vld [vmem:[#allocation6] sm:$0xf] }
  0x47   :  { %178 = vmatprep.subr.mxu0 %v90_v21  ;;  %249 = vmatprep.subr.mxu1 %v92_v22  ;;  %v118_v41 = vrot.slane %v113_v38, %v652_v36  ;;  %v126_v42 = vrot.slane %v113_v38, %v655_v37  ;;  %v122_v43 = vrot.slane %v113_v38, %v658_v39 }
  0x48   :  { %179 = vmatpush1.msra.mxu0 %v89_v23  ;;  %250 = vmatpush1.msra.mxu1 %v91_v24  ;;  %v130_v44 = vrot.slane %v113_v38, %v661_v40 }
  0x49   :  { %180 = vmatprep.subr.mxu0 %v86_v25  ;;  %251 = vmatprep.subr.mxu1 %v88_v26 }
  0x4a   :  { %181 = vmatpush1.msra.mxu0 %v85_v27  ;;  %252 = vmatpush1.msra.mxu1 %v87_v28 }
  0x4b   :  { %182 = vmatprep.subr.mxu0 %v82_v29  ;;  %253 = vmatprep.subr.mxu1 %v84_v30 }
  0x4c   :  { %183 = vmatpush1.msra.mxu0 %v81_v31  ;;  %254 = vmatpush1.msra.mxu1 %v83_v32 }
  0x4d   :  { %468 = vmatmul.mubr.msk.f32.vlgmr.msra.gmra.mxu0 %vm135_vm1, %v80_v33  ;;  %471 = vmatmul.mubr.msk.f32.vlgmr.msra.gmra.mxu1 %vm135_vm1, %v80_v33 }
 0x10d   :  { %v218_v45 = vpop.f32.mrf.mxu0  ;;  %v289_v46 = vpop.f32.mrf.mxu1 }
 0x10e   :  { %v219_v47 = vadd.f32 %v218_v45, %v118_v41  ;;  %v290_v48 = vadd.f32 %v289_v46, %v126_v42 }
 0x10f   :  { %v220_v49 = vpop.f32.mrf.mxu0  ;;  %v291_v50 = vpop.f32.mrf.mxu1 }
 0x110   :  { %v295_v51 = vsel %vm294_vm2, %v219_v47, 0.0  ;;  %v309_v52 = vsel %vm294_vm2, %v290_v48, 0.0  ;;  %v221_v53 = vadd.f32 %v220_v49, %v122_v43  ;;  %v292_v54 = vadd.f32 %v291_v50, %v130_v44 }
 0x111   :  { %v296_v55 = vrot.slane %v295_v51, 4  ;;  %v310_v56 = vrot.slane %v309_v52, 4 }
 0x112   :  { %v302_v57 = vsel %vm294_vm2, %v221_v53, 0.0  ;;  %v316_v58 = vsel %vm294_vm2, %v292_v54, 0.0 }
 0x113   :  { %v297_v59 = vadd.f32 %v296_v55, %v295_v51  ;;  %v311_v60 = vadd.f32 %v310_v56, %v309_v52  ;;  %v303_v61 = vrot.slane %v302_v57, 4  ;;  %v317_v62 = vrot.slane %v316_v58, 4 }
 0x115   :  { %v298_v63 = vrot.slane %v297_v59, 2  ;;  %v312_v0 = vrot.slane %v311_v60, 2  ;;  %v304_v1 = vadd.f32 %v303_v61, %v302_v57  ;;  %v318_v2 = vadd.f32 %v317_v62, %v316_v58 }
 0x117   :  { %v299_v3 = vadd.f32 %v298_v63, %v297_v59  ;;  %v313_v4 = vadd.f32 %v312_v0, %v311_v60  ;;  %v305_v5 = vrot.slane %v304_v1, 2  ;;  %v319_v6 = vrot.slane %v318_v2, 2 }
 0x119   :  { %v300_v7 = vrot.slane %v299_v3, 1  ;;  %v314_v8 = vrot.slane %v313_v4, 1  ;;  %v306_v9 = vadd.f32 %v305_v5, %v304_v1  ;;  %v320_v10 = vadd.f32 %v319_v6, %v318_v2  ;;  %v380_v6 = vld [vmem:[#allocation7] sm:$0xf] }
 0x11b   :  { %v301_v11 = vadd.f32 %v300_v7, %v299_v3  ;;  %v315_v12 = vadd.f32 %v314_v8, %v313_v4  ;;  %v307_v13 = vrot.slane %v306_v9, 1  ;;  %v321_v14 = vrot.slane %v320_v10, 1  ;;  %v406_v7 = vld [vmem:[#allocation9] sm:$0xf] }
 0x11c   :  { %v385_v8 = vrot.slane %v380_v6, %v652_v36 }
 0x11d   :  { %v324_v15 = vmul.f32 0.5, %v301_v11  ;;  %v326_v16 = vmul.f32 0.5, %v315_v12  ;;  %v308_v17 = vadd.f32 %v307_v13, %v306_v9  ;;  %v322_v18 = vadd.f32 %v321_v14, %v320_v10 }
 0x11e   :  { %v393_v10 = vrot.slane %v380_v6, %v655_v37  ;;  %v411_v13 = vrot.slane %v406_v7, %v652_v36  ;;  %v389_v14 = vrot.slane %v380_v6, %v658_v39  ;;  %v423_v36 = vrot.slane %v406_v7, %v661_v40 }
 0x11f   :  { %v328_v19 = vsub.f32 %v219_v47, %v324_v15  ;;  %v330_v20 = vsub.f32 %v290_v48, %v326_v16  ;;  %v325_v21 = vmul.f32 0.5, %v308_v17  ;;  %v327_v22 = vmul.f32 0.5, %v322_v18 }
 0x120   :  { %v603_v15 = vmov 1983009808  }
 0x121   :  { %v332_v23 = vmul.f32 %v328_v19, %v328_v19  ;;  %v334_v24 = vmul.f32 %v330_v20, %v330_v20  ;;  %v329_v25 = vsub.f32 %v221_v53, %v325_v21  ;;  %v671_v26 = vsub.f32 %v292_v54, %v327_v22 }
 0x122   :  { %v443_v16 = vunpack.c.l.s4 %v603_v15  ;;  %v419_v21 = vrot.slane %v406_v7, %v655_v37  ;;  %v397_v22 = vrot.slane %v380_v6, %v661_v40 }
 0x123   :  { %v336_v27 = vsel %vm294_vm2, %v332_v23, 0.0  ;;  %v350_v28 = vsel %vm294_vm2, %v334_v24, 0.0  ;;  %v333_v29 = vmul.f32 %v329_v25, %v329_v25  ;;  %v335_v30 = vmul.f32 %v671_v26, %v671_v26 }
 0x124   :  { %v337_v31 = vrot.slane %v336_v27, 4  ;;  %v351_v32 = vrot.slane %v350_v28, 4 }
 0x125   :  { %v343_v33 = vsel %vm294_vm2, %v333_v29, 0.0  ;;  %v357_v34 = vsel %vm294_vm2, %v335_v30, 0.0 }
 0x126   :  { %v338_v38 = vadd.f32 %v337_v31, %v336_v27  ;;  %v352_v41 = vadd.f32 %v351_v32, %v350_v28  ;;  %v344_v42 = vrot.slane %v343_v33, 4  ;;  %v358_v43 = vrot.slane %v357_v34, 4 }
 0x127   :  { %v415_v28 = vrot.slane %v406_v7, %v658_v39  ;;  %v444_v32 = vunpack.c.0.s8 %v443_v16 }
 0x128   :  { %v339_v44 = vrot.slane %v338_v38, 2  ;;  %v353_v45 = vrot.slane %v352_v41, 2  ;;  %v345_v46 = vadd.f32 %v344_v42, %v343_v33  ;;  %v359_v47 = vadd.f32 %v358_v43, %v357_v34 }
 0x129   :  { %v447_v42 = vsub.s32 %v444_v32, %v649_v35 }
 0x12a   :  { %v340_v48 = vadd.f32 %v339_v44, %v338_v38  ;;  %v354_v49 = vadd.f32 %v353_v45, %v352_v41  ;;  %v346_v50 = vrot.slane %v345_v46, 2  ;;  %v360_v51 = vrot.slane %v359_v47, 2 }
 0x12c   :  { %v341_v52 = vrot.slane %v340_v48, 1  ;;  %v355_v53 = vrot.slane %v354_v49, 1  ;;  %v347_v54 = vadd.f32 %v346_v50, %v345_v46  ;;  %v361_v55 = vadd.f32 %v360_v51, %v359_v47 }
 0x12e   :  { %v342_v56 = vadd.f32 %v341_v52, %v340_v48  ;;  %v356_v57 = vadd.f32 %v355_v53, %v354_v49  ;;  %v348_v58 = vrot.slane %v347_v54, 1  ;;  %v362_v59 = vrot.slane %v361_v55, 1 }
 0x130   :  { %v364_v60 = vmul.f32 0.5, %v342_v56  ;;  %v366_v61 = vmul.f32 0.5, %v356_v57  ;;  %v349_v62 = vadd.f32 %v348_v58, %v347_v54  ;;  %v363_v63 = vadd.f32 %v362_v59, %v361_v55 }
 0x132   :  { %v368_v0 = vadd.f32 1e-05, %v364_v60  ;;  %v370_v1 = vadd.f32 1e-05, %v366_v61  ;;  %v365_v2 = vmul.f32 0.5, %v349_v62  ;;  %v367_v3 = vmul.f32 0.5, %v363_v63 }
 0x134   :  { %481 = vrsqrt.f32 %v368_v0  ;;  %v369_v4 = vadd.f32 1e-05, %v365_v2  ;;  %v371_v5 = vadd.f32 1e-05, %v367_v3 }
 0x135   :  { %483 = vrsqrt.f32 %v370_v1 }
 0x136   :  { %485 = vrsqrt.f32 %v369_v4 }
 0x137   :  { %487 = vrsqrt.f32 %v371_v5 }
 0x141   :  { %v482_v9 = vpop.eup %481 }
 0x142   :  { %v484_v11 = vpop.eup %483  ;;  %v376_v12 = vmul.f32 %v482_v9, %v328_v19 }
 0x143   :  { %v486_v17 = vpop.eup %485  ;;  %v378_v18 = vmul.f32 %v484_v11, %v330_v20 }
 0x144   :  { %v488_v23 = vpop.eup %487  ;;  %v402_v24 = vmul.f32 %v385_v8, %v376_v12  ;;  %v377_v27 = vmul.f32 %v486_v17, %v329_v25 }
 0x145   :  { %v404_v29 = vmul.f32 %v393_v10, %v378_v18  ;;  %v379_v19 = vmul.f32 %v488_v23, %v671_v26 }
 0x146   :  { %v428_v30 = vadd.f32 %v411_v13, %v402_v24  ;;  %v403_v31 = vmul.f32 %v389_v14, %v377_v27 }
 0x147   :  { %v430_v33 = vadd.f32 %v419_v21, %v404_v29  ;;  %v405_v34 = vmul.f32 %v397_v22, %v379_v19 }
 0x148   :  { %v429_v20 = vadd.f32 %v415_v28, %v403_v31  ;;  %v432_v37 = vmax.f32 %v428_v30, 0.0 }
 0x149   :  { %v431_v38 = vadd.f32 %v423_v36, %v405_v34  ;;  %v434_v43 = vmax.f32 %v430_v33, 0.0 }
 0x14a   :  { %v433_v41 = vmax.f32 %v429_v20, 0.0 }
 0x14b   :  { %v435_v25 = vmax.f32 %v431_v38, 0.0 }
 0x14c   :  { %v440_v44 = vcombine.low %v432_v37, %v433_v41 }
 0x14d   :  { %v441_v39 = vcombine.low %v434_v43, %v435_v25 }
 0x14e   :  { %v448_v45 = vrot.slane %v440_v44, %v447_v42 }
 0x14f   :  { %v455_v46 = vrot.slane %v441_v39, %v447_v42 }
 0x151   :  { %v456_v26 = vcombine.low %v448_v45, %v455_v46 }
 0x153   :  { %458 = vst [vmem:[%s697_s5] sm:$0xff] %v456_v26 }
 0x154   :  { %463 = vsyncpa [#allocation3], 1 }
 0x155   :  { %464 = vsyncpa [#allocation5], 1 }
 0x156   :  { %465 = vsyncpa [#allocation8], 1 }

// kernel: decoder_vae_forward.5
= control target key start
LH: loop header
LB: loop body
LE: loop exit
PB: predicated region body
PF: predicated region fallthrough
CT: control target
= control target key end

     0   :  { %s2998_s18 = smov 0   ;;  %s3000_s19 = smov 0   ;;  %s4768_s0 = inlined_call_operand.vmem [shape: f32[2,512], index: 0, kind: input, shape index: {}]   ;;  %s4769_s1 = inlined_call_operand.vmem [shape: f32[512,2048], index: 1, kind: input, shape index: {}]   ;;  %s4770_s2 = inlined_call_operand.vmem [shape: f32[1,2048], index: 2, kind: input, shape index: {}]   ;;  %s4771_s3 = inlined_call_operand.vmem [shape: f32[1,2048], index: 3, kind: input, shape index: {}]   ;;  %s4772_s4 = inlined_call_operand.vmem [shape: f32[1,2048], index: 4, kind: input, shape index: {}]   ;;  %s4773_s5 = inlined_call_operand.vmem [shape: f32[2,2048], index: 5, kind: output, shape index: {}]  }
   0x1   :  { %s3002_s20 = smov 0  }
   0x2 LB: > { %s2884_s21 = sadd.s32 4294967295, %s2965_s20   ;;  %s3015_s22 = sadd.s32 1, %s2965_s20   ;;  %s2965_s20 = sphi %s3002_s20, %s4776_s20   ;;  %s2961_s19 = sphi %s3000_s19, %s4775_s19   ;;  %s2957_s18 = sphi %s2998_s18, %s4774_s18  }
   0x3   : > { %s40_s23 = ssub.s32 %s2965_s20, %s3015_s22  ;;  %s43_s24 = sadd.s32 1, %s2961_s19 }
   0x4   : > { %p41_p0 = scmp.eq.s32.totalorder %s40_s23, 0  ;;  %p50_p1 = scmp.ne.s32.totalorder %s2961_s19, %s2957_s18 }
   0x5   : > { %p51_p2 = scmp.eq.s32.totalorder %s2965_s20, 0  ;;  %p2887_p4 = scmp.ge.s32.totalorder %s2965_s20, 2 }
   0x6   : > { %s3024_s25 = scalar_select %p41_p0, %s2961_s19, %s43_s24  }
   0x7   : > { %p52_p3 = por %p51_p2, %p50_p1  ;;  %183 = sbr.rel (%p2887_p4) target bundleno = 272 (0x110), region = 20 }
   0xc   : > { %186 = sbr.rel (!%p52_p3) target bundleno = 272 (0x110), region = 24  ;;  %s188_s26 = sand.u32 (%p52_p3), 1, %s2961_s19  }
   0xd   : > { %s2900_s27 = sshll.u32 (%p52_p3), %s2965_s20, 6  ;;  %s2888_s28 = sshll.u32 (%p52_p3), %s188_s26, 12 }
   0xe   : > { %s3032_s6 = scalar_lea.vmem (%p52_p3), %s4769_s1, %s2900_s27  ;;  %s3037_s7 = scalar_lea.vmem (%p52_p3), [#allocation2], %s2888_s28 }
   0xf   : > { %v206_v0 = vld [vmem:[%s3032_s6] sm:$0xff] (%p52_p3)  ;;  %v208_v1 = vld [vmem:[%s3032_s6 + $0x8] sm:$0xff] (%p52_p3)  ;;  %v210_v2 = vld [vmem:[%s3032_s6 + $0x10] sm:$0xff] (%p52_p3) }
  0x10   : > { %207 = vst [vmem:[%s3037_s7] sm:$0xff] (%p52_p3), %v206_v0  ;;  %209 = vst [vmem:[%s3037_s7 + $0x8] sm:$0xff] (%p52_p3), %v208_v1  ;;  %v212_v3 = vld [vmem:[%s3032_s6 + $0x18] sm:$0xff] (%p52_p3)  ;;  %v214_v4 = vld [vmem:[%s3032_s6 + $0x20] sm:$0xff] (%p52_p3) }
  0x11   : > { %211 = vst [vmem:[%s3037_s7 + $0x10] sm:$0xff] %v210_v2  ;;  %v216_v5 = vld [vmem:[%s3032_s6 + $0x28] sm:$0xff]  ;;  %213 = vst [vmem:[%s3037_s7 + $0x18] sm:$0xff] %v212_v3  ;;  %v218_v6 = vld [vmem:[%s3032_s6 + $0x30] sm:$0xff] }
  0x12   : > { %215 = vst [vmem:[%s3037_s7 + $0x20] sm:$0xff] %v214_v4  ;;  %217 = vst [vmem:[%s3037_s7 + $0x28] sm:$0xff] %v216_v5  ;;  %v220_v7 = vld [vmem:[%s3032_s6 + $0x38] sm:$0xff]  ;;  %v222_v8 = vld [vmem:[%s3032_s6 + $0x80] sm:$0xff] }
  0x13   : > { %219 = vst [vmem:[%s3037_s7 + $0x30] sm:$0xff] %v218_v6  ;;  %221 = vst [vmem:[%s3037_s7 + $0x38] sm:$0xff] %v220_v7  ;;  %v224_v9 = vld [vmem:[%s3032_s6 + $0x88] sm:$0xff]  ;;  %v226_v10 = vld [vmem:[%s3032_s6 + $0x90] sm:$0xff] }
  0x14   : > { %223 = vst [vmem:[%s3037_s7 + $0x40] sm:$0xff] %v222_v8  ;;  %v228_v11 = vld [vmem:[%s3032_s6 + $0x98] sm:$0xff]  ;;  %225 = vst [vmem:[%s3037_s7 + $0x48] sm:$0xff] %v224_v9  ;;  %v230_v12 = vld [vmem:[%s3032_s6 + $0xa0] sm:$0xff] }
  0x15   : > { %227 = vst [vmem:[%s3037_s7 + $0x50] sm:$0xff] %v226_v10  ;;  %229 = vst [vmem:[%s3037_s7 + $0x58] sm:$0xff] %v228_v11  ;;  %v232_v13 = vld [vmem:[%s3032_s6 + $0xa8] sm:$0xff]  ;;  %v234_v14 = vld [vmem:[%s3032_s6 + $0xb0] sm:$0xff] }
  0x16   : > { %231 = vst [vmem:[%s3037_s7 + $0x60] sm:$0xff] %v230_v12  ;;  %233 = vst [vmem:[%s3037_s7 + $0x68] sm:$0xff] %v232_v13  ;;  %v236_v15 = vld [vmem:[%s3032_s6 + $0xb8] sm:$0xff]  ;;  %v238_v16 = vld [vmem:[%s3032_s6 + $0x100] sm:$0xff] }
  0x17   : > { %235 = vst [vmem:[%s3037_s7 + $0x70] sm:$0xff] %v234_v14  ;;  %v240_v17 = vld [vmem:[%s3032_s6 + $0x108] sm:$0xff]  ;;  %237 = vst [vmem:[%s3037_s7 + $0x78] sm:$0xff] %v236_v15  ;;  %v242_v18 = vld [vmem:[%s3032_s6 + $0x110] sm:$0xff] }
  0x18   : > { %239 = vst [vmem:[%s3037_s7 + $0x80] sm:$0xff] %v238_v16  ;;  %241 = vst [vmem:[%s3037_s7 + $0x88] sm:$0xff] %v240_v17  ;;  %v244_v19 = vld [vmem:[%s3032_s6 + $0x118] sm:$0xff]  ;;  %v246_v20 = vld [vmem:[%s3032_s6 + $0x120] sm:$0xff] }
  0x19   : > { %243 = vst [vmem:[%s3037_s7 + $0x90] sm:$0xff] %v242_v18  ;;  %245 = vst [vmem:[%s3037_s7 + $0x98] sm:$0xff] %v244_v19  ;;  %v248_v21 = vld [vmem:[%s3032_s6 + $0x128] sm:$0xff]  ;;  %v250_v22 = vld [vmem:[%s3032_s6 + $0x130] sm:$0xff] }
  0x1a   : > { %247 = vst [vmem:[%s3037_s7 + $0xa0] sm:$0xff] %v246_v20  ;;  %v252_v23 = vld [vmem:[%s3032_s6 + $0x138] sm:$0xff]  ;;  %249 = vst [vmem:[%s3037_s7 + $0xa8] sm:$0xff] %v248_v21  ;;  %v254_v24 = vld [vmem:[%s3032_s6 + $0x180] sm:$0xff] }
  0x1b   : > { %251 = vst [vmem:[%s3037_s7 + $0xb0] sm:$0xff] %v250_v22  ;;  %253 = vst [vmem:[%s3037_s7 + $0xb8] sm:$0xff] %v252_v23  ;;  %v256_v25 = vld [vmem:[%s3032_s6 + $0x188] sm:$0xff]  ;;  %v258_v26 = vld [vmem:[%s3032_s6 + $0x190] sm:$0xff] }
  0x1c   : > { %255 = vst [vmem:[%s3037_s7 + $0xc0] sm:$0xff] %v254_v24  ;;  %257 = vst [vmem:[%s3037_s7 + $0xc8] sm:$0xff] %v256_v25  ;;  %v260_v27 = vld [vmem:[%s3032_s6 + $0x198] sm:$0xff]  ;;  %v262_v28 = vld [vmem:[%s3032_s6 + $0x1a0] sm:$0xff] }
  0x1d   : > { %259 = vst [vmem:[%s3037_s7 + $0xd0] sm:$0xff] %v258_v26  ;;  %v264_v29 = vld [vmem:[%s3032_s6 + $0x1a8] sm:$0xff]  ;;  %261 = vst [vmem:[%s3037_s7 + $0xd8] sm:$0xff] %v260_v27  ;;  %v266_v30 = vld [vmem:[%s3032_s6 + $0x1b0] sm:$0xff] }
  0x1e   : > { %263 = vst [vmem:[%s3037_s7 + $0xe0] sm:$0xff] %v262_v28  ;;  %265 = vst [vmem:[%s3037_s7 + $0xe8] sm:$0xff] %v264_v29  ;;  %v268_v31 = vld [vmem:[%s3032_s6 + $0x1b8] sm:$0xff]  ;;  %v270_v32 = vld [vmem:[%s3032_s6 + $0x200] sm:$0xff] }
  0x1f   : > { %267 = vst [vmem:[%s3037_s7 + $0xf0] sm:$0xff] %v266_v30  ;;  %269 = vst [vmem:[%s3037_s7 + $0xf8] sm:$0xff] %v268_v31  ;;  %v272_v33 = vld [vmem:[%s3032_s6 + $0x208] sm:$0xff]  ;;  %v274_v34 = vld [vmem:[%s3032_s6 + $0x210] sm:$0xff] }
  0x20   : > { %271 = vst [vmem:[%s3037_s7 + $0x100] sm:$0xff] %v270_v32  ;;  %v276_v35 = vld [vmem:[%s3032_s6 + $0x218] sm:$0xff]  ;;  %273 = vst [vmem:[%s3037_s7 + $0x108] sm:$0xff] %v272_v33  ;;  %v278_v36 = vld [vmem:[%s3032_s6 + $0x220] sm:$0xff] }
  0x21   : > { %275 = vst [vmem:[%s3037_s7 + $0x110] sm:$0xff] %v274_v34  ;;  %277 = vst [vmem:[%s3037_s7 + $0x118] sm:$0xff] %v276_v35  ;;  %v280_v37 = vld [vmem:[%s3032_s6 + $0x228] sm:$0xff]  ;;  %v282_v38 = vld [vmem:[%s3032_s6 + $0x230] sm:$0xff] }
  0x22   : > { %279 = vst [vmem:[%s3037_s7 + $0x120] sm:$0xff] %v278_v36  ;;  %281 = vst [vmem:[%s3037_s7 + $0x128] sm:$0xff] %v280_v37  ;;  %v284_v39 = vld [vmem:[%s3032_s6 + $0x238] sm:$0xff]  ;;  %v286_v40 = vld [vmem:[%s3032_s6 + $0x280] sm:$0xff] }
  0x23   : > { %283 = vst [vmem:[%s3037_s7 + $0x130] sm:$0xff] %v282_v38  ;;  %v288_v41 = vld [vmem:[%s3032_s6 + $0x288] sm:$0xff]  ;;  %285 = vst [vmem:[%s3037_s7 + $0x138] sm:$0xff] %v284_v39  ;;  %v290_v42 = vld [vmem:[%s3032_s6 + $0x290] sm:$0xff] }
  0x24   : > { %287 = vst [vmem:[%s3037_s7 + $0x140] sm:$0xff] %v286_v40  ;;  %289 = vst [vmem:[%s3037_s7 + $0x148] sm:$0xff] %v288_v41  ;;  %v292_v43 = vld [vmem:[%s3032_s6 + $0x298] sm:$0xff]  ;;  %v294_v44 = vld [vmem:[%s3032_s6 + $0x2a0] sm:$0xff] }
  0x25   : > { %291 = vst [vmem:[%s3037_s7 + $0x150] sm:$0xff] %v290_v42  ;;  %293 = vst [vmem:[%s3037_s7 + $0x158] sm:$0xff] %v292_v43  ;;  %v296_v45 = vld [vmem:[%s3032_s6 + $0x2a8] sm:$0xff]  ;;  %v298_v46 = vld [vmem:[%s3032_s6 + $0x2b0] sm:$0xff] }
  0x26   : > { %295 = vst [vmem:[%s3037_s7 + $0x160] sm:$0xff] %v294_v44  ;;  %v300_v47 = vld [vmem:[%s3032_s6 + $0x2b8] sm:$0xff]  ;;  %297 = vst [vmem:[%s3037_s7 + $0x168] sm:$0xff] %v296_v45  ;;  %v302_v48 = vld [vmem:[%s3032_s6 + $0x300] sm:$0xff] }
  0x27   : > { %299 = vst [vmem:[%s3037_s7 + $0x170] sm:$0xff] %v298_v46  ;;  %301 = vst [vmem:[%s3037_s7 + $0x178] sm:$0xff] %v300_v47  ;;  %v304_v49 = vld [vmem:[%s3032_s6 + $0x308] sm:$0xff]  ;;  %v306_v50 = vld [vmem:[%s3032_s6 + $0x310] sm:$0xff] }
  0x28   : > { %303 = vst [vmem:[%s3037_s7 + $0x180] sm:$0xff] %v302_v48  ;;  %305 = vst [vmem:[%s3037_s7 + $0x188] sm:$0xff] %v304_v49  ;;  %v308_v51 = vld [vmem:[%s3032_s6 + $0x318] sm:$0xff]  ;;  %v310_v52 = vld [vmem:[%s3032_s6 + $0x320] sm:$0xff] }
  0x29   : > { %307 = vst [vmem:[%s3037_s7 + $0x190] sm:$0xff] %v306_v50  ;;  %v312_v53 = vld [vmem:[%s3032_s6 + $0x328] sm:$0xff]  ;;  %309 = vst [vmem:[%s3037_s7 + $0x198] sm:$0xff] %v308_v51  ;;  %v314_v54 = vld [vmem:[%s3032_s6 + $0x330] sm:$0xff] }
  0x2a   : > { %311 = vst [vmem:[%s3037_s7 + $0x1a0] sm:$0xff] %v310_v52  ;;  %313 = vst [vmem:[%s3037_s7 + $0x1a8] sm:$0xff] %v312_v53  ;;  %v316_v55 = vld [vmem:[%s3032_s6 + $0x338] sm:$0xff]  ;;  %v318_v56 = vld [vmem:[%s3032_s6 + $0x380] sm:$0xff] }
  0x2b   : > { %315 = vst [vmem:[%s3037_s7 + $0x1b0] sm:$0xff] %v314_v54  ;;  %317 = vst [vmem:[%s3037_s7 + $0x1b8] sm:$0xff] %v316_v55  ;;  %v320_v57 = vld [vmem:[%s3032_s6 + $0x388] sm:$0xff]  ;;  %v322_v58 = vld [vmem:[%s3032_s6 + $0x390] sm:$0xff] }
  0x2c   : > { %319 = vst [vmem:[%s3037_s7 + $0x1c0] sm:$0xff] %v318_v56  ;;  %v324_v59 = vld [vmem:[%s3032_s6 + $0x398] sm:$0xff]  ;;  %321 = vst [vmem:[%s3037_s7 + $0x1c8] sm:$0xff] %v320_v57  ;;  %v326_v60 = vld [vmem:[%s3032_s6 + $0x3a0] sm:$0xff] }
  0x2d   : > { %323 = vst [vmem:[%s3037_s7 + $0x1d0] sm:$0xff] %v322_v58  ;;  %325 = vst [vmem:[%s3037_s7 + $0x1d8] sm:$0xff] %v324_v59  ;;  %v328_v61 = vld [vmem:[%s3032_s6 + $0x3a8] sm:$0xff]  ;;  %v330_v62 = vld [vmem:[%s3032_s6 + $0x3b0] sm:$0xff] }
  0x2e   : > { %327 = vst [vmem:[%s3037_s7 + $0x1e0] sm:$0xff] %v326_v60  ;;  %329 = vst [vmem:[%s3037_s7 + $0x1e8] sm:$0xff] %v328_v61  ;;  %v332_v63 = vld [vmem:[%s3032_s6 + $0x3b8] sm:$0xff]  ;;  %v334_v0 = vld [vmem:[%s3032_s6 + $0x400] sm:$0xff] }
  0x2f   : > { %331 = vst [vmem:[%s3037_s7 + $0x1f0] sm:$0xff] %v330_v62  ;;  %v336_v1 = vld [vmem:[%s3032_s6 + $0x408] sm:$0xff]  ;;  %333 = vst [vmem:[%s3037_s7 + $0x1f8] sm:$0xff] %v332_v63  ;;  %v338_v2 = vld [vmem:[%s3032_s6 + $0x410] sm:$0xff] }
  0x30   : > { %335 = vst [vmem:[%s3037_s7 + $0x200] sm:$0xff] %v334_v0  ;;  %337 = vst [vmem:[%s3037_s7 + $0x208] sm:$0xff] %v336_v1  ;;  %v340_v3 = vld [vmem:[%s3032_s6 + $0x418] sm:$0xff]  ;;  %v342_v4 = vld [vmem:[%s3032_s6 + $0x420] sm:$0xff] }
  0x31   : > { %339 = vst [vmem:[%s3037_s7 + $0x210] sm:$0xff] %v338_v2  ;;  %341 = vst [vmem:[%s3037_s7 + $0x218] sm:$0xff] %v340_v3  ;;  %v344_v5 = vld [vmem:[%s3032_s6 + $0x428] sm:$0xff]  ;;  %v346_v6 = vld [vmem:[%s3032_s6 + $0x430] sm:$0xff] }
  0x32   : > { %343 = vst [vmem:[%s3037_s7 + $0x220] sm:$0xff] %v342_v4  ;;  %v348_v7 = vld [vmem:[%s3032_s6 + $0x438] sm:$0xff]  ;;  %345 = vst [vmem:[%s3037_s7 + $0x228] sm:$0xff] %v344_v5  ;;  %v350_v8 = vld [vmem:[%s3032_s6 + $0x480] sm:$0xff] }
  0x33   : > { %347 = vst [vmem:[%s3037_s7 + $0x230] sm:$0xff] %v346_v6  ;;  %349 = vst [vmem:[%s3037_s7 + $0x238] sm:$0xff] %v348_v7  ;;  %v352_v9 = vld [vmem:[%s3032_s6 + $0x488] sm:$0xff]  ;;  %v354_v10 = vld [vmem:[%s3032_s6 + $0x490] sm:$0xff] }
  0x34   : > { %351 = vst [vmem:[%s3037_s7 + $0x240] sm:$0xff] %v350_v8  ;;  %353 = vst [vmem:[%s3037_s7 + $0x248] sm:$0xff] %v352_v9  ;;  %v356_v11 = vld [vmem:[%s3032_s6 + $0x498] sm:$0xff]  ;;  %v358_v12 = vld [vmem:[%s3032_s6 + $0x4a0] sm:$0xff] }
  0x35   : > { %355 = vst [vmem:[%s3037_s7 + $0x250] sm:$0xff] %v354_v10  ;;  %v360_v13 = vld [vmem:[%s3032_s6 + $0x4a8] sm:$0xff]  ;;  %357 = vst [vmem:[%s3037_s7 + $0x258] sm:$0xff] %v356_v11  ;;  %v362_v14 = vld [vmem:[%s3032_s6 + $0x4b0] sm:$0xff] }
  0x36   : > { %359 = vst [vmem:[%s3037_s7 + $0x260] sm:$0xff] %v358_v12  ;;  %361 = vst [vmem:[%s3037_s7 + $0x268] sm:$0xff] %v360_v13  ;;  %v364_v15 = vld [vmem:[%s3032_s6 + $0x4b8] sm:$0xff]  ;;  %v366_v16 = vld [vmem:[%s3032_s6 + $0x500] sm:$0xff] }
  0x37   : > { %363 = vst [vmem:[%s3037_s7 + $0x270] sm:$0xff] %v362_v14  ;;  %365 = vst [vmem:[%s3037_s7 + $0x278] sm:$0xff] %v364_v15  ;;  %v368_v17 = vld [vmem:[%s3032_s6 + $0x508] sm:$0xff]  ;;  %v370_v18 = vld [vmem:[%s3032_s6 + $0x510] sm:$0xff] }
  0x38   : > { %367 = vst [vmem:[%s3037_s7 + $0x280] sm:$0xff] %v366_v16  ;;  %v372_v19 = vld [vmem:[%s3032_s6 + $0x518] sm:$0xff]  ;;  %369 = vst [vmem:[%s3037_s7 + $0x288] sm:$0xff] %v368_v17  ;;  %v374_v20 = vld [vmem:[%s3032_s6 + $0x520] sm:$0xff] }
  0x39   : > { %371 = vst [vmem:[%s3037_s7 + $0x290] sm:$0xff] %v370_v18  ;;  %373 = vst [vmem:[%s3037_s7 + $0x298] sm:$0xff] %v372_v19  ;;  %v376_v21 = vld [vmem:[%s3032_s6 + $0x528] sm:$0xff]  ;;  %v378_v22 = vld [vmem:[%s3032_s6 + $0x530] sm:$0xff] }
  0x3a   : > { %375 = vst [vmem:[%s3037_s7 + $0x2a0] sm:$0xff] %v374_v20  ;;  %377 = vst [vmem:[%s3037_s7 + $0x2a8] sm:$0xff] %v376_v21  ;;  %v380_v23 = vld [vmem:[%s3032_s6 + $0x538] sm:$0xff]  ;;  %v382_v24 = vld [vmem:[%s3032_s6 + $0x580] sm:$0xff] }
  0x3b   : > { %379 = vst [vmem:[%s3037_s7 + $0x2b0] sm:$0xff] %v378_v22  ;;  %v384_v25 = vld [vmem:[%s3032_s6 + $0x588] sm:$0xff]  ;;  %381 = vst [vmem:[%s3037_s7 + $0x2b8] sm:$0xff] %v380_v23  ;;  %v386_v26 = vld [vmem:[%s3032_s6 + $0x590] sm:$0xff] }
  0x3c   : > { %383 = vst [vmem:[%s3037_s7 + $0x2c0] sm:$0xff] %v382_v24  ;;  %385 = vst [vmem:[%s3037_s7 + $0x2c8] sm:$0xff] %v384_v25  ;;  %v388_v27 = vld [vmem:[%s3032_s6 + $0x598] sm:$0xff]  ;;  %v390_v28 = vld [vmem:[%s3032_s6 + $0x5a0] sm:$0xff] }
  0x3d   : > { %387 = vst [vmem:[%s3037_s7 + $0x2d0] sm:$0xff] %v386_v26  ;;  %389 = vst [vmem:[%s3037_s7 + $0x2d8] sm:$0xff] %v388_v27  ;;  %v392_v29 = vld [vmem:[%s3032_s6 + $0x5a8] sm:$0xff]  ;;  %v394_v30 = vld [vmem:[%s3032_s6 + $0x5b0] sm:$0xff] }
  0x3e   : > { %391 = vst [vmem:[%s3037_s7 + $0x2e0] sm:$0xff] %v390_v28  ;;  %v396_v31 = vld [vmem:[%s3032_s6 + $0x5b8] sm:$0xff]  ;;  %393 = vst [vmem:[%s3037_s7 + $0x2e8] sm:$0xff] %v392_v29  ;;  %v398_v32 = vld [vmem:[%s3032_s6 + $0x600] sm:$0xff] }
  0x3f   : > { %395 = vst [vmem:[%s3037_s7 + $0x2f0] sm:$0xff] %v394_v30  ;;  %397 = vst [vmem:[%s3037_s7 + $0x2f8] sm:$0xff] %v396_v31  ;;  %v400_v33 = vld [vmem:[%s3032_s6 + $0x608] sm:$0xff]  ;;  %v402_v34 = vld [vmem:[%s3032_s6 + $0x610] sm:$0xff] }
  0x40   : > { %399 = vst [vmem:[%s3037_s7 + $0x300] sm:$0xff] %v398_v32  ;;  %401 = vst [vmem:[%s3037_s7 + $0x308] sm:$0xff] %v400_v33  ;;  %v404_v35 = vld [vmem:[%s3032_s6 + $0x618] sm:$0xff]  ;;  %v406_v36 = vld [vmem:[%s3032_s6 + $0x620] sm:$0xff] }
  0x41   : > { %403 = vst [vmem:[%s3037_s7 + $0x310] sm:$0xff] %v402_v34  ;;  %v408_v37 = vld [vmem:[%s3032_s6 + $0x628] sm:$0xff]  ;;  %405 = vst [vmem:[%s3037_s7 + $0x318] sm:$0xff] %v404_v35  ;;  %v410_v38 = vld [vmem:[%s3032_s6 + $0x630] sm:$0xff] }
  0x42   : > { %407 = vst [vmem:[%s3037_s7 + $0x320] sm:$0xff] %v406_v36  ;;  %409 = vst [vmem:[%s3037_s7 + $0x328] sm:$0xff] %v408_v37  ;;  %v412_v39 = vld [vmem:[%s3032_s6 + $0x638] sm:$0xff]  ;;  %v414_v40 = vld [vmem:[%s3032_s6 + $0x680] sm:$0xff] }
  0x43   : > { %411 = vst [vmem:[%s3037_s7 + $0x330] sm:$0xff] %v410_v38  ;;  %413 = vst [vmem:[%s3037_s7 + $0x338] sm:$0xff] %v412_v39  ;;  %v416_v41 = vld [vmem:[%s3032_s6 + $0x688] sm:$0xff]  ;;  %v418_v42 = vld [vmem:[%s3032_s6 + $0x690] sm:$0xff] }
  0x44   : > { %415 = vst [vmem:[%s3037_s7 + $0x340] sm:$0xff] %v414_v40  ;;  %v420_v43 = vld [vmem:[%s3032_s6 + $0x698] sm:$0xff]  ;;  %417 = vst [vmem:[%s3037_s7 + $0x348] sm:$0xff] %v416_v41  ;;  %v422_v44 = vld [vmem:[%s3032_s6 + $0x6a0] sm:$0xff] }
  0x45   : > { %419 = vst [vmem:[%s3037_s7 + $0x350] sm:$0xff] %v418_v42  ;;  %421 = vst [vmem:[%s3037_s7 + $0x358] sm:$0xff] %v420_v43  ;;  %v424_v45 = vld [vmem:[%s3032_s6 + $0x6a8] sm:$0xff]  ;;  %v426_v46 = vld [vmem:[%s3032_s6 + $0x6b0] sm:$0xff] }
  0x46   : > { %423 = vst [vmem:[%s3037_s7 + $0x360] sm:$0xff] %v422_v44  ;;  %425 = vst [vmem:[%s3037_s7 + $0x368] sm:$0xff] %v424_v45  ;;  %v428_v47 = vld [vmem:[%s3032_s6 + $0x6b8] sm:$0xff]  ;;  %v430_v48 = vld [vmem:[%s3032_s6 + $0x700] sm:$0xff] }
  0x47   : > { %427 = vst [vmem:[%s3037_s7 + $0x370] sm:$0xff] %v426_v46  ;;  %v432_v49 = vld [vmem:[%s3032_s6 + $0x708] sm:$0xff]  ;;  %429 = vst [vmem:[%s3037_s7 + $0x378] sm:$0xff] %v428_v47  ;;  %v434_v50 = vld [vmem:[%s3032_s6 + $0x710] sm:$0xff] }
  0x48   : > { %431 = vst [vmem:[%s3037_s7 + $0x380] sm:$0xff] %v430_v48  ;;  %433 = vst [vmem:[%s3037_s7 + $0x388] sm:$0xff] %v432_v49  ;;  %v436_v51 = vld [vmem:[%s3032_s6 + $0x718] sm:$0xff]  ;;  %v438_v52 = vld [vmem:[%s3032_s6 + $0x720] sm:$0xff] }
  0x49   : > { %435 = vst [vmem:[%s3037_s7 + $0x390] sm:$0xff] %v434_v50  ;;  %437 = vst [vmem:[%s3037_s7 + $0x398] sm:$0xff] %v436_v51  ;;  %v440_v53 = vld [vmem:[%s3032_s6 + $0x728] sm:$0xff]  ;;  %v442_v54 = vld [vmem:[%s3032_s6 + $0x730] sm:$0xff] }
  0x4a   : > { %439 = vst [vmem:[%s3037_s7 + $0x3a0] sm:$0xff] %v438_v52  ;;  %v444_v55 = vld [vmem:[%s3032_s6 + $0x738] sm:$0xff]  ;;  %441 = vst [vmem:[%s3037_s7 + $0x3a8] sm:$0xff] %v440_v53  ;;  %v446_v56 = vld [vmem:[%s3032_s6 + $0x780] sm:$0xff] }
  0x4b   : > { %443 = vst [vmem:[%s3037_s7 + $0x3b0] sm:$0xff] %v442_v54  ;;  %445 = vst [vmem:[%s3037_s7 + $0x3b8] sm:$0xff] %v444_v55  ;;  %v448_v57 = vld [vmem:[%s3032_s6 + $0x788] sm:$0xff]  ;;  %v450_v58 = vld [vmem:[%s3032_s6 + $0x790] sm:$0xff] }
  0x4c   : > { %447 = vst [vmem:[%s3037_s7 + $0x3c0] sm:$0xff] %v446_v56  ;;  %449 = vst [vmem:[%s3037_s7 + $0x3c8] sm:$0xff] %v448_v57  ;;  %v452_v59 = vld [vmem:[%s3032_s6 + $0x798] sm:$0xff]  ;;  %v454_v60 = vld [vmem:[%s3032_s6 + $0x7a0] sm:$0xff] }
  0x4d   : > { %451 = vst [vmem:[%s3037_s7 + $0x3d0] sm:$0xff] %v450_v58  ;;  %v456_v61 = vld [vmem:[%s3032_s6 + $0x7a8] sm:$0xff]  ;;  %453 = vst [vmem:[%s3037_s7 + $0x3d8] sm:$0xff] %v452_v59  ;;  %v458_v62 = vld [vmem:[%s3032_s6 + $0x7b0] sm:$0xff] }
  0x4e   : > { %455 = vst [vmem:[%s3037_s7 + $0x3e0] sm:$0xff] %v454_v60  ;;  %457 = vst [vmem:[%s3037_s7 + $0x3e8] sm:$0xff] %v456_v61  ;;  %v460_v63 = vld [vmem:[%s3032_s6 + $0x7b8] sm:$0xff]  ;;  %v462_v0 = vld [vmem:[%s3032_s6 + $0x800] sm:$0xff] }
  0x4f   : > { %459 = vst [vmem:[%s3037_s7 + $0x3f0] sm:$0xff] %v458_v62  ;;  %461 = vst [vmem:[%s3037_s7 + $0x3f8] sm:$0xff] %v460_v63  ;;  %v464_v1 = vld [vmem:[%s3032_s6 + $0x808] sm:$0xff]  ;;  %v466_v2 = vld [vmem:[%s3032_s6 + $0x810] sm:$0xff] }
  0x50   : > { %463 = vst [vmem:[%s3037_s7 + $0x400] sm:$0xff] %v462_v0  ;;  %v468_v3 = vld [vmem:[%s3032_s6 + $0x818] sm:$0xff]  ;;  %465 = vst [vmem:[%s3037_s7 + $0x408] sm:$0xff] %v464_v1  ;;  %v470_v4 = vld [vmem:[%s3032_s6 + $0x820] sm:$0xff] }
  0x51   : > { %467 = vst [vmem:[%s3037_s7 + $0x410] sm:$0xff] %v466_v2  ;;  %469 = vst [vmem:[%s3037_s7 + $0x418] sm:$0xff] %v468_v3  ;;  %v472_v5 = vld [vmem:[%s3032_s6 + $0x828] sm:$0xff]  ;;  %v474_v6 = vld [vmem:[%s3032_s6 + $0x830] sm:$0xff] }
  0x52   : > { %471 = vst [vmem:[%s3037_s7 + $0x420] sm:$0xff] %v470_v4  ;;  %473 = vst [vmem:[%s3037_s7 + $0x428] sm:$0xff] %v472_v5  ;;  %v476_v7 = vld [vmem:[%s3032_s6 + $0x838] sm:$0xff]  ;;  %v478_v8 = vld [vmem:[%s3032_s6 + $0x880] sm:$0xff] }
  0x53   : > { %475 = vst [vmem:[%s3037_s7 + $0x430] sm:$0xff] %v474_v6  ;;  %v480_v9 = vld [vmem:[%s3032_s6 + $0x888] sm:$0xff]  ;;  %477 = vst [vmem:[%s3037_s7 + $0x438] sm:$0xff] %v476_v7  ;;  %v482_v10 = vld [vmem:[%s3032_s6 + $0x890] sm:$0xff] }
  0x54   : > { %479 = vst [vmem:[%s3037_s7 + $0x440] sm:$0xff] %v478_v8  ;;  %481 = vst [vmem:[%s3037_s7 + $0x448] sm:$0xff] %v480_v9  ;;  %v484_v11 = vld [vmem:[%s3032_s6 + $0x898] sm:$0xff]  ;;  %v486_v12 = vld [vmem:[%s3032_s6 + $0x8a0] sm:$0xff] }
  0x55   : > { %483 = vst [vmem:[%s3037_s7 + $0x450] sm:$0xff] %v482_v10  ;;  %485 = vst [vmem:[%s3037_s7 + $0x458] sm:$0xff] %v484_v11  ;;  %v488_v13 = vld [vmem:[%s3032_s6 + $0x8a8] sm:$0xff]  ;;  %v490_v14 = vld [vmem:[%s3032_s6 + $0x8b0] sm:$0xff] }
  0x56   : > { %487 = vst [vmem:[%s3037_s7 + $0x460] sm:$0xff] %v486_v12  ;;  %v492_v15 = vld [vmem:[%s3032_s6 + $0x8b8] sm:$0xff]  ;;  %489 = vst [vmem:[%s3037_s7 + $0x468] sm:$0xff] %v488_v13  ;;  %v494_v16 = vld [vmem:[%s3032_s6 + $0x900] sm:$0xff] }
  0x57   : > { %491 = vst [vmem:[%s3037_s7 + $0x470] sm:$0xff] %v490_v14  ;;  %493 = vst [vmem:[%s3037_s7 + $0x478] sm:$0xff] %v492_v15  ;;  %v496_v17 = vld [vmem:[%s3032_s6 + $0x908] sm:$0xff]  ;;  %v498_v18 = vld [vmem:[%s3032_s6 + $0x910] sm:$0xff] }
  0x58   : > { %495 = vst [vmem:[%s3037_s7 + $0x480] sm:$0xff] %v494_v16  ;;  %497 = vst [vmem:[%s3037_s7 + $0x488] sm:$0xff] %v496_v17  ;;  %v500_v19 = vld [vmem:[%s3032_s6 + $0x918] sm:$0xff]  ;;  %v502_v20 = vld [vmem:[%s3032_s6 + $0x920] sm:$0xff] }
  0x59   : > { %499 = vst [vmem:[%s3037_s7 + $0x490] sm:$0xff] %v498_v18  ;;  %v504_v21 = vld [vmem:[%s3032_s6 + $0x928] sm:$0xff]  ;;  %501 = vst [vmem:[%s3037_s7 + $0x498] sm:$0xff] %v500_v19  ;;  %v506_v22 = vld [vmem:[%s3032_s6 + $0x930] sm:$0xff] }
  0x5a   : > { %503 = vst [vmem:[%s3037_s7 + $0x4a0] sm:$0xff] %v502_v20  ;;  %505 = vst [vmem:[%s3037_s7 + $0x4a8] sm:$0xff] %v504_v21  ;;  %v508_v23 = vld [vmem:[%s3032_s6 + $0x938] sm:$0xff]  ;;  %v510_v24 = vld [vmem:[%s3032_s6 + $0x980] sm:$0xff] }
  0x5b   : > { %507 = vst [vmem:[%s3037_s7 + $0x4b0] sm:$0xff] %v506_v22  ;;  %509 = vst [vmem:[%s3037_s7 + $0x4b8] sm:$0xff] %v508_v23  ;;  %v512_v25 = vld [vmem:[%s3032_s6 + $0x988] sm:$0xff]  ;;  %v514_v26 = vld [vmem:[%s3032_s6 + $0x990] sm:$0xff] }
  0x5c   : > { %511 = vst [vmem:[%s3037_s7 + $0x4c0] sm:$0xff] %v510_v24  ;;  %v516_v27 = vld [vmem:[%s3032_s6 + $0x998] sm:$0xff]  ;;  %513 = vst [vmem:[%s3037_s7 + $0x4c8] sm:$0xff] %v512_v25  ;;  %v518_v28 = vld [vmem:[%s3032_s6 + $0x9a0] sm:$0xff] }
  0x5d   : > { %515 = vst [vmem:[%s3037_s7 + $0x4d0] sm:$0xff] %v514_v26  ;;  %517 = vst [vmem:[%s3037_s7 + $0x4d8] sm:$0xff] %v516_v27  ;;  %v520_v29 = vld [vmem:[%s3032_s6 + $0x9a8] sm:$0xff]  ;;  %v522_v30 = vld [vmem:[%s3032_s6 + $0x9b0] sm:$0xff] }
  0x5e   : > { %519 = vst [vmem:[%s3037_s7 + $0x4e0] sm:$0xff] %v518_v28  ;;  %521 = vst [vmem:[%s3037_s7 + $0x4e8] sm:$0xff] %v520_v29  ;;  %v524_v31 = vld [vmem:[%s3032_s6 + $0x9b8] sm:$0xff]  ;;  %v526_v32 = vld [vmem:[%s3032_s6 + $0xa00] sm:$0xff] }
  0x5f   : > { %523 = vst [vmem:[%s3037_s7 + $0x4f0] sm:$0xff] %v522_v30  ;;  %v528_v33 = vld [vmem:[%s3032_s6 + $0xa08] sm:$0xff]  ;;  %525 = vst [vmem:[%s3037_s7 + $0x4f8] sm:$0xff] %v524_v31  ;;  %v530_v34 = vld [vmem:[%s3032_s6 + $0xa10] sm:$0xff] }
  0x60   : > { %527 = vst [vmem:[%s3037_s7 + $0x500] sm:$0xff] %v526_v32  ;;  %529 = vst [vmem:[%s3037_s7 + $0x508] sm:$0xff] %v528_v33  ;;  %v532_v35 = vld [vmem:[%s3032_s6 + $0xa18] sm:$0xff]  ;;  %v534_v36 = vld [vmem:[%s3032_s6 + $0xa20] sm:$0xff] }
  0x61   : > { %531 = vst [vmem:[%s3037_s7 + $0x510] sm:$0xff] %v530_v34  ;;  %533 = vst [vmem:[%s3037_s7 + $0x518] sm:$0xff] %v532_v35  ;;  %v536_v37 = vld [vmem:[%s3032_s6 + $0xa28] sm:$0xff]  ;;  %v538_v38 = vld [vmem:[%s3032_s6 + $0xa30] sm:$0xff] }
  0x62   : > { %535 = vst [vmem:[%s3037_s7 + $0x520] sm:$0xff] %v534_v36  ;;  %v540_v39 = vld [vmem:[%s3032_s6 + $0xa38] sm:$0xff]  ;;  %537 = vst [vmem:[%s3037_s7 + $0x528] sm:$0xff] %v536_v37  ;;  %v542_v40 = vld [vmem:[%s3032_s6 + $0xa80] sm:$0xff] }
  0x63   : > { %539 = vst [vmem:[%s3037_s7 + $0x530] sm:$0xff] %v538_v38  ;;  %541 = vst [vmem:[%s3037_s7 + $0x538] sm:$0xff] %v540_v39  ;;  %v544_v41 = vld [vmem:[%s3032_s6 + $0xa88] sm:$0xff]  ;;  %v546_v42 = vld [vmem:[%s3032_s6 + $0xa90] sm:$0xff] }
  0x64   : > { %543 = vst [vmem:[%s3037_s7 + $0x540] sm:$0xff] %v542_v40  ;;  %545 = vst [vmem:[%s3037_s7 + $0x548] sm:$0xff] %v544_v41  ;;  %v548_v43 = vld [vmem:[%s3032_s6 + $0xa98] sm:$0xff]  ;;  %v550_v44 = vld [vmem:[%s3032_s6 + $0xaa0] sm:$0xff] }
  0x65   : > { %547 = vst [vmem:[%s3037_s7 + $0x550] sm:$0xff] %v546_v42  ;;  %v552_v45 = vld [vmem:[%s3032_s6 + $0xaa8] sm:$0xff]  ;;  %549 = vst [vmem:[%s3037_s7 + $0x558] sm:$0xff] %v548_v43  ;;  %v554_v46 = vld [vmem:[%s3032_s6 + $0xab0] sm:$0xff] }
  0x66   : > { %551 = vst [vmem:[%s3037_s7 + $0x560] sm:$0xff] %v550_v44  ;;  %553 = vst [vmem:[%s3037_s7 + $0x568] sm:$0xff] %v552_v45  ;;  %v556_v47 = vld [vmem:[%s3032_s6 + $0xab8] sm:$0xff]  ;;  %v558_v48 = vld [vmem:[%s3032_s6 + $0xb00] sm:$0xff] }
  0x67   : > { %555 = vst [vmem:[%s3037_s7 + $0x570] sm:$0xff] %v554_v46  ;;  %557 = vst [vmem:[%s3037_s7 + $0x578] sm:$0xff] %v556_v47  ;;  %v560_v49 = vld [vmem:[%s3032_s6 + $0xb08] sm:$0xff]  ;;  %v562_v50 = vld [vmem:[%s3032_s6 + $0xb10] sm:$0xff] }
  0x68   : > { %559 = vst [vmem:[%s3037_s7 + $0x580] sm:$0xff] %v558_v48  ;;  %v564_v51 = vld [vmem:[%s3032_s6 + $0xb18] sm:$0xff]  ;;  %561 = vst [vmem:[%s3037_s7 + $0x588] sm:$0xff] %v560_v49  ;;  %v566_v52 = vld [vmem:[%s3032_s6 + $0xb20] sm:$0xff] }
  0x69   : > { %563 = vst [vmem:[%s3037_s7 + $0x590] sm:$0xff] %v562_v50  ;;  %565 = vst [vmem:[%s3037_s7 + $0x598] sm:$0xff] %v564_v51  ;;  %v568_v53 = vld [vmem:[%s3032_s6 + $0xb28] sm:$0xff]  ;;  %v570_v54 = vld [vmem:[%s3032_s6 + $0xb30] sm:$0xff] }
  0x6a   : > { %567 = vst [vmem:[%s3037_s7 + $0x5a0] sm:$0xff] %v566_v52  ;;  %569 = vst [vmem:[%s3037_s7 + $0x5a8] sm:$0xff] %v568_v53  ;;  %v572_v55 = vld [vmem:[%s3032_s6 + $0xb38] sm:$0xff]  ;;  %v574_v56 = vld [vmem:[%s3032_s6 + $0xb80] sm:$0xff] }
  0x6b   : > { %571 = vst [vmem:[%s3037_s7 + $0x5b0] sm:$0xff] %v570_v54  ;;  %v576_v57 = vld [vmem:[%s3032_s6 + $0xb88] sm:$0xff]  ;;  %573 = vst [vmem:[%s3037_s7 + $0x5b8] sm:$0xff] %v572_v55  ;;  %v578_v58 = vld [vmem:[%s3032_s6 + $0xb90] sm:$0xff] }
  0x6c   : > { %575 = vst [vmem:[%s3037_s7 + $0x5c0] sm:$0xff] %v574_v56  ;;  %577 = vst [vmem:[%s3037_s7 + $0x5c8] sm:$0xff] %v576_v57  ;;  %v580_v59 = vld [vmem:[%s3032_s6 + $0xb98] sm:$0xff]  ;;  %v582_v60 = vld [vmem:[%s3032_s6 + $0xba0] sm:$0xff] }
  0x6d   : > { %579 = vst [vmem:[%s3037_s7 + $0x5d0] sm:$0xff] %v578_v58  ;;  %581 = vst [vmem:[%s3037_s7 + $0x5d8] sm:$0xff] %v580_v59  ;;  %v584_v61 = vld [vmem:[%s3032_s6 + $0xba8] sm:$0xff]  ;;  %v586_v62 = vld [vmem:[%s3032_s6 + $0xbb0] sm:$0xff] }
  0x6e   : > { %583 = vst [vmem:[%s3037_s7 + $0x5e0] sm:$0xff] %v582_v60  ;;  %v588_v63 = vld [vmem:[%s3032_s6 + $0xbb8] sm:$0xff]  ;;  %585 = vst [vmem:[%s3037_s7 + $0x5e8] sm:$0xff] %v584_v61  ;;  %v590_v0 = vld [vmem:[%s3032_s6 + $0xc00] sm:$0xff] }
  0x6f   : > { %587 = vst [vmem:[%s3037_s7 + $0x5f0] sm:$0xff] %v586_v62  ;;  %589 = vst [vmem:[%s3037_s7 + $0x5f8] sm:$0xff] %v588_v63  ;;  %v592_v1 = vld [vmem:[%s3032_s6 + $0xc08] sm:$0xff]  ;;  %v594_v2 = vld [vmem:[%s3032_s6 + $0xc10] sm:$0xff] }
  0x70   : > { %591 = vst [vmem:[%s3037_s7 + $0x600] sm:$0xff] %v590_v0  ;;  %593 = vst [vmem:[%s3037_s7 + $0x608] sm:$0xff] %v592_v1  ;;  %v596_v3 = vld [vmem:[%s3032_s6 + $0xc18] sm:$0xff]  ;;  %v598_v4 = vld [vmem:[%s3032_s6 + $0xc20] sm:$0xff] }
  0x71   : > { %595 = vst [vmem:[%s3037_s7 + $0x610] sm:$0xff] %v594_v2  ;;  %v600_v5 = vld [vmem:[%s3032_s6 + $0xc28] sm:$0xff]  ;;  %597 = vst [vmem:[%s3037_s7 + $0x618] sm:$0xff] %v596_v3  ;;  %v602_v6 = vld [vmem:[%s3032_s6 + $0xc30] sm:$0xff] }
  0x72   : > { %599 = vst [vmem:[%s3037_s7 + $0x620] sm:$0xff] %v598_v4  ;;  %601 = vst [vmem:[%s3037_s7 + $0x628] sm:$0xff] %v600_v5  ;;  %v604_v7 = vld [vmem:[%s3032_s6 + $0xc38] sm:$0xff]  ;;  %v606_v8 = vld [vmem:[%s3032_s6 + $0xc80] sm:$0xff] }
  0x73   : > { %603 = vst [vmem:[%s3037_s7 + $0x630] sm:$0xff] %v602_v6  ;;  %605 = vst [vmem:[%s3037_s7 + $0x638] sm:$0xff] %v604_v7  ;;  %v608_v9 = vld [vmem:[%s3032_s6 + $0xc88] sm:$0xff]  ;;  %v610_v10 = vld [vmem:[%s3032_s6 + $0xc90] sm:$0xff] }
  0x74   : > { %607 = vst [vmem:[%s3037_s7 + $0x640] sm:$0xff] %v606_v8  ;;  %v612_v11 = vld [vmem:[%s3032_s6 + $0xc98] sm:$0xff]  ;;  %609 = vst [vmem:[%s3037_s7 + $0x648] sm:$0xff] %v608_v9  ;;  %v614_v12 = vld [vmem:[%s3032_s6 + $0xca0] sm:$0xff] }
  0x75   : > { %611 = vst [vmem:[%s3037_s7 + $0x650] sm:$0xff] %v610_v10  ;;  %613 = vst [vmem:[%s3037_s7 + $0x658] sm:$0xff] %v612_v11  ;;  %v616_v13 = vld [vmem:[%s3032_s6 + $0xca8] sm:$0xff]  ;;  %v618_v14 = vld [vmem:[%s3032_s6 + $0xcb0] sm:$0xff] }
  0x76   : > { %615 = vst [vmem:[%s3037_s7 + $0x660] sm:$0xff] %v614_v12  ;;  %617 = vst [vmem:[%s3037_s7 + $0x668] sm:$0xff] %v616_v13  ;;  %v620_v15 = vld [vmem:[%s3032_s6 + $0xcb8] sm:$0xff]  ;;  %v622_v16 = vld [vmem:[%s3032_s6 + $0xd00] sm:$0xff] }
  0x77   : > { %619 = vst [vmem:[%s3037_s7 + $0x670] sm:$0xff] %v618_v14  ;;  %v624_v17 = vld [vmem:[%s3032_s6 + $0xd08] sm:$0xff]  ;;  %621 = vst [vmem:[%s3037_s7 + $0x678] sm:$0xff] %v620_v15  ;;  %v626_v18 = vld [vmem:[%s3032_s6 + $0xd10] sm:$0xff] }
  0x78   : > { %623 = vst [vmem:[%s3037_s7 + $0x680] sm:$0xff] %v622_v16  ;;  %625 = vst [vmem:[%s3037_s7 + $0x688] sm:$0xff] %v624_v17  ;;  %v628_v19 = vld [vmem:[%s3032_s6 + $0xd18] sm:$0xff]  ;;  %v630_v20 = vld [vmem:[%s3032_s6 + $0xd20] sm:$0xff] }
  0x79   : > { %627 = vst [vmem:[%s3037_s7 + $0x690] sm:$0xff] %v626_v18  ;;  %629 = vst [vmem:[%s3037_s7 + $0x698] sm:$0xff] %v628_v19  ;;  %v632_v21 = vld [vmem:[%s3032_s6 + $0xd28] sm:$0xff]  ;;  %v634_v22 = vld [vmem:[%s3032_s6 + $0xd30] sm:$0xff] }
  0x7a   : > { %631 = vst [vmem:[%s3037_s7 + $0x6a0] sm:$0xff] %v630_v20  ;;  %v636_v23 = vld [vmem:[%s3032_s6 + $0xd38] sm:$0xff]  ;;  %633 = vst [vmem:[%s3037_s7 + $0x6a8] sm:$0xff] %v632_v21  ;;  %v638_v24 = vld [vmem:[%s3032_s6 + $0xd80] sm:$0xff] }
  0x7b   : > { %635 = vst [vmem:[%s3037_s7 + $0x6b0] sm:$0xff] %v634_v22  ;;  %637 = vst [vmem:[%s3037_s7 + $0x6b8] sm:$0xff] %v636_v23  ;;  %v640_v25 = vld [vmem:[%s3032_s6 + $0xd88] sm:$0xff]  ;;  %v642_v26 = vld [vmem:[%s3032_s6 + $0xd90] sm:$0xff] }
  0x7c   : > { %639 = vst [vmem:[%s3037_s7 + $0x6c0] sm:$0xff] %v638_v24  ;;  %641 = vst [vmem:[%s3037_s7 + $0x6c8] sm:$0xff] %v640_v25  ;;  %v644_v27 = vld [vmem:[%s3032_s6 + $0xd98] sm:$0xff]  ;;  %v646_v28 = vld [vmem:[%s3032_s6 + $0xda0] sm:$0xff] }
  0x7d   : > { %643 = vst [vmem:[%s3037_s7 + $0x6d0] sm:$0xff] %v642_v26  ;;  %v648_v29 = vld [vmem:[%s3032_s6 + $0xda8] sm:$0xff]  ;;  %645 = vst [vmem:[%s3037_s7 + $0x6d8] sm:$0xff] %v644_v27  ;;  %v650_v30 = vld [vmem:[%s3032_s6 + $0xdb0] sm:$0xff] }
  0x7e   : > { %647 = vst [vmem:[%s3037_s7 + $0x6e0] sm:$0xff] %v646_v28  ;;  %649 = vst [vmem:[%s3037_s7 + $0x6e8] sm:$0xff] %v648_v29  ;;  %v652_v31 = vld [vmem:[%s3032_s6 + $0xdb8] sm:$0xff]  ;;  %v654_v32 = vld [vmem:[%s3032_s6 + $0xe00] sm:$0xff] }
  0x7f   : > { %651 = vst [vmem:[%s3037_s7 + $0x6f0] sm:$0xff] %v650_v30  ;;  %653 = vst [vmem:[%s3037_s7 + $0x6f8] sm:$0xff] %v652_v31  ;;  %v656_v33 = vld [vmem:[%s3032_s6 + $0xe08] sm:$0xff]  ;;  %v658_v34 = vld [vmem:[%s3032_s6 + $0xe10] sm:$0xff] }
  0x80   : > { %655 = vst [vmem:[%s3037_s7 + $0x700] sm:$0xff] %v654_v32  ;;  %v660_v35 = vld [vmem:[%s3032_s6 + $0xe18] sm:$0xff]  ;;  %657 = vst [vmem:[%s3037_s7 + $0x708] sm:$0xff] %v656_v33  ;;  %v662_v36 = vld [vmem:[%s3032_s6 + $0xe20] sm:$0xff] }
  0x81   : > { %659 = vst [vmem:[%s3037_s7 + $0x710] sm:$0xff] %v658_v34  ;;  %661 = vst [vmem:[%s3037_s7 + $0x718] sm:$0xff] %v660_v35  ;;  %v664_v37 = vld [vmem:[%s3032_s6 + $0xe28] sm:$0xff]  ;;  %v666_v38 = vld [vmem:[%s3032_s6 + $0xe30] sm:$0xff] }
  0x82   : > { %663 = vst [vmem:[%s3037_s7 + $0x720] sm:$0xff] %v662_v36  ;;  %665 = vst [vmem:[%s3037_s7 + $0x728] sm:$0xff] %v664_v37  ;;  %v668_v39 = vld [vmem:[%s3032_s6 + $0xe38] sm:$0xff]  ;;  %v670_v40 = vld [vmem:[%s3032_s6 + $0xe80] sm:$0xff] }
  0x83   : > { %667 = vst [vmem:[%s3037_s7 + $0x730] sm:$0xff] %v666_v38  ;;  %v672_v41 = vld [vmem:[%s3032_s6 + $0xe88] sm:$0xff]  ;;  %669 = vst [vmem:[%s3037_s7 + $0x738] sm:$0xff] %v668_v39  ;;  %v674_v42 = vld [vmem:[%s3032_s6 + $0xe90] sm:$0xff] }
  0x84   : > { %671 = vst [vmem:[%s3037_s7 + $0x740] sm:$0xff] %v670_v40  ;;  %673 = vst [vmem:[%s3037_s7 + $0x748] sm:$0xff] %v672_v41  ;;  %v676_v43 = vld [vmem:[%s3032_s6 + $0xe98] sm:$0xff]  ;;  %v678_v44 = vld [vmem:[%s3032_s6 + $0xea0] sm:$0xff] }
  0x85   : > { %675 = vst [vmem:[%s3037_s7 + $0x750] sm:$0xff] %v674_v42  ;;  %677 = vst [vmem:[%s3037_s7 + $0x758] sm:$0xff] %v676_v43  ;;  %v680_v45 = vld [vmem:[%s3032_s6 + $0xea8] sm:$0xff]  ;;  %v682_v46 = vld [vmem:[%s3032_s6 + $0xeb0] sm:$0xff] }
  0x86   : > { %679 = vst [vmem:[%s3037_s7 + $0x760] sm:$0xff] %v678_v44  ;;  %v684_v47 = vld [vmem:[%s3032_s6 + $0xeb8] sm:$0xff]  ;;  %681 = vst [vmem:[%s3037_s7 + $0x768] sm:$0xff] %v680_v45  ;;  %v686_v48 = vld [vmem:[%s3032_s6 + $0xf00] sm:$0xff] }
  0x87   : > { %683 = vst [vmem:[%s3037_s7 + $0x770] sm:$0xff] %v682_v46  ;;  %685 = vst [vmem:[%s3037_s7 + $0x778] sm:$0xff] %v684_v47  ;;  %v688_v49 = vld [vmem:[%s3032_s6 + $0xf08] sm:$0xff]  ;;  %v690_v50 = vld [vmem:[%s3032_s6 + $0xf10] sm:$0xff] }
  0x88   : > { %687 = vst [vmem:[%s3037_s7 + $0x780] sm:$0xff] %v686_v48  ;;  %689 = vst [vmem:[%s3037_s7 + $0x788] sm:$0xff] %v688_v49  ;;  %v692_v51 = vld [vmem:[%s3032_s6 + $0xf18] sm:$0xff]  ;;  %v694_v52 = vld [vmem:[%s3032_s6 + $0xf20] sm:$0xff] }
  0x89   : > { %691 = vst [vmem:[%s3037_s7 + $0x790] sm:$0xff] %v690_v50  ;;  %v696_v53 = vld [vmem:[%s3032_s6 + $0xf28] sm:$0xff]  ;;  %693 = vst [vmem:[%s3037_s7 + $0x798] sm:$0xff] %v692_v51  ;;  %v698_v54 = vld [vmem:[%s3032_s6 + $0xf30] sm:$0xff] }
  0x8a   : > { %695 = vst [vmem:[%s3037_s7 + $0x7a0] sm:$0xff] %v694_v52  ;;  %697 = vst [vmem:[%s3037_s7 + $0x7a8] sm:$0xff] %v696_v53  ;;  %v700_v55 = vld [vmem:[%s3032_s6 + $0xf38] sm:$0xff]  ;;  %v702_v56 = vld [vmem:[%s3032_s6 + $0xf80] sm:$0xff] }
  0x8b   : > { %699 = vst [vmem:[%s3037_s7 + $0x7b0] sm:$0xff] %v698_v54  ;;  %701 = vst [vmem:[%s3037_s7 + $0x7b8] sm:$0xff] %v700_v55  ;;  %v704_v57 = vld [vmem:[%s3032_s6 + $0xf88] sm:$0xff]  ;;  %v706_v58 = vld [vmem:[%s3032_s6 + $0xf90] sm:$0xff] }
  0x8c   : > { %703 = vst [vmem:[%s3037_s7 + $0x7c0] sm:$0xff] %v702_v56  ;;  %v708_v59 = vld [vmem:[%s3032_s6 + $0xf98] sm:$0xff]  ;;  %705 = vst [vmem:[%s3037_s7 + $0x7c8] sm:$0xff] %v704_v57  ;;  %v710_v60 = vld [vmem:[%s3032_s6 + $0xfa0] sm:$0xff] }
  0x8d   : > { %707 = vst [vmem:[%s3037_s7 + $0x7d0] sm:$0xff] %v706_v58  ;;  %709 = vst [vmem:[%s3037_s7 + $0x7d8] sm:$0xff] %v708_v59  ;;  %v712_v61 = vld [vmem:[%s3032_s6 + $0xfa8] sm:$0xff]  ;;  %v714_v62 = vld [vmem:[%s3032_s6 + $0xfb0] sm:$0xff] }
  0x8e   : > { %711 = vst [vmem:[%s3037_s7 + $0x7e0] sm:$0xff] %v710_v60  ;;  %713 = vst [vmem:[%s3037_s7 + $0x7e8] sm:$0xff] %v712_v61  ;;  %v716_v63 = vld [vmem:[%s3032_s6 + $0xfb8] sm:$0xff]  ;;  %v718_v0 = vld [vmem:[%s3032_s6 + $0x1000] sm:$0xff] }
  0x8f   : > { %715 = vst [vmem:[%s3037_s7 + $0x7f0] sm:$0xff] %v714_v62  ;;  %v720_v1 = vld [vmem:[%s3032_s6 + $0x1008] sm:$0xff]  ;;  %717 = vst [vmem:[%s3037_s7 + $0x7f8] sm:$0xff] %v716_v63  ;;  %v722_v2 = vld [vmem:[%s3032_s6 + $0x1010] sm:$0xff] }
  0x90   : > { %719 = vst [vmem:[%s3037_s7 + $0x800] sm:$0xff] %v718_v0  ;;  %721 = vst [vmem:[%s3037_s7 + $0x808] sm:$0xff] %v720_v1  ;;  %v724_v3 = vld [vmem:[%s3032_s6 + $0x1018] sm:$0xff]  ;;  %v726_v4 = vld [vmem:[%s3032_s6 + $0x1020] sm:$0xff] }
  0x91   : > { %723 = vst [vmem:[%s3037_s7 + $0x810] sm:$0xff] %v722_v2  ;;  %725 = vst [vmem:[%s3037_s7 + $0x818] sm:$0xff] %v724_v3  ;;  %v728_v5 = vld [vmem:[%s3032_s6 + $0x1028] sm:$0xff]  ;;  %v730_v6 = vld [vmem:[%s3032_s6 + $0x1030] sm:$0xff] }
  0x92   : > { %727 = vst [vmem:[%s3037_s7 + $0x820] sm:$0xff] %v726_v4  ;;  %v732_v7 = vld [vmem:[%s3032_s6 + $0x1038] sm:$0xff]  ;;  %729 = vst [vmem:[%s3037_s7 + $0x828] sm:$0xff] %v728_v5  ;;  %v734_v8 = vld [vmem:[%s3032_s6 + $0x1080] sm:$0xff] }
  0x93   : > { %731 = vst [vmem:[%s3037_s7 + $0x830] sm:$0xff] %v730_v6  ;;  %733 = vst [vmem:[%s3037_s7 + $0x838] sm:$0xff] %v732_v7  ;;  %v736_v9 = vld [vmem:[%s3032_s6 + $0x1088] sm:$0xff]  ;;  %v738_v10 = vld [vmem:[%s3032_s6 + $0x1090] sm:$0xff] }
  0x94   : > { %735 = vst [vmem:[%s3037_s7 + $0x840] sm:$0xff] %v734_v8  ;;  %737 = vst [vmem:[%s3037_s7 + $0x848] sm:$0xff] %v736_v9  ;;  %v740_v11 = vld [vmem:[%s3032_s6 + $0x1098] sm:$0xff]  ;;  %v742_v12 = vld [vmem:[%s3032_s6 + $0x10a0] sm:$0xff] }
  0x95   : > { %739 = vst [vmem:[%s3037_s7 + $0x850] sm:$0xff] %v738_v10  ;;  %v744_v13 = vld [vmem:[%s3032_s6 + $0x10a8] sm:$0xff]  ;;  %741 = vst [vmem:[%s3037_s7 + $0x858] sm:$0xff] %v740_v11  ;;  %v746_v14 = vld [vmem:[%s3032_s6 + $0x10b0] sm:$0xff] }
  0x96   : > { %743 = vst [vmem:[%s3037_s7 + $0x860] sm:$0xff] %v742_v12  ;;  %745 = vst [vmem:[%s3037_s7 + $0x868] sm:$0xff] %v744_v13  ;;  %v748_v15 = vld [vmem:[%s3032_s6 + $0x10b8] sm:$0xff]  ;;  %v750_v16 = vld [vmem:[%s3032_s6 + $0x1100] sm:$0xff] }
  0x97   : > { %747 = vst [vmem:[%s3037_s7 + $0x870] sm:$0xff] %v746_v14  ;;  %749 = vst [vmem:[%s3037_s7 + $0x878] sm:$0xff] %v748_v15  ;;  %v752_v17 = vld [vmem:[%s3032_s6 + $0x1108] sm:$0xff]  ;;  %v754_v18 = vld [vmem:[%s3032_s6 + $0x1110] sm:$0xff] }
  0x98   : > { %751 = vst [vmem:[%s3037_s7 + $0x880] sm:$0xff] %v750_v16  ;;  %v756_v19 = vld [vmem:[%s3032_s6 + $0x1118] sm:$0xff]  ;;  %753 = vst [vmem:[%s3037_s7 + $0x888] sm:$0xff] %v752_v17  ;;  %v758_v20 = vld [vmem:[%s3032_s6 + $0x1120] sm:$0xff] }
  0x99   : > { %755 = vst [vmem:[%s3037_s7 + $0x890] sm:$0xff] %v754_v18  ;;  %757 = vst [vmem:[%s3037_s7 + $0x898] sm:$0xff] %v756_v19  ;;  %v760_v21 = vld [vmem:[%s3032_s6 + $0x1128] sm:$0xff]  ;;  %v762_v22 = vld [vmem:[%s3032_s6 + $0x1130] sm:$0xff] }
  0x9a   : > { %759 = vst [vmem:[%s3037_s7 + $0x8a0] sm:$0xff] %v758_v20  ;;  %761 = vst [vmem:[%s3037_s7 + $0x8a8] sm:$0xff] %v760_v21  ;;  %v764_v23 = vld [vmem:[%s3032_s6 + $0x1138] sm:$0xff]  ;;  %v766_v24 = vld [vmem:[%s3032_s6 + $0x1180] sm:$0xff] }
  0x9b   : > { %763 = vst [vmem:[%s3037_s7 + $0x8b0] sm:$0xff] %v762_v22  ;;  %v768_v25 = vld [vmem:[%s3032_s6 + $0x1188] sm:$0xff]  ;;  %765 = vst [vmem:[%s3037_s7 + $0x8b8] sm:$0xff] %v764_v23  ;;  %v770_v26 = vld [vmem:[%s3032_s6 + $0x1190] sm:$0xff] }
  0x9c   : > { %767 = vst [vmem:[%s3037_s7 + $0x8c0] sm:$0xff] %v766_v24  ;;  %769 = vst [vmem:[%s3037_s7 + $0x8c8] sm:$0xff] %v768_v25  ;;  %v772_v27 = vld [vmem:[%s3032_s6 + $0x1198] sm:$0xff]  ;;  %v774_v28 = vld [vmem:[%s3032_s6 + $0x11a0] sm:$0xff] }
  0x9d   : > { %771 = vst [vmem:[%s3037_s7 + $0x8d0] sm:$0xff] %v770_v26  ;;  %773 = vst [vmem:[%s3037_s7 + $0x8d8] sm:$0xff] %v772_v27  ;;  %v776_v29 = vld [vmem:[%s3032_s6 + $0x11a8] sm:$0xff]  ;;  %v778_v30 = vld [vmem:[%s3032_s6 + $0x11b0] sm:$0xff] }
  0x9e   : > { %775 = vst [vmem:[%s3037_s7 + $0x8e0] sm:$0xff] %v774_v28  ;;  %v780_v31 = vld [vmem:[%s3032_s6 + $0x11b8] sm:$0xff]  ;;  %777 = vst [vmem:[%s3037_s7 + $0x8e8] sm:$0xff] %v776_v29  ;;  %v782_v32 = vld [vmem:[%s3032_s6 + $0x1200] sm:$0xff] }
  0x9f   : > { %779 = vst [vmem:[%s3037_s7 + $0x8f0] sm:$0xff] %v778_v30  ;;  %781 = vst [vmem:[%s3037_s7 + $0x8f8] sm:$0xff] %v780_v31  ;;  %v784_v33 = vld [vmem:[%s3032_s6 + $0x1208] sm:$0xff]  ;;  %v786_v34 = vld [vmem:[%s3032_s6 + $0x1210] sm:$0xff] }
  0xa0   : > { %783 = vst [vmem:[%s3037_s7 + $0x900] sm:$0xff] %v782_v32  ;;  %785 = vst [vmem:[%s3037_s7 + $0x908] sm:$0xff] %v784_v33  ;;  %v788_v35 = vld [vmem:[%s3032_s6 + $0x1218] sm:$0xff]  ;;  %v790_v36 = vld [vmem:[%s3032_s6 + $0x1220] sm:$0xff] }
  0xa1   : > { %787 = vst [vmem:[%s3037_s7 + $0x910] sm:$0xff] %v786_v34  ;;  %v792_v37 = vld [vmem:[%s3032_s6 + $0x1228] sm:$0xff]  ;;  %789 = vst [vmem:[%s3037_s7 + $0x918] sm:$0xff] %v788_v35  ;;  %v794_v38 = vld [vmem:[%s3032_s6 + $0x1230] sm:$0xff] }
  0xa2   : > { %791 = vst [vmem:[%s3037_s7 + $0x920] sm:$0xff] %v790_v36  ;;  %793 = vst [vmem:[%s3037_s7 + $0x928] sm:$0xff] %v792_v37  ;;  %v796_v39 = vld [vmem:[%s3032_s6 + $0x1238] sm:$0xff]  ;;  %v798_v40 = vld [vmem:[%s3032_s6 + $0x1280] sm:$0xff] }
  0xa3   : > { %795 = vst [vmem:[%s3037_s7 + $0x930] sm:$0xff] %v794_v38  ;;  %797 = vst [vmem:[%s3037_s7 + $0x938] sm:$0xff] %v796_v39  ;;  %v800_v41 = vld [vmem:[%s3032_s6 + $0x1288] sm:$0xff]  ;;  %v802_v42 = vld [vmem:[%s3032_s6 + $0x1290] sm:$0xff] }
  0xa4   : > { %799 = vst [vmem:[%s3037_s7 + $0x940] sm:$0xff] %v798_v40  ;;  %v804_v43 = vld [vmem:[%s3032_s6 + $0x1298] sm:$0xff]  ;;  %801 = vst [vmem:[%s3037_s7 + $0x948] sm:$0xff] %v800_v41  ;;  %v806_v44 = vld [vmem:[%s3032_s6 + $0x12a0] sm:$0xff] }
  0xa5   : > { %803 = vst [vmem:[%s3037_s7 + $0x950] sm:$0xff] %v802_v42  ;;  %805 = vst [vmem:[%s3037_s7 + $0x958] sm:$0xff] %v804_v43  ;;  %v808_v45 = vld [vmem:[%s3032_s6 + $0x12a8] sm:$0xff]  ;;  %v810_v46 = vld [vmem:[%s3032_s6 + $0x12b0] sm:$0xff] }
  0xa6   : > { %807 = vst [vmem:[%s3037_s7 + $0x960] sm:$0xff] %v806_v44  ;;  %809 = vst [vmem:[%s3037_s7 + $0x968] sm:$0xff] %v808_v45  ;;  %v812_v47 = vld [vmem:[%s3032_s6 + $0x12b8] sm:$0xff]  ;;  %v814_v48 = vld [vmem:[%s3032_s6 + $0x1300] sm:$0xff] }
  0xa7   : > { %811 = vst [vmem:[%s3037_s7 + $0x970] sm:$0xff] %v810_v46  ;;  %v816_v49 = vld [vmem:[%s3032_s6 + $0x1308] sm:$0xff]  ;;  %813 = vst [vmem:[%s3037_s7 + $0x978] sm:$0xff] %v812_v47  ;;  %v818_v50 = vld [vmem:[%s3032_s6 + $0x1310] sm:$0xff] }
  0xa8   : > { %815 = vst [vmem:[%s3037_s7 + $0x980] sm:$0xff] %v814_v48  ;;  %817 = vst [vmem:[%s3037_s7 + $0x988] sm:$0xff] %v816_v49  ;;  %v820_v51 = vld [vmem:[%s3032_s6 + $0x1318] sm:$0xff]  ;;  %v822_v52 = vld [vmem:[%s3032_s6 + $0x1320] sm:$0xff] }
  0xa9   : > { %819 = vst [vmem:[%s3037_s7 + $0x990] sm:$0xff] %v818_v50  ;;  %821 = vst [vmem:[%s3037_s7 + $0x998] sm:$0xff] %v820_v51  ;;  %v824_v53 = vld [vmem:[%s3032_s6 + $0x1328] sm:$0xff]  ;;  %v826_v54 = vld [vmem:[%s3032_s6 + $0x1330] sm:$0xff] }
  0xaa   : > { %823 = vst [vmem:[%s3037_s7 + $0x9a0] sm:$0xff] %v822_v52  ;;  %v828_v55 = vld [vmem:[%s3032_s6 + $0x1338] sm:$0xff]  ;;  %825 = vst [vmem:[%s3037_s7 + $0x9a8] sm:$0xff] %v824_v53  ;;  %v830_v56 = vld [vmem:[%s3032_s6 + $0x1380] sm:$0xff] }
  0xab   : > { %827 = vst [vmem:[%s3037_s7 + $0x9b0] sm:$0xff] %v826_v54  ;;  %829 = vst [vmem:[%s3037_s7 + $0x9b8] sm:$0xff] %v828_v55  ;;  %v832_v57 = vld [vmem:[%s3032_s6 + $0x1388] sm:$0xff]  ;;  %v834_v58 = vld [vmem:[%s3032_s6 + $0x1390] sm:$0xff] }
  0xac   : > { %831 = vst [vmem:[%s3037_s7 + $0x9c0] sm:$0xff] %v830_v56  ;;  %833 = vst [vmem:[%s3037_s7 + $0x9c8] sm:$0xff] %v832_v57  ;;  %v836_v59 = vld [vmem:[%s3032_s6 + $0x1398] sm:$0xff]  ;;  %v838_v60 = vld [vmem:[%s3032_s6 + $0x13a0] sm:$0xff] }
  0xad   : > { %835 = vst [vmem:[%s3037_s7 + $0x9d0] sm:$0xff] %v834_v58  ;;  %v840_v61 = vld [vmem:[%s3032_s6 + $0x13a8] sm:$0xff]  ;;  %837 = vst [vmem:[%s3037_s7 + $0x9d8] sm:$0xff] %v836_v59  ;;  %v842_v62 = vld [vmem:[%s3032_s6 + $0x13b0] sm:$0xff] }
  0xae   : > { %839 = vst [vmem:[%s3037_s7 + $0x9e0] sm:$0xff] %v838_v60  ;;  %841 = vst [vmem:[%s3037_s7 + $0x9e8] sm:$0xff] %v840_v61  ;;  %v844_v63 = vld [vmem:[%s3032_s6 + $0x13b8] sm:$0xff]  ;;  %v846_v0 = vld [vmem:[%s3032_s6 + $0x1400] sm:$0xff] }
  0xaf   : > { %843 = vst [vmem:[%s3037_s7 + $0x9f0] sm:$0xff] %v842_v62  ;;  %845 = vst [vmem:[%s3037_s7 + $0x9f8] sm:$0xff] %v844_v63  ;;  %v848_v1 = vld [vmem:[%s3032_s6 + $0x1408] sm:$0xff]  ;;  %v850_v2 = vld [vmem:[%s3032_s6 + $0x1410] sm:$0xff] }
  0xb0   : > { %847 = vst [vmem:[%s3037_s7 + $0xa00] sm:$0xff] %v846_v0  ;;  %v852_v3 = vld [vmem:[%s3032_s6 + $0x1418] sm:$0xff]  ;;  %849 = vst [vmem:[%s3037_s7 + $0xa08] sm:$0xff] %v848_v1  ;;  %v854_v4 = vld [vmem:[%s3032_s6 + $0x1420] sm:$0xff] }
  0xb1   : > { %851 = vst [vmem:[%s3037_s7 + $0xa10] sm:$0xff] %v850_v2  ;;  %853 = vst [vmem:[%s3037_s7 + $0xa18] sm:$0xff] %v852_v3  ;;  %v856_v5 = vld [vmem:[%s3032_s6 + $0x1428] sm:$0xff]  ;;  %v858_v6 = vld [vmem:[%s3032_s6 + $0x1430] sm:$0xff] }
  0xb2   : > { %855 = vst [vmem:[%s3037_s7 + $0xa20] sm:$0xff] %v854_v4  ;;  %857 = vst [vmem:[%s3037_s7 + $0xa28] sm:$0xff] %v856_v5  ;;  %v860_v7 = vld [vmem:[%s3032_s6 + $0x1438] sm:$0xff]  ;;  %v862_v8 = vld [vmem:[%s3032_s6 + $0x1480] sm:$0xff] }
  0xb3   : > { %859 = vst [vmem:[%s3037_s7 + $0xa30] sm:$0xff] %v858_v6  ;;  %v864_v9 = vld [vmem:[%s3032_s6 + $0x1488] sm:$0xff]  ;;  %861 = vst [vmem:[%s3037_s7 + $0xa38] sm:$0xff] %v860_v7  ;;  %v866_v10 = vld [vmem:[%s3032_s6 + $0x1490] sm:$0xff] }
  0xb4   : > { %863 = vst [vmem:[%s3037_s7 + $0xa40] sm:$0xff] %v862_v8  ;;  %865 = vst [vmem:[%s3037_s7 + $0xa48] sm:$0xff] %v864_v9  ;;  %v868_v11 = vld [vmem:[%s3032_s6 + $0x1498] sm:$0xff]  ;;  %v870_v12 = vld [vmem:[%s3032_s6 + $0x14a0] sm:$0xff] }
  0xb5   : > { %867 = vst [vmem:[%s3037_s7 + $0xa50] sm:$0xff] %v866_v10  ;;  %869 = vst [vmem:[%s3037_s7 + $0xa58] sm:$0xff] %v868_v11  ;;  %v872_v13 = vld [vmem:[%s3032_s6 + $0x14a8] sm:$0xff]  ;;  %v874_v14 = vld [vmem:[%s3032_s6 + $0x14b0] sm:$0xff] }
  0xb6   : > { %871 = vst [vmem:[%s3037_s7 + $0xa60] sm:$0xff] %v870_v12  ;;  %v876_v15 = vld [vmem:[%s3032_s6 + $0x14b8] sm:$0xff]  ;;  %873 = vst [vmem:[%s3037_s7 + $0xa68] sm:$0xff] %v872_v13  ;;  %v878_v16 = vld [vmem:[%s3032_s6 + $0x1500] sm:$0xff] }
  0xb7   : > { %875 = vst [vmem:[%s3037_s7 + $0xa70] sm:$0xff] %v874_v14  ;;  %877 = vst [vmem:[%s3037_s7 + $0xa78] sm:$0xff] %v876_v15  ;;  %v880_v17 = vld [vmem:[%s3032_s6 + $0x1508] sm:$0xff]  ;;  %v882_v18 = vld [vmem:[%s3032_s6 + $0x1510] sm:$0xff] }
  0xb8   : > { %879 = vst [vmem:[%s3037_s7 + $0xa80] sm:$0xff] %v878_v16  ;;  %881 = vst [vmem:[%s3037_s7 + $0xa88] sm:$0xff] %v880_v17  ;;  %v884_v19 = vld [vmem:[%s3032_s6 + $0x1518] sm:$0xff]  ;;  %v886_v20 = vld [vmem:[%s3032_s6 + $0x1520] sm:$0xff] }
  0xb9   : > { %883 = vst [vmem:[%s3037_s7 + $0xa90] sm:$0xff] %v882_v18  ;;  %v888_v21 = vld [vmem:[%s3032_s6 + $0x1528] sm:$0xff]  ;;  %885 = vst [vmem:[%s3037_s7 + $0xa98] sm:$0xff] %v884_v19  ;;  %v890_v22 = vld [vmem:[%s3032_s6 + $0x1530] sm:$0xff] }
  0xba   : > { %887 = vst [vmem:[%s3037_s7 + $0xaa0] sm:$0xff] %v886_v20  ;;  %889 = vst [vmem:[%s3037_s7 + $0xaa8] sm:$0xff] %v888_v21  ;;  %v892_v23 = vld [vmem:[%s3032_s6 + $0x1538] sm:$0xff]  ;;  %v894_v24 = vld [vmem:[%s3032_s6 + $0x1580] sm:$0xff] }
  0xbb   : > { %891 = vst [vmem:[%s3037_s7 + $0xab0] sm:$0xff] %v890_v22  ;;  %893 = vst [vmem:[%s3037_s7 + $0xab8] sm:$0xff] %v892_v23  ;;  %v896_v25 = vld [vmem:[%s3032_s6 + $0x1588] sm:$0xff]  ;;  %v898_v26 = vld [vmem:[%s3032_s6 + $0x1590] sm:$0xff] }
  0xbc   : > { %895 = vst [vmem:[%s3037_s7 + $0xac0] sm:$0xff] %v894_v24  ;;  %v900_v27 = vld [vmem:[%s3032_s6 + $0x1598] sm:$0xff]  ;;  %897 = vst [vmem:[%s3037_s7 + $0xac8] sm:$0xff] %v896_v25  ;;  %v902_v28 = vld [vmem:[%s3032_s6 + $0x15a0] sm:$0xff] }
  0xbd   : > { %899 = vst [vmem:[%s3037_s7 + $0xad0] sm:$0xff] %v898_v26  ;;  %901 = vst [vmem:[%s3037_s7 + $0xad8] sm:$0xff] %v900_v27  ;;  %v904_v29 = vld [vmem:[%s3032_s6 + $0x15a8] sm:$0xff]  ;;  %v906_v30 = vld [vmem:[%s3032_s6 + $0x15b0] sm:$0xff] }
  0xbe   : > { %903 = vst [vmem:[%s3037_s7 + $0xae0] sm:$0xff] %v902_v28  ;;  %905 = vst [vmem:[%s3037_s7 + $0xae8] sm:$0xff] %v904_v29  ;;  %v908_v31 = vld [vmem:[%s3032_s6 + $0x15b8] sm:$0xff]  ;;  %v910_v32 = vld [vmem:[%s3032_s6 + $0x1600] sm:$0xff] }
  0xbf   : > { %907 = vst [vmem:[%s3037_s7 + $0xaf0] sm:$0xff] %v906_v30  ;;  %v912_v33 = vld [vmem:[%s3032_s6 + $0x1608] sm:$0xff]  ;;  %909 = vst [vmem:[%s3037_s7 + $0xaf8] sm:$0xff] %v908_v31  ;;  %v914_v34 = vld [vmem:[%s3032_s6 + $0x1610] sm:$0xff] }
  0xc0   : > { %911 = vst [vmem:[%s3037_s7 + $0xb00] sm:$0xff] %v910_v32  ;;  %913 = vst [vmem:[%s3037_s7 + $0xb08] sm:$0xff] %v912_v33  ;;  %v916_v35 = vld [vmem:[%s3032_s6 + $0x1618] sm:$0xff]  ;;  %v918_v36 = vld [vmem:[%s3032_s6 + $0x1620] sm:$0xff] }
  0xc1   : > { %915 = vst [vmem:[%s3037_s7 + $0xb10] sm:$0xff] %v914_v34  ;;  %917 = vst [vmem:[%s3037_s7 + $0xb18] sm:$0xff] %v916_v35  ;;  %v920_v37 = vld [vmem:[%s3032_s6 + $0x1628] sm:$0xff]  ;;  %v922_v38 = vld [vmem:[%s3032_s6 + $0x1630] sm:$0xff] }
  0xc2   : > { %919 = vst [vmem:[%s3037_s7 + $0xb20] sm:$0xff] %v918_v36  ;;  %v924_v39 = vld [vmem:[%s3032_s6 + $0x1638] sm:$0xff]  ;;  %921 = vst [vmem:[%s3037_s7 + $0xb28] sm:$0xff] %v920_v37  ;;  %v926_v40 = vld [vmem:[%s3032_s6 + $0x1680] sm:$0xff] }
  0xc3   : > { %923 = vst [vmem:[%s3037_s7 + $0xb30] sm:$0xff] %v922_v38  ;;  %925 = vst [vmem:[%s3037_s7 + $0xb38] sm:$0xff] %v924_v39  ;;  %v928_v41 = vld [vmem:[%s3032_s6 + $0x1688] sm:$0xff]  ;;  %v930_v42 = vld [vmem:[%s3032_s6 + $0x1690] sm:$0xff] }
  0xc4   : > { %927 = vst [vmem:[%s3037_s7 + $0xb40] sm:$0xff] %v926_v40  ;;  %929 = vst [vmem:[%s3037_s7 + $0xb48] sm:$0xff] %v928_v41  ;;  %v932_v43 = vld [vmem:[%s3032_s6 + $0x1698] sm:$0xff]  ;;  %v934_v44 = vld [vmem:[%s3032_s6 + $0x16a0] sm:$0xff] }
  0xc5   : > { %931 = vst [vmem:[%s3037_s7 + $0xb50] sm:$0xff] %v930_v42  ;;  %v936_v45 = vld [vmem:[%s3032_s6 + $0x16a8] sm:$0xff]  ;;  %933 = vst [vmem:[%s3037_s7 + $0xb58] sm:$0xff] %v932_v43  ;;  %v938_v46 = vld [vmem:[%s3032_s6 + $0x16b0] sm:$0xff] }
  0xc6   : > { %935 = vst [vmem:[%s3037_s7 + $0xb60] sm:$0xff] %v934_v44  ;;  %937 = vst [vmem:[%s3037_s7 + $0xb68] sm:$0xff] %v936_v45  ;;  %v940_v47 = vld [vmem:[%s3032_s6 + $0x16b8] sm:$0xff]  ;;  %v942_v48 = vld [vmem:[%s3032_s6 + $0x1700] sm:$0xff] }
  0xc7   : > { %939 = vst [vmem:[%s3037_s7 + $0xb70] sm:$0xff] %v938_v46  ;;  %941 = vst [vmem:[%s3037_s7 + $0xb78] sm:$0xff] %v940_v47  ;;  %v944_v49 = vld [vmem:[%s3032_s6 + $0x1708] sm:$0xff]  ;;  %v946_v50 = vld [vmem:[%s3032_s6 + $0x1710] sm:$0xff] }
  0xc8   : > { %943 = vst [vmem:[%s3037_s7 + $0xb80] sm:$0xff] %v942_v48  ;;  %v948_v51 = vld [vmem:[%s3032_s6 + $0x1718] sm:$0xff]  ;;  %945 = vst [vmem:[%s3037_s7 + $0xb88] sm:$0xff] %v944_v49  ;;  %v950_v52 = vld [vmem:[%s3032_s6 + $0x1720] sm:$0xff] }
  0xc9   : > { %947 = vst [vmem:[%s3037_s7 + $0xb90] sm:$0xff] %v946_v50  ;;  %949 = vst [vmem:[%s3037_s7 + $0xb98] sm:$0xff] %v948_v51  ;;  %v952_v53 = vld [vmem:[%s3032_s6 + $0x1728] sm:$0xff]  ;;  %v954_v54 = vld [vmem:[%s3032_s6 + $0x1730] sm:$0xff] }
  0xca   : > { %951 = vst [vmem:[%s3037_s7 + $0xba0] sm:$0xff] %v950_v52  ;;  %953 = vst [vmem:[%s3037_s7 + $0xba8] sm:$0xff] %v952_v53  ;;  %v956_v55 = vld [vmem:[%s3032_s6 + $0x1738] sm:$0xff]  ;;  %v958_v56 = vld [vmem:[%s3032_s6 + $0x1780] sm:$0xff] }
  0xcb   : > { %955 = vst [vmem:[%s3037_s7 + $0xbb0] sm:$0xff] %v954_v54  ;;  %v960_v57 = vld [vmem:[%s3032_s6 + $0x1788] sm:$0xff]  ;;  %957 = vst [vmem:[%s3037_s7 + $0xbb8] sm:$0xff] %v956_v55  ;;  %v962_v58 = vld [vmem:[%s3032_s6 + $0x1790] sm:$0xff] }
  0xcc   : > { %959 = vst [vmem:[%s3037_s7 + $0xbc0] sm:$0xff] %v958_v56  ;;  %961 = vst [vmem:[%s3037_s7 + $0xbc8] sm:$0xff] %v960_v57  ;;  %v964_v59 = vld [vmem:[%s3032_s6 + $0x1798] sm:$0xff]  ;;  %v966_v60 = vld [vmem:[%s3032_s6 + $0x17a0] sm:$0xff] }
  0xcd   : > { %963 = vst [vmem:[%s3037_s7 + $0xbd0] sm:$0xff] %v962_v58  ;;  %965 = vst [vmem:[%s3037_s7 + $0xbd8] sm:$0xff] %v964_v59  ;;  %v968_v61 = vld [vmem:[%s3032_s6 + $0x17a8] sm:$0xff]  ;;  %v970_v62 = vld [vmem:[%s3032_s6 + $0x17b0] sm:$0xff] }
  0xce   : > { %967 = vst [vmem:[%s3037_s7 + $0xbe0] sm:$0xff] %v966_v60  ;;  %v972_v63 = vld [vmem:[%s3032_s6 + $0x17b8] sm:$0xff]  ;;  %969 = vst [vmem:[%s3037_s7 + $0xbe8] sm:$0xff] %v968_v61  ;;  %v974_v0 = vld [vmem:[%s3032_s6 + $0x1800] sm:$0xff] }
  0xcf   : > { %971 = vst [vmem:[%s3037_s7 + $0xbf0] sm:$0xff] %v970_v62  ;;  %973 = vst [vmem:[%s3037_s7 + $0xbf8] sm:$0xff] %v972_v63  ;;  %v976_v1 = vld [vmem:[%s3032_s6 + $0x1808] sm:$0xff]  ;;  %v978_v2 = vld [vmem:[%s3032_s6 + $0x1810] sm:$0xff] }
  0xd0   : > { %975 = vst [vmem:[%s3037_s7 + $0xc00] sm:$0xff] %v974_v0  ;;  %977 = vst [vmem:[%s3037_s7 + $0xc08] sm:$0xff] %v976_v1  ;;  %v980_v3 = vld [vmem:[%s3032_s6 + $0x1818] sm:$0xff]  ;;  %v982_v4 = vld [vmem:[%s3032_s6 + $0x1820] sm:$0xff] }
  0xd1   : > { %979 = vst [vmem:[%s3037_s7 + $0xc10] sm:$0xff] %v978_v2  ;;  %v984_v5 = vld [vmem:[%s3032_s6 + $0x1828] sm:$0xff]  ;;  %981 = vst [vmem:[%s3037_s7 + $0xc18] sm:$0xff] %v980_v3  ;;  %v986_v6 = vld [vmem:[%s3032_s6 + $0x1830] sm:$0xff] }
  0xd2   : > { %983 = vst [vmem:[%s3037_s7 + $0xc20] sm:$0xff] %v982_v4  ;;  %985 = vst [vmem:[%s3037_s7 + $0xc28] sm:$0xff] %v984_v5  ;;  %v988_v7 = vld [vmem:[%s3032_s6 + $0x1838] sm:$0xff]  ;;  %v990_v8 = vld [vmem:[%s3032_s6 + $0x1880] sm:$0xff] }
  0xd3   : > { %987 = vst [vmem:[%s3037_s7 + $0xc30] sm:$0xff] %v986_v6  ;;  %989 = vst [vmem:[%s3037_s7 + $0xc38] sm:$0xff] %v988_v7  ;;  %v992_v9 = vld [vmem:[%s3032_s6 + $0x1888] sm:$0xff]  ;;  %v994_v10 = vld [vmem:[%s3032_s6 + $0x1890] sm:$0xff] }
  0xd4   : > { %991 = vst [vmem:[%s3037_s7 + $0xc40] sm:$0xff] %v990_v8  ;;  %v996_v11 = vld [vmem:[%s3032_s6 + $0x1898] sm:$0xff]  ;;  %993 = vst [vmem:[%s3037_s7 + $0xc48] sm:$0xff] %v992_v9  ;;  %v998_v12 = vld [vmem:[%s3032_s6 + $0x18a0] sm:$0xff] }
  0xd5   : > { %995 = vst [vmem:[%s3037_s7 + $0xc50] sm:$0xff] %v994_v10  ;;  %997 = vst [vmem:[%s3037_s7 + $0xc58] sm:$0xff] %v996_v11  ;;  %v1000_v13 = vld [vmem:[%s3032_s6 + $0x18a8] sm:$0xff]  ;;  %v1002_v14 = vld [vmem:[%s3032_s6 + $0x18b0] sm:$0xff] }
  0xd6   : > { %999 = vst [vmem:[%s3037_s7 + $0xc60] sm:$0xff] %v998_v12  ;;  %1001 = vst [vmem:[%s3037_s7 + $0xc68] sm:$0xff] %v1000_v13  ;;  %v1004_v15 = vld [vmem:[%s3032_s6 + $0x18b8] sm:$0xff]  ;;  %v1006_v16 = vld [vmem:[%s3032_s6 + $0x1900] sm:$0xff] }
  0xd7   : > { %1003 = vst [vmem:[%s3037_s7 + $0xc70] sm:$0xff] %v1002_v14  ;;  %v1008_v17 = vld [vmem:[%s3032_s6 + $0x1908] sm:$0xff]  ;;  %1005 = vst [vmem:[%s3037_s7 + $0xc78] sm:$0xff] %v1004_v15  ;;  %v1010_v18 = vld [vmem:[%s3032_s6 + $0x1910] sm:$0xff] }
  0xd8   : > { %1007 = vst [vmem:[%s3037_s7 + $0xc80] sm:$0xff] %v1006_v16  ;;  %1009 = vst [vmem:[%s3037_s7 + $0xc88] sm:$0xff] %v1008_v17  ;;  %v1012_v19 = vld [vmem:[%s3032_s6 + $0x1918] sm:$0xff]  ;;  %v1014_v20 = vld [vmem:[%s3032_s6 + $0x1920] sm:$0xff] }
  0xd9   : > { %1011 = vst [vmem:[%s3037_s7 + $0xc90] sm:$0xff] %v1010_v18  ;;  %1013 = vst [vmem:[%s3037_s7 + $0xc98] sm:$0xff] %v1012_v19  ;;  %v1016_v21 = vld [vmem:[%s3032_s6 + $0x1928] sm:$0xff]  ;;  %v1018_v22 = vld [vmem:[%s3032_s6 + $0x1930] sm:$0xff] }
  0xda   : > { %1015 = vst [vmem:[%s3037_s7 + $0xca0] sm:$0xff] %v1014_v20  ;;  %v1020_v23 = vld [vmem:[%s3032_s6 + $0x1938] sm:$0xff]  ;;  %1017 = vst [vmem:[%s3037_s7 + $0xca8] sm:$0xff] %v1016_v21  ;;  %v1022_v24 = vld [vmem:[%s3032_s6 + $0x1980] sm:$0xff] }
  0xdb   : > { %1019 = vst [vmem:[%s3037_s7 + $0xcb0] sm:$0xff] %v1018_v22  ;;  %1021 = vst [vmem:[%s3037_s7 + $0xcb8] sm:$0xff] %v1020_v23  ;;  %v1024_v25 = vld [vmem:[%s3032_s6 + $0x1988] sm:$0xff]  ;;  %v1026_v26 = vld [vmem:[%s3032_s6 + $0x1990] sm:$0xff] }
  0xdc   : > { %1023 = vst [vmem:[%s3037_s7 + $0xcc0] sm:$0xff] %v1022_v24  ;;  %1025 = vst [vmem:[%s3037_s7 + $0xcc8] sm:$0xff] %v1024_v25  ;;  %v1028_v27 = vld [vmem:[%s3032_s6 + $0x1998] sm:$0xff]  ;;  %v1030_v28 = vld [vmem:[%s3032_s6 + $0x19a0] sm:$0xff] }
  0xdd   : > { %1027 = vst [vmem:[%s3037_s7 + $0xcd0] sm:$0xff] %v1026_v26  ;;  %v1032_v29 = vld [vmem:[%s3032_s6 + $0x19a8] sm:$0xff]  ;;  %1029 = vst [vmem:[%s3037_s7 + $0xcd8] sm:$0xff] %v1028_v27  ;;  %v1034_v30 = vld [vmem:[%s3032_s6 + $0x19b0] sm:$0xff] }
  0xde   : > { %1031 = vst [vmem:[%s3037_s7 + $0xce0] sm:$0xff] %v1030_v28  ;;  %1033 = vst [vmem:[%s3037_s7 + $0xce8] sm:$0xff] %v1032_v29  ;;  %v1036_v31 = vld [vmem:[%s3032_s6 + $0x19b8] sm:$0xff]  ;;  %v1038_v32 = vld [vmem:[%s3032_s6 + $0x1a00] sm:$0xff] }
  0xdf   : > { %1035 = vst [vmem:[%s3037_s7 + $0xcf0] sm:$0xff] %v1034_v30  ;;  %1037 = vst [vmem:[%s3037_s7 + $0xcf8] sm:$0xff] %v1036_v31  ;;  %v1040_v33 = vld [vmem:[%s3032_s6 + $0x1a08] sm:$0xff]  ;;  %v1042_v34 = vld [vmem:[%s3032_s6 + $0x1a10] sm:$0xff] }
  0xe0   : > { %1039 = vst [vmem:[%s3037_s7 + $0xd00] sm:$0xff] %v1038_v32  ;;  %v1044_v35 = vld [vmem:[%s3032_s6 + $0x1a18] sm:$0xff]  ;;  %1041 = vst [vmem:[%s3037_s7 + $0xd08] sm:$0xff] %v1040_v33  ;;  %v1046_v36 = vld [vmem:[%s3032_s6 + $0x1a20] sm:$0xff] }
  0xe1   : > { %1043 = vst [vmem:[%s3037_s7 + $0xd10] sm:$0xff] %v1042_v34  ;;  %1045 = vst [vmem:[%s3037_s7 + $0xd18] sm:$0xff] %v1044_v35  ;;  %v1048_v37 = vld [vmem:[%s3032_s6 + $0x1a28] sm:$0xff]  ;;  %v1050_v38 = vld [vmem:[%s3032_s6 + $0x1a30] sm:$0xff] }
  0xe2   : > { %1047 = vst [vmem:[%s3037_s7 + $0xd20] sm:$0xff] %v1046_v36  ;;  %1049 = vst [vmem:[%s3037_s7 + $0xd28] sm:$0xff] %v1048_v37  ;;  %v1052_v39 = vld [vmem:[%s3032_s6 + $0x1a38] sm:$0xff]  ;;  %v1054_v40 = vld [vmem:[%s3032_s6 + $0x1a80] sm:$0xff] }
  0xe3   : > { %1051 = vst [vmem:[%s3037_s7 + $0xd30] sm:$0xff] %v1050_v38  ;;  %v1056_v41 = vld [vmem:[%s3032_s6 + $0x1a88] sm:$0xff]  ;;  %1053 = vst [vmem:[%s3037_s7 + $0xd38] sm:$0xff] %v1052_v39  ;;  %v1058_v42 = vld [vmem:[%s3032_s6 + $0x1a90] sm:$0xff] }
  0xe4   : > { %1055 = vst [vmem:[%s3037_s7 + $0xd40] sm:$0xff] %v1054_v40  ;;  %1057 = vst [vmem:[%s3037_s7 + $0xd48] sm:$0xff] %v1056_v41  ;;  %v1060_v43 = vld [vmem:[%s3032_s6 + $0x1a98] sm:$0xff]  ;;  %v1062_v44 = vld [vmem:[%s3032_s6 + $0x1aa0] sm:$0xff] }
  0xe5   : > { %1059 = vst [vmem:[%s3037_s7 + $0xd50] sm:$0xff] %v1058_v42  ;;  %1061 = vst [vmem:[%s3037_s7 + $0xd58] sm:$0xff] %v1060_v43  ;;  %v1064_v45 = vld [vmem:[%s3032_s6 + $0x1aa8] sm:$0xff]  ;;  %v1066_v46 = vld [vmem:[%s3032_s6 + $0x1ab0] sm:$0xff] }
  0xe6   : > { %1063 = vst [vmem:[%s3037_s7 + $0xd60] sm:$0xff] %v1062_v44  ;;  %v1068_v47 = vld [vmem:[%s3032_s6 + $0x1ab8] sm:$0xff]  ;;  %1065 = vst [vmem:[%s3037_s7 + $0xd68] sm:$0xff] %v1064_v45  ;;  %v1070_v48 = vld [vmem:[%s3032_s6 + $0x1b00] sm:$0xff] }
  0xe7   : > { %1067 = vst [vmem:[%s3037_s7 + $0xd70] sm:$0xff] %v1066_v46  ;;  %1069 = vst [vmem:[%s3037_s7 + $0xd78] sm:$0xff] %v1068_v47  ;;  %v1072_v49 = vld [vmem:[%s3032_s6 + $0x1b08] sm:$0xff]  ;;  %v1074_v50 = vld [vmem:[%s3032_s6 + $0x1b10] sm:$0xff] }
  0xe8   : > { %1071 = vst [vmem:[%s3037_s7 + $0xd80] sm:$0xff] %v1070_v48  ;;  %1073 = vst [vmem:[%s3037_s7 + $0xd88] sm:$0xff] %v1072_v49  ;;  %v1076_v51 = vld [vmem:[%s3032_s6 + $0x1b18] sm:$0xff]  ;;  %v1078_v52 = vld [vmem:[%s3032_s6 + $0x1b20] sm:$0xff] }
  0xe9   : > { %1075 = vst [vmem:[%s3037_s7 + $0xd90] sm:$0xff] %v1074_v50  ;;  %v1080_v53 = vld [vmem:[%s3032_s6 + $0x1b28] sm:$0xff]  ;;  %1077 = vst [vmem:[%s3037_s7 + $0xd98] sm:$0xff] %v1076_v51  ;;  %v1082_v54 = vld [vmem:[%s3032_s6 + $0x1b30] sm:$0xff] }
  0xea   : > { %1079 = vst [vmem:[%s3037_s7 + $0xda0] sm:$0xff] %v1078_v52  ;;  %1081 = vst [vmem:[%s3037_s7 + $0xda8] sm:$0xff] %v1080_v53  ;;  %v1084_v55 = vld [vmem:[%s3032_s6 + $0x1b38] sm:$0xff]  ;;  %v1086_v56 = vld [vmem:[%s3032_s6 + $0x1b80] sm:$0xff] }
  0xeb   : > { %1083 = vst [vmem:[%s3037_s7 + $0xdb0] sm:$0xff] %v1082_v54  ;;  %1085 = vst [vmem:[%s3037_s7 + $0xdb8] sm:$0xff] %v1084_v55  ;;  %v1088_v57 = vld [vmem:[%s3032_s6 + $0x1b88] sm:$0xff]  ;;  %v1090_v58 = vld [vmem:[%s3032_s6 + $0x1b90] sm:$0xff] }
  0xec   : > { %1087 = vst [vmem:[%s3037_s7 + $0xdc0] sm:$0xff] %v1086_v56  ;;  %v1092_v59 = vld [vmem:[%s3032_s6 + $0x1b98] sm:$0xff]  ;;  %1089 = vst [vmem:[%s3037_s7 + $0xdc8] sm:$0xff] %v1088_v57  ;;  %v1094_v60 = vld [vmem:[%s3032_s6 + $0x1ba0] sm:$0xff] }
  0xed   : > { %1091 = vst [vmem:[%s3037_s7 + $0xdd0] sm:$0xff] %v1090_v58  ;;  %1093 = vst [vmem:[%s3037_s7 + $0xdd8] sm:$0xff] %v1092_v59  ;;  %v1096_v61 = vld [vmem:[%s3032_s6 + $0x1ba8] sm:$0xff]  ;;  %v1098_v62 = vld [vmem:[%s3032_s6 + $0x1bb0] sm:$0xff] }
  0xee   : > { %1095 = vst [vmem:[%s3037_s7 + $0xde0] sm:$0xff] %v1094_v60  ;;  %1097 = vst [vmem:[%s3037_s7 + $0xde8] sm:$0xff] %v1096_v61  ;;  %v1100_v63 = vld [vmem:[%s3032_s6 + $0x1bb8] sm:$0xff]  ;;  %v1102_v0 = vld [vmem:[%s3032_s6 + $0x1c00] sm:$0xff] }
  0xef   : > { %1099 = vst [vmem:[%s3037_s7 + $0xdf0] sm:$0xff] %v1098_v62  ;;  %v1104_v1 = vld [vmem:[%s3032_s6 + $0x1c08] sm:$0xff]  ;;  %1101 = vst [vmem:[%s3037_s7 + $0xdf8] sm:$0xff] %v1100_v63  ;;  %v1106_v2 = vld [vmem:[%s3032_s6 + $0x1c10] sm:$0xff] }
  0xf0   : > { %1103 = vst [vmem:[%s3037_s7 + $0xe00] sm:$0xff] %v1102_v0  ;;  %1105 = vst [vmem:[%s3037_s7 + $0xe08] sm:$0xff] %v1104_v1  ;;  %v1108_v3 = vld [vmem:[%s3032_s6 + $0x1c18] sm:$0xff]  ;;  %v1110_v4 = vld [vmem:[%s3032_s6 + $0x1c20] sm:$0xff] }
  0xf1   : > { %1107 = vst [vmem:[%s3037_s7 + $0xe10] sm:$0xff] %v1106_v2  ;;  %1109 = vst [vmem:[%s3037_s7 + $0xe18] sm:$0xff] %v1108_v3  ;;  %v1112_v5 = vld [vmem:[%s3032_s6 + $0x1c28] sm:$0xff]  ;;  %v1114_v6 = vld [vmem:[%s3032_s6 + $0x1c30] sm:$0xff] }
  0xf2   : > { %1111 = vst [vmem:[%s3037_s7 + $0xe20] sm:$0xff] %v1110_v4  ;;  %v1116_v7 = vld [vmem:[%s3032_s6 + $0x1c38] sm:$0xff]  ;;  %1113 = vst [vmem:[%s3037_s7 + $0xe28] sm:$0xff] %v1112_v5  ;;  %v1118_v8 = vld [vmem:[%s3032_s6 + $0x1c80] sm:$0xff] }
  0xf3   : > { %1115 = vst [vmem:[%s3037_s7 + $0xe30] sm:$0xff] %v1114_v6  ;;  %1117 = vst [vmem:[%s3037_s7 + $0xe38] sm:$0xff] %v1116_v7  ;;  %v1120_v9 = vld [vmem:[%s3032_s6 + $0x1c88] sm:$0xff]  ;;  %v1122_v10 = vld [vmem:[%s3032_s6 + $0x1c90] sm:$0xff] }
  0xf4   : > { %1119 = vst [vmem:[%s3037_s7 + $0xe40] sm:$0xff] %v1118_v8  ;;  %1121 = vst [vmem:[%s3037_s7 + $0xe48] sm:$0xff] %v1120_v9  ;;  %v1124_v11 = vld [vmem:[%s3032_s6 + $0x1c98] sm:$0xff]  ;;  %v1126_v12 = vld [vmem:[%s3032_s6 + $0x1ca0] sm:$0xff] }
  0xf5   : > { %1123 = vst [vmem:[%s3037_s7 + $0xe50] sm:$0xff] %v1122_v10  ;;  %v1128_v13 = vld [vmem:[%s3032_s6 + $0x1ca8] sm:$0xff]  ;;  %1125 = vst [vmem:[%s3037_s7 + $0xe58] sm:$0xff] %v1124_v11  ;;  %v1130_v14 = vld [vmem:[%s3032_s6 + $0x1cb0] sm:$0xff] }
  0xf6   : > { %1127 = vst [vmem:[%s3037_s7 + $0xe60] sm:$0xff] %v1126_v12  ;;  %1129 = vst [vmem:[%s3037_s7 + $0xe68] sm:$0xff] %v1128_v13  ;;  %v1132_v15 = vld [vmem:[%s3032_s6 + $0x1cb8] sm:$0xff]  ;;  %v1134_v16 = vld [vmem:[%s3032_s6 + $0x1d00] sm:$0xff] }
  0xf7   : > { %1131 = vst [vmem:[%s3037_s7 + $0xe70] sm:$0xff] %v1130_v14  ;;  %1133 = vst [vmem:[%s3037_s7 + $0xe78] sm:$0xff] %v1132_v15  ;;  %v1136_v17 = vld [vmem:[%s3032_s6 + $0x1d08] sm:$0xff]  ;;  %v1138_v18 = vld [vmem:[%s3032_s6 + $0x1d10] sm:$0xff] }
  0xf8   : > { %1135 = vst [vmem:[%s3037_s7 + $0xe80] sm:$0xff] %v1134_v16  ;;  %v1140_v19 = vld [vmem:[%s3032_s6 + $0x1d18] sm:$0xff]  ;;  %1137 = vst [vmem:[%s3037_s7 + $0xe88] sm:$0xff] %v1136_v17  ;;  %v1142_v20 = vld [vmem:[%s3032_s6 + $0x1d20] sm:$0xff] }
  0xf9   : > { %1139 = vst [vmem:[%s3037_s7 + $0xe90] sm:$0xff] %v1138_v18  ;;  %1141 = vst [vmem:[%s3037_s7 + $0xe98] sm:$0xff] %v1140_v19  ;;  %v1144_v21 = vld [vmem:[%s3032_s6 + $0x1d28] sm:$0xff]  ;;  %v1146_v22 = vld [vmem:[%s3032_s6 + $0x1d30] sm:$0xff] }
  0xfa   : > { %1143 = vst [vmem:[%s3037_s7 + $0xea0] sm:$0xff] %v1142_v20  ;;  %1145 = vst [vmem:[%s3037_s7 + $0xea8] sm:$0xff] %v1144_v21  ;;  %v1148_v23 = vld [vmem:[%s3032_s6 + $0x1d38] sm:$0xff]  ;;  %v1150_v24 = vld [vmem:[%s3032_s6 + $0x1d80] sm:$0xff] }
  0xfb   : > { %1147 = vst [vmem:[%s3037_s7 + $0xeb0] sm:$0xff] %v1146_v22  ;;  %v1152_v25 = vld [vmem:[%s3032_s6 + $0x1d88] sm:$0xff]  ;;  %1149 = vst [vmem:[%s3037_s7 + $0xeb8] sm:$0xff] %v1148_v23  ;;  %v1154_v26 = vld [vmem:[%s3032_s6 + $0x1d90] sm:$0xff] }
  0xfc   : > { %1151 = vst [vmem:[%s3037_s7 + $0xec0] sm:$0xff] %v1150_v24  ;;  %1153 = vst [vmem:[%s3037_s7 + $0xec8] sm:$0xff] %v1152_v25  ;;  %v1156_v27 = vld [vmem:[%s3032_s6 + $0x1d98] sm:$0xff]  ;;  %v1158_v28 = vld [vmem:[%s3032_s6 + $0x1da0] sm:$0xff] }
  0xfd   : > { %1155 = vst [vmem:[%s3037_s7 + $0xed0] sm:$0xff] %v1154_v26  ;;  %1157 = vst [vmem:[%s3037_s7 + $0xed8] sm:$0xff] %v1156_v27  ;;  %v1160_v29 = vld [vmem:[%s3032_s6 + $0x1da8] sm:$0xff]  ;;  %v1162_v30 = vld [vmem:[%s3032_s6 + $0x1db0] sm:$0xff] }
  0xfe   : > { %1159 = vst [vmem:[%s3037_s7 + $0xee0] sm:$0xff] %v1158_v28  ;;  %v1164_v31 = vld [vmem:[%s3032_s6 + $0x1db8] sm:$0xff]  ;;  %1161 = vst [vmem:[%s3037_s7 + $0xee8] sm:$0xff] %v1160_v29  ;;  %v1166_v32 = vld [vmem:[%s3032_s6 + $0x1e00] sm:$0xff] }
  0xff   : > { %1163 = vst [vmem:[%s3037_s7 + $0xef0] sm:$0xff] %v1162_v30  ;;  %1165 = vst [vmem:[%s3037_s7 + $0xef8] sm:$0xff] %v1164_v31  ;;  %v1168_v33 = vld [vmem:[%s3032_s6 + $0x1e08] sm:$0xff]  ;;  %v1170_v34 = vld [vmem:[%s3032_s6 + $0x1e10] sm:$0xff] }
 0x100   : > { %1167 = vst [vmem:[%s3037_s7 + $0xf00] sm:$0xff] %v1166_v32  ;;  %1169 = vst [vmem:[%s3037_s7 + $0xf08] sm:$0xff] %v1168_v33  ;;  %v1172_v35 = vld [vmem:[%s3032_s6 + $0x1e18] sm:$0xff]  ;;  %v1174_v36 = vld [vmem:[%s3032_s6 + $0x1e20] sm:$0xff] }
 0x101   : > { %1171 = vst [vmem:[%s3037_s7 + $0xf10] sm:$0xff] %v1170_v34  ;;  %v1176_v37 = vld [vmem:[%s3032_s6 + $0x1e28] sm:$0xff]  ;;  %1173 = vst [vmem:[%s3037_s7 + $0xf18] sm:$0xff] %v1172_v35  ;;  %v1178_v38 = vld [vmem:[%s3032_s6 + $0x1e30] sm:$0xff] }
 0x102   : > { %1175 = vst [vmem:[%s3037_s7 + $0xf20] sm:$0xff] %v1174_v36  ;;  %1177 = vst [vmem:[%s3037_s7 + $0xf28] sm:$0xff] %v1176_v37  ;;  %v1180_v39 = vld [vmem:[%s3032_s6 + $0x1e38] sm:$0xff]  ;;  %v1182_v40 = vld [vmem:[%s3032_s6 + $0x1e80] sm:$0xff] }
 0x103   : > { %1179 = vst [vmem:[%s3037_s7 + $0xf30] sm:$0xff] %v1178_v38  ;;  %1181 = vst [vmem:[%s3037_s7 + $0xf38] sm:$0xff] %v1180_v39  ;;  %v1184_v41 = vld [vmem:[%s3032_s6 + $0x1e88] sm:$0xff]  ;;  %v1186_v42 = vld [vmem:[%s3032_s6 + $0x1e90] sm:$0xff] }
 0x104   : > { %1183 = vst [vmem:[%s3037_s7 + $0xf40] sm:$0xff] %v1182_v40  ;;  %v1188_v43 = vld [vmem:[%s3032_s6 + $0x1e98] sm:$0xff]  ;;  %1185 = vst [vmem:[%s3037_s7 + $0xf48] sm:$0xff] %v1184_v41  ;;  %v1190_v44 = vld [vmem:[%s3032_s6 + $0x1ea0] sm:$0xff] }
 0x105   : > { %1187 = vst [vmem:[%s3037_s7 + $0xf50] sm:$0xff] %v1186_v42  ;;  %1189 = vst [vmem:[%s3037_s7 + $0xf58] sm:$0xff] %v1188_v43  ;;  %v1192_v45 = vld [vmem:[%s3032_s6 + $0x1ea8] sm:$0xff]  ;;  %v1194_v46 = vld [vmem:[%s3032_s6 + $0x1eb0] sm:$0xff] }
 0x106   : > { %1191 = vst [vmem:[%s3037_s7 + $0xf60] sm:$0xff] %v1190_v44  ;;  %1193 = vst [vmem:[%s3037_s7 + $0xf68] sm:$0xff] %v1192_v45  ;;  %v1196_v47 = vld [vmem:[%s3032_s6 + $0x1eb8] sm:$0xff]  ;;  %v1198_v48 = vld [vmem:[%s3032_s6 + $0x1f00] sm:$0xff] }
 0x107   : > { %1195 = vst [vmem:[%s3037_s7 + $0xf70] sm:$0xff] %v1194_v46  ;;  %v1200_v49 = vld [vmem:[%s3032_s6 + $0x1f08] sm:$0xff]  ;;  %1197 = vst [vmem:[%s3037_s7 + $0xf78] sm:$0xff] %v1196_v47  ;;  %v1202_v50 = vld [vmem:[%s3032_s6 + $0x1f10] sm:$0xff] }
 0x108   : > { %1199 = vst [vmem:[%s3037_s7 + $0xf80] sm:$0xff] %v1198_v48  ;;  %1201 = vst [vmem:[%s3037_s7 + $0xf88] sm:$0xff] %v1200_v49  ;;  %v1204_v51 = vld [vmem:[%s3032_s6 + $0x1f18] sm:$0xff]  ;;  %v1206_v52 = vld [vmem:[%s3032_s6 + $0x1f20] sm:$0xff] }
 0x109   : > { %1203 = vst [vmem:[%s3037_s7 + $0xf90] sm:$0xff] %v1202_v50  ;;  %1205 = vst [vmem:[%s3037_s7 + $0xf98] sm:$0xff] %v1204_v51  ;;  %v1208_v53 = vld [vmem:[%s3032_s6 + $0x1f28] sm:$0xff]  ;;  %v1210_v54 = vld [vmem:[%s3032_s6 + $0x1f30] sm:$0xff] }
 0x10a   : > { %1207 = vst [vmem:[%s3037_s7 + $0xfa0] sm:$0xff] %v1206_v52  ;;  %v1212_v55 = vld [vmem:[%s3032_s6 + $0x1f38] sm:$0xff]  ;;  %1209 = vst [vmem:[%s3037_s7 + $0xfa8] sm:$0xff] %v1208_v53  ;;  %v1214_v56 = vld [vmem:[%s3032_s6 + $0x1f80] sm:$0xff] }
 0x10b   : > { %1211 = vst [vmem:[%s3037_s7 + $0xfb0] sm:$0xff] %v1210_v54  ;;  %1213 = vst [vmem:[%s3037_s7 + $0xfb8] sm:$0xff] %v1212_v55  ;;  %v1216_v57 = vld [vmem:[%s3032_s6 + $0x1f88] sm:$0xff]  ;;  %v1218_v58 = vld [vmem:[%s3032_s6 + $0x1f90] sm:$0xff] }
 0x10c   : > { %1215 = vst [vmem:[%s3037_s7 + $0xfc0] sm:$0xff] %v1214_v56  ;;  %1217 = vst [vmem:[%s3037_s7 + $0xfc8] sm:$0xff] %v1216_v57  ;;  %v1220_v59 = vld [vmem:[%s3032_s6 + $0x1f98] sm:$0xff]  ;;  %v1222_v60 = vld [vmem:[%s3032_s6 + $0x1fa0] sm:$0xff] }
 0x10d   : > { %1219 = vst [vmem:[%s3037_s7 + $0xfd0] sm:$0xff] %v1218_v58  ;;  %v1224_v61 = vld [vmem:[%s3032_s6 + $0x1fa8] sm:$0xff]  ;;  %1221 = vst [vmem:[%s3037_s7 + $0xfd8] sm:$0xff] %v1220_v59  ;;  %v1226_v62 = vld [vmem:[%s3032_s6 + $0x1fb0] sm:$0xff] }
 0x10e   : > { %1223 = vst [vmem:[%s3037_s7 + $0xfe0] sm:$0xff] %v1222_v60  ;;  %1225 = vst [vmem:[%s3037_s7 + $0xfe8] sm:$0xff] %v1224_v61  ;;  %v1228_v63 = vld [vmem:[%s3032_s6 + $0x1fb8] sm:$0xff] }
 0x10f   : > { %1227 = vst [vmem:[%s3037_s7 + $0xff0] sm:$0xff] %v1226_v62  ;;  %1229 = vst [vmem:[%s3037_s7 + $0xff8] sm:$0xff] %v1228_v63 }
 0x110 PF: > { %p2891_p5 = scmp.ge.s32.totalorder %s2965_s20, 1  ;;  %p1258_p6 = scmp.lt.s32.totalorder %s2965_s20, 3 }
 0x112   : > { %p1259_p7 = pnand %p2891_p5, %p1258_p6 }
 0x113   : > { %s1265_s8 = sand.u32 (!%p1259_p7), 1, %s2957_s18   ;;  %s2893_s13 = sshll.u32 (!%p1259_p7), %s2884_s21, 3 }
 0x114   : > { %1262 = sbr.rel (%p1259_p7) target bundleno = 809 (0x329), region = 59  ;;  %s2892_s9 = sshll.u32 (!%p1259_p7), %s1265_s8, 12 }
 0x115   : > { %s4063_s10 = scalar_lea.vmem (!%p1259_p7), [#allocation2], %s2892_s9  ;;  %p1306_p8 = scmp.lt.s32.totalorder (!%p1259_p7), %s2893_s13, 15 }
 0x119   : > { %v1448_v0 = vld [vmem:[%s4063_s10 + $0x3c8] sm:$0xff]  ;;  %v1447_v2 = vld [vmem:[%s4063_s10 + $0x3c0] sm:$0xff]  ;;  %s4778_s13 = smov (!%p1306_p8, %s2893_s13), 15  ;;  %vm2471_vm0 = vcmask 1041408  }
 0x11a   : > { %v1704_v1 = vld [vmem:[%s4063_s10 + $0xbc8] sm:$0xff]  ;;  %1903 = vmatprep.subr.mxu0 %v1448_v0  ;;  %v1703_v3 = vld [vmem:[%s4063_s10 + $0xbc0] sm:$0xff]  ;;  %s1308_s16 = scalar_lea.vmem %s4770_s2, %s4778_s13  ;;  %s1313_s20 = scalar_lea.vmem %s4771_s3, %s4778_s13 }
 0x11b   : > { %1974 = vmatprep.subr.mxu1 %v1704_v1  ;;  %v1440_v4 = vld [vmem:[%s4063_s10 + $0x388] sm:$0xff]  ;;  %1904 = vmatpush1.msra.mxu0 %v1447_v2  ;;  %v1439_v6 = vld [vmem:[%s4063_s10 + $0x380] sm:$0xff]  ;;  %s1318_s24 = scalar_lea.vmem %s4772_s4, %s4778_s13  ;;  %s2897_s26 = sshll.u32 %s4778_s13, 1 }
 0x11c   : > { %v1696_v5 = vld [vmem:[%s4063_s10 + $0xb88] sm:$0xff]  ;;  %1975 = vmatpush1.msra.mxu1 %v1703_v3  ;;  %v1695_v7 = vld [vmem:[%s4063_s10 + $0xb80] sm:$0xff]  ;;  %1905 = vmatprep.subr.mxu0 %v1440_v4  ;;  %s4698_s29 = scalar_lea.vmem %s4773_s5, %s2897_s26 }
 0x11d   : > { %v1432_v8 = vld [vmem:[%s4063_s10 + $0x348] sm:$0xff]  ;;  %1976 = vmatprep.subr.mxu1 %v1696_v5  ;;  %v1431_v10 = vld [vmem:[%s4063_s10 + $0x340] sm:$0xff]  ;;  %1906 = vmatpush1.msra.mxu0 %v1439_v6 }
 0x11e   : > { %v1688_v9 = vld [vmem:[%s4063_s10 + $0xb48] sm:$0xff]  ;;  %v1687_v11 = vld [vmem:[%s4063_s10 + $0xb40] sm:$0xff]  ;;  %1977 = vmatpush1.msra.mxu1 %v1695_v7  ;;  %1907 = vmatprep.subr.mxu0 %v1432_v8 }
 0x11f   : > { %v1424_v12 = vld [vmem:[%s4063_s10 + $0x308] sm:$0xff]  ;;  %1978 = vmatprep.subr.mxu1 %v1688_v9  ;;  %v1423_v14 = vld [vmem:[%s4063_s10 + $0x300] sm:$0xff]  ;;  %1908 = vmatpush1.msra.mxu0 %v1431_v10 }
 0x120   : > { %v1680_v13 = vld [vmem:[%s4063_s10 + $0xb08] sm:$0xff]  ;;  %v1679_v15 = vld [vmem:[%s4063_s10 + $0xb00] sm:$0xff]  ;;  %1979 = vmatpush1.msra.mxu1 %v1687_v11  ;;  %1909 = vmatprep.subr.mxu0 %v1424_v12 }
 0x121   : > { %v1416_v16 = vld [vmem:[%s4063_s10 + $0x2c8] sm:$0xff]  ;;  %1980 = vmatprep.subr.mxu1 %v1680_v13  ;;  %v1415_v18 = vld [vmem:[%s4063_s10 + $0x2c0] sm:$0xff]  ;;  %1910 = vmatpush1.msra.mxu0 %v1423_v14 }
 0x122   : > { %v1672_v17 = vld [vmem:[%s4063_s10 + $0xac8] sm:$0xff]  ;;  %v1671_v19 = vld [vmem:[%s4063_s10 + $0xac0] sm:$0xff]  ;;  %1981 = vmatpush1.msra.mxu1 %v1679_v15  ;;  %1911 = vmatprep.subr.mxu0 %v1416_v16 }
 0x123   : > { %v1408_v20 = vld [vmem:[%s4063_s10 + $0x288] sm:$0xff]  ;;  %1982 = vmatprep.subr.mxu1 %v1672_v17  ;;  %v1407_v22 = vld [vmem:[%s4063_s10 + $0x280] sm:$0xff]  ;;  %1912 = vmatpush1.msra.mxu0 %v1415_v18 }
 0x124   : > { %v1664_v21 = vld [vmem:[%s4063_s10 + $0xa88] sm:$0xff]  ;;  %v1663_v23 = vld [vmem:[%s4063_s10 + $0xa80] sm:$0xff]  ;;  %1983 = vmatpush1.msra.mxu1 %v1671_v19  ;;  %1913 = vmatprep.subr.mxu0 %v1408_v20 }
 0x125   : > { %v1400_v24 = vld [vmem:[%s4063_s10 + $0x248] sm:$0xff]  ;;  %1984 = vmatprep.subr.mxu1 %v1664_v21  ;;  %v1399_v26 = vld [vmem:[%s4063_s10 + $0x240] sm:$0xff]  ;;  %1914 = vmatpush1.msra.mxu0 %v1407_v22 }
 0x126   : > { %v1656_v25 = vld [vmem:[%s4063_s10 + $0xa48] sm:$0xff]  ;;  %v1655_v27 = vld [vmem:[%s4063_s10 + $0xa40] sm:$0xff]  ;;  %1985 = vmatpush1.msra.mxu1 %v1663_v23  ;;  %1915 = vmatprep.subr.mxu0 %v1400_v24 }
 0x127   : > { %v1392_v28 = vld [vmem:[%s4063_s10 + $0x208] sm:$0xff]  ;;  %1986 = vmatprep.subr.mxu1 %v1656_v25  ;;  %v1391_v30 = vld [vmem:[%s4063_s10 + $0x200] sm:$0xff]  ;;  %1916 = vmatpush1.msra.mxu0 %v1399_v26 }
 0x128   : > { %v1648_v29 = vld [vmem:[%s4063_s10 + $0xa08] sm:$0xff]  ;;  %v1647_v31 = vld [vmem:[%s4063_s10 + $0xa00] sm:$0xff]  ;;  %1987 = vmatpush1.msra.mxu1 %v1655_v27  ;;  %1917 = vmatprep.subr.mxu0 %v1392_v28 }
 0x129   : > { %v1384_v32 = vld [vmem:[%s4063_s10 + $0x1c8] sm:$0xff]  ;;  %1988 = vmatprep.subr.mxu1 %v1648_v29  ;;  %v1383_v34 = vld [vmem:[%s4063_s10 + $0x1c0] sm:$0xff]  ;;  %1918 = vmatpush1.msra.mxu0 %v1391_v30  ;;  %v1841_v30 = vlaneseq }
 0x12a   : > { %v1640_v33 = vld [vmem:[%s4063_s10 + $0x9c8] sm:$0xff]  ;;  %v1639_v35 = vld [vmem:[%s4063_s10 + $0x9c0] sm:$0xff]  ;;  %1989 = vmatpush1.msra.mxu1 %v1647_v31  ;;  %1919 = vmatprep.subr.mxu0 %v1384_v32  ;;  %v2967_v31 = vmov 1983009808  }
 0x12b   : > { %v1376_v36 = vld [vmem:[%s4063_s10 + $0x188] sm:$0xff]  ;;  %1990 = vmatprep.subr.mxu1 %v1640_v33  ;;  %v1375_v38 = vld [vmem:[%s4063_s10 + $0x180] sm:$0xff]  ;;  %1920 = vmatpush1.msra.mxu0 %v1383_v34  ;;  %v1884_v32 = vunpack.c.l.s4 %v2967_v31  ;;  %v1673_v31 = vld [vmem:[%s4063_s10 + $0xad0] sm:$0xff] }
 0x12c   : > { %v1632_v37 = vld [vmem:[%s4063_s10 + $0x988] sm:$0xff]  ;;  %v1631_v39 = vld [vmem:[%s4063_s10 + $0x980] sm:$0xff]  ;;  %1991 = vmatpush1.msra.mxu1 %v1639_v35  ;;  %1921 = vmatprep.subr.mxu0 %v1376_v36 }
 0x12d   : > { %v1368_v40 = vld [vmem:[%s4063_s10 + $0x148] sm:$0xff]  ;;  %1992 = vmatprep.subr.mxu1 %v1632_v37  ;;  %v1367_v42 = vld [vmem:[%s4063_s10 + $0x140] sm:$0xff]  ;;  %1922 = vmatpush1.msra.mxu0 %v1375_v38 }
 0x12e   : > { %v1624_v41 = vld [vmem:[%s4063_s10 + $0x948] sm:$0xff]  ;;  %v1623_v43 = vld [vmem:[%s4063_s10 + $0x940] sm:$0xff]  ;;  %1993 = vmatpush1.msra.mxu1 %v1631_v39  ;;  %1923 = vmatprep.subr.mxu0 %v1368_v40 }
 0x12f   : > { %v1360_v44 = vld [vmem:[%s4063_s10 + $0x108] sm:$0xff]  ;;  %1994 = vmatprep.subr.mxu1 %v1624_v41  ;;  %v1359_v46 = vld [vmem:[%s4063_s10 + $0x100] sm:$0xff]  ;;  %1924 = vmatpush1.msra.mxu0 %v1367_v42  ;;  %v4167_v41 = vshrl.u32 %v1841_v30, 7  ;;  %v1885_v42 = vunpack.c.0.s8 %v1884_v32  ;;  %v1417_v30 = vld [vmem:[%s4063_s10 + $0x2d0] sm:$0xff] }
 0x130   : > { %v1616_v45 = vld [vmem:[%s4063_s10 + $0x908] sm:$0xff]  ;;  %v1615_v47 = vld [vmem:[%s4063_s10 + $0x900] sm:$0xff]  ;;  %1995 = vmatpush1.msra.mxu1 %v1623_v43  ;;  %1925 = vmatprep.subr.mxu0 %v1360_v44  ;;  %v1410_v32 = vld [vmem:[%s4063_s10 + $0x298] sm:$0xff] }
 0x131   : > { %v1352_v48 = vld [vmem:[%s4063_s10 + $0xc8] sm:$0xff]  ;;  %1996 = vmatprep.subr.mxu1 %v1616_v45  ;;  %v1351_v50 = vld [vmem:[%s4063_s10 + $0xc0] sm:$0xff]  ;;  %1926 = vmatpush1.msra.mxu0 %v1359_v46 }
 0x132   : > { %v1608_v49 = vld [vmem:[%s4063_s10 + $0x8c8] sm:$0xff]  ;;  %v1607_v51 = vld [vmem:[%s4063_s10 + $0x8c0] sm:$0xff]  ;;  %1997 = vmatpush1.msra.mxu1 %v1615_v47  ;;  %1927 = vmatprep.subr.mxu0 %v1352_v48 }
 0x133   : > { %v1344_v52 = vld [vmem:[%s4063_s10 + $0x88] sm:$0xff]  ;;  %1998 = vmatprep.subr.mxu1 %v1608_v49  ;;  %v1343_v54 = vld [vmem:[%s4063_s10 + $0x80] sm:$0xff]  ;;  %1928 = vmatpush1.msra.mxu0 %v1351_v50 }
 0x134   : > { %v1600_v53 = vld [vmem:[%s4063_s10 + $0x888] sm:$0xff]  ;;  %v1599_v55 = vld [vmem:[%s4063_s10 + $0x880] sm:$0xff]  ;;  %1999 = vmatpush1.msra.mxu1 %v1607_v51  ;;  %1929 = vmatprep.subr.mxu0 %v1344_v52  ;;  %v4181_v52 = vsub.s32 %v1885_v42, %v4167_v41  ;;  %v1650_v42 = vld [vmem:[%s4063_s10 + $0xa18] sm:$0xff] }
 0x135   : > { %v1336_v56 = vld [vmem:[%s4063_s10 + $0x48] sm:$0xff]  ;;  %2000 = vmatprep.subr.mxu1 %v1600_v53  ;;  %v1335_v58 = vld [vmem:[%s4063_s10 + $0x40] sm:$0xff]  ;;  %1930 = vmatpush1.msra.mxu0 %v1343_v54 }
 0x136   : > { %v1592_v57 = vld [vmem:[%s4063_s10 + $0x848] sm:$0xff]  ;;  %v1591_v59 = vld [vmem:[%s4063_s10 + $0x840] sm:$0xff]  ;;  %2001 = vmatpush1.msra.mxu1 %v1599_v55  ;;  %1931 = vmatprep.subr.mxu0 %v1336_v56 }
 0x137   : > { %v1328_v60 = vld [vmem:[%s4063_s10 + $0x8] sm:$0xff]  ;;  %2002 = vmatprep.subr.mxu1 %v1592_v57  ;;  %v1327_v62 = vld [vmem:[%s4063_s10] sm:$0xff]  ;;  %1932 = vmatpush1.msra.mxu0 %v1335_v58 }
 0x138   : > { %v1584_v61 = vld [vmem:[%s4063_s10 + $0x808] sm:$0xff]  ;;  %v1583_v63 = vld [vmem:[%s4063_s10 + $0x800] sm:$0xff]  ;;  %2003 = vmatpush1.msra.mxu1 %v1591_v59  ;;  %1933 = vmatprep.subr.mxu0 %v1328_v60 }
 0x139   : > { %v1576_v0 = vld [vmem:[%s4063_s10 + $0x7c8] sm:$0xff]  ;;  %2004 = vmatprep.subr.mxu1 %v1584_v61  ;;  %v1575_v2 = vld [vmem:[%s4063_s10 + $0x7c0] sm:$0xff]  ;;  %1934 = vmatpush1.msra.mxu0 %v1327_v62 }
 0x13a   : > { %v1832_v1 = vld [vmem:[%s4063_s10 + $0xfc8] sm:$0xff]  ;;  %v1831_v3 = vld [vmem:[%s4063_s10 + $0xfc0] sm:$0xff]  ;;  %2005 = vmatpush1.msra.mxu1 %v1583_v63  ;;  %1935 = vmatprep.subr.mxu0 %v1576_v0 }
 0x13b   : > { %v1568_v4 = vld [vmem:[%s4063_s10 + $0x788] sm:$0xff]  ;;  %2006 = vmatprep.subr.mxu1 %v1832_v1  ;;  %v1567_v6 = vld [vmem:[%s4063_s10 + $0x780] sm:$0xff]  ;;  %1936 = vmatpush2.msra.mxu0 %v1575_v2 }
 0x13c   : > { %v1824_v5 = vld [vmem:[%s4063_s10 + $0xf88] sm:$0xff]  ;;  %v1823_v7 = vld [vmem:[%s4063_s10 + $0xf80] sm:$0xff]  ;;  %2007 = vmatpush2.msra.mxu1 %v1831_v3  ;;  %1937 = vmatprep.subr.mxu0 %v1568_v4 }
 0x13d   : > { %v1560_v8 = vld [vmem:[%s4063_s10 + $0x748] sm:$0xff]  ;;  %2008 = vmatprep.subr.mxu1 %v1824_v5  ;;  %v1559_v10 = vld [vmem:[%s4063_s10 + $0x740] sm:$0xff]  ;;  %1938 = vmatpush2.msra.mxu0 %v1567_v6 }
 0x13e   : > { %v1816_v9 = vld [vmem:[%s4063_s10 + $0xf48] sm:$0xff]  ;;  %v1815_v11 = vld [vmem:[%s4063_s10 + $0xf40] sm:$0xff]  ;;  %2009 = vmatpush2.msra.mxu1 %v1823_v7  ;;  %1939 = vmatprep.subr.mxu0 %v1560_v8 }
 0x13f   : > { %v1552_v12 = vld [vmem:[%s4063_s10 + $0x708] sm:$0xff]  ;;  %2010 = vmatprep.subr.mxu1 %v1816_v9  ;;  %v1551_v14 = vld [vmem:[%s4063_s10 + $0x700] sm:$0xff]  ;;  %1940 = vmatpush2.msra.mxu0 %v1559_v10 }
 0x140   : > { %v1808_v13 = vld [vmem:[%s4063_s10 + $0xf08] sm:$0xff]  ;;  %v1807_v15 = vld [vmem:[%s4063_s10 + $0xf00] sm:$0xff]  ;;  %2011 = vmatpush2.msra.mxu1 %v1815_v11  ;;  %1941 = vmatprep.subr.mxu0 %v1552_v12  ;;  %v1450_v12 = vld [vmem:[%s4063_s10 + $0x3d8] sm:$0xff] }
 0x141   : > { %v1544_v16 = vld [vmem:[%s4063_s10 + $0x6c8] sm:$0xff]  ;;  %2012 = vmatprep.subr.mxu1 %v1808_v13  ;;  %v1543_v18 = vld [vmem:[%s4063_s10 + $0x6c0] sm:$0xff]  ;;  %1942 = vmatpush2.msra.mxu0 %v1551_v14  ;;  %v1706_v13 = vld [vmem:[%s4063_s10 + $0xbd8] sm:$0xff] }
 0x142   : > { %v1800_v17 = vld [vmem:[%s4063_s10 + $0xec8] sm:$0xff]  ;;  %v1799_v19 = vld [vmem:[%s4063_s10 + $0xec0] sm:$0xff]  ;;  %2013 = vmatpush2.msra.mxu1 %v1807_v15  ;;  %1943 = vmatprep.subr.mxu0 %v1544_v16  ;;  %v1449_v14 = vld [vmem:[%s4063_s10 + $0x3d0] sm:$0xff] }
 0x143   : > { %v1536_v20 = vld [vmem:[%s4063_s10 + $0x688] sm:$0xff]  ;;  %2014 = vmatprep.subr.mxu1 %v1800_v17  ;;  %v1535_v22 = vld [vmem:[%s4063_s10 + $0x680] sm:$0xff]  ;;  %1944 = vmatpush2.msra.mxu0 %v1543_v18  ;;  %v1705_v15 = vld [vmem:[%s4063_s10 + $0xbd0] sm:$0xff] }
 0x144   : > { %v1792_v21 = vld [vmem:[%s4063_s10 + $0xe88] sm:$0xff]  ;;  %v1791_v23 = vld [vmem:[%s4063_s10 + $0xe80] sm:$0xff]  ;;  %2015 = vmatpush2.msra.mxu1 %v1799_v19  ;;  %1945 = vmatprep.subr.mxu0 %v1536_v20  ;;  %v1442_v16 = vld [vmem:[%s4063_s10 + $0x398] sm:$0xff] }
 0x145   : > { %v1528_v24 = vld [vmem:[%s4063_s10 + $0x648] sm:$0xff]  ;;  %2016 = vmatprep.subr.mxu1 %v1792_v21  ;;  %v1527_v26 = vld [vmem:[%s4063_s10 + $0x640] sm:$0xff]  ;;  %1946 = vmatpush2.msra.mxu0 %v1535_v22  ;;  %v1698_v17 = vld [vmem:[%s4063_s10 + $0xb98] sm:$0xff] }
 0x146   : > { %v1784_v25 = vld [vmem:[%s4063_s10 + $0xe48] sm:$0xff]  ;;  %v1783_v27 = vld [vmem:[%s4063_s10 + $0xe40] sm:$0xff]  ;;  %2017 = vmatpush2.msra.mxu1 %v1791_v23  ;;  %1947 = vmatprep.subr.mxu0 %v1528_v24  ;;  %v1441_v18 = vld [vmem:[%s4063_s10 + $0x390] sm:$0xff] }
 0x147   : > { %v1520_v28 = vld [vmem:[%s4063_s10 + $0x608] sm:$0xff]  ;;  %2018 = vmatprep.subr.mxu1 %v1784_v25  ;;  %v1519_v33 = vld [vmem:[%s4063_s10 + $0x600] sm:$0xff]  ;;  %1948 = vmatpush2.msra.mxu0 %v1527_v26  ;;  %v1697_v19 = vld [vmem:[%s4063_s10 + $0xb90] sm:$0xff] }
 0x148   : > { %v1776_v29 = vld [vmem:[%s4063_s10 + $0xe08] sm:$0xff]  ;;  %v1775_v34 = vld [vmem:[%s4063_s10 + $0xe00] sm:$0xff]  ;;  %2019 = vmatpush2.msra.mxu1 %v1783_v27  ;;  %1949 = vmatprep.subr.mxu0 %v1520_v28  ;;  %v1434_v20 = vld [vmem:[%s4063_s10 + $0x358] sm:$0xff] }
 0x149   : > { %v1512_v35 = vld [vmem:[%s4063_s10 + $0x5c8] sm:$0xff]  ;;  %2020 = vmatprep.subr.mxu1 %v1776_v29  ;;  %v1511_v37 = vld [vmem:[%s4063_s10 + $0x5c0] sm:$0xff]  ;;  %1950 = vmatpush2.msra.mxu0 %v1519_v33  ;;  %v1690_v21 = vld [vmem:[%s4063_s10 + $0xb58] sm:$0xff] }
 0x14a   : > { %v1768_v36 = vld [vmem:[%s4063_s10 + $0xdc8] sm:$0xff]  ;;  %v1767_v38 = vld [vmem:[%s4063_s10 + $0xdc0] sm:$0xff]  ;;  %2021 = vmatpush2.msra.mxu1 %v1775_v34  ;;  %1951 = vmatprep.subr.mxu0 %v1512_v35  ;;  %v1433_v22 = vld [vmem:[%s4063_s10 + $0x350] sm:$0xff] }
 0x14b   : > { %v1504_v39 = vld [vmem:[%s4063_s10 + $0x588] sm:$0xff]  ;;  %2022 = vmatprep.subr.mxu1 %v1768_v36  ;;  %v1503_v43 = vld [vmem:[%s4063_s10 + $0x580] sm:$0xff]  ;;  %1952 = vmatpush2.msra.mxu0 %v1511_v37  ;;  %v1689_v23 = vld [vmem:[%s4063_s10 + $0xb50] sm:$0xff] }
 0x14c   : > { %v1760_v40 = vld [vmem:[%s4063_s10 + $0xd88] sm:$0xff]  ;;  %v1759_v44 = vld [vmem:[%s4063_s10 + $0xd80] sm:$0xff]  ;;  %2023 = vmatpush2.msra.mxu1 %v1767_v38  ;;  %1953 = vmatprep.subr.mxu0 %v1504_v39  ;;  %v1426_v24 = vld [vmem:[%s4063_s10 + $0x318] sm:$0xff] }
 0x14d   : > { %v1496_v45 = vld [vmem:[%s4063_s10 + $0x548] sm:$0xff]  ;;  %2024 = vmatprep.subr.mxu1 %v1760_v40  ;;  %v1495_v47 = vld [vmem:[%s4063_s10 + $0x540] sm:$0xff]  ;;  %1954 = vmatpush2.msra.mxu0 %v1503_v43  ;;  %v1682_v25 = vld [vmem:[%s4063_s10 + $0xb18] sm:$0xff] }
 0x14e   : > { %v1752_v46 = vld [vmem:[%s4063_s10 + $0xd48] sm:$0xff]  ;;  %v1751_v48 = vld [vmem:[%s4063_s10 + $0xd40] sm:$0xff]  ;;  %2025 = vmatpush2.msra.mxu1 %v1759_v44  ;;  %1955 = vmatprep.subr.mxu0 %v1496_v45  ;;  %v1425_v26 = vld [vmem:[%s4063_s10 + $0x310] sm:$0xff] }
 0x14f   : > { %v1326_v49 = vld [vmem:[%s4768_s0] sm:$0xff]  ;;  %v1488_v50 = vld [vmem:[%s4063_s10 + $0x508] sm:$0xff]  ;;  %2026 = vmatprep.subr.mxu1 %v1752_v46  ;;  %1956 = vmatpush2.msra.mxu0 %v1495_v47  ;;  %v1681_v27 = vld [vmem:[%s4063_s10 + $0xb10] sm:$0xff] }
 0x150   : > { %v1744_v51 = vld [vmem:[%s4063_s10 + $0xd08] sm:$0xff]  ;;  %v1487_v53 = vld [vmem:[%s4063_s10 + $0x500] sm:$0xff]  ;;  %2027 = vmatpush2.msra.mxu1 %v1751_v48  ;;  %v1882_v57 = vcombine.high %v1326_v49, %v1326_v49  ;;  %1957 = vmatprep.subr.mxu0 %v1488_v50  ;;  %v4192_v62 = vrot.slane %v1326_v49, %v4181_v52  ;;  %v1418_v28 = vld [vmem:[%s4063_s10 + $0x2d8] sm:$0xff] }
 0x151   : > { %v1743_v54 = vld [vmem:[%s4063_s10 + $0xd00] sm:$0xff]  ;;  %v1480_v55 = vld [vmem:[%s4063_s10 + $0x4c8] sm:$0xff]  ;;  %2028 = vmatprep.subr.mxu1 %v1744_v51  ;;  %1958 = vmatpush2.msra.mxu0 %v1487_v53  ;;  %v1674_v29 = vld [vmem:[%s4063_s10 + $0xad8] sm:$0xff] }
 0x152   : > { %v1736_v56 = vld [vmem:[%s4063_s10 + $0xcc8] sm:$0xff]  ;;  %v1479_v58 = vld [vmem:[%s4063_s10 + $0x4c0] sm:$0xff]  ;;  %2029 = vmatpush2.msra.mxu1 %v1743_v54  ;;  %1959 = vmatprep.subr.mxu0 %v1480_v55  ;;  %v4199_v3 = vrot.slane %v1882_v57, %v4181_v52  ;;  %v4207_v8 = vcombine.high %v4192_v62, %v4192_v62  ;;  %v1666_v33 = vld [vmem:[%s4063_s10 + $0xa98] sm:$0xff] }
 0x153   : > { %v1735_v59 = vld [vmem:[%s4063_s10 + $0xcc0] sm:$0xff]  ;;  %v1472_v60 = vld [vmem:[%s4063_s10 + $0x488] sm:$0xff]  ;;  %2030 = vmatprep.subr.mxu1 %v1736_v56  ;;  %1960 = vmatpush2.msra.mxu0 %v1479_v58  ;;  %v1409_v34 = vld [vmem:[%s4063_s10 + $0x290] sm:$0xff] }
 0x154   : > { %v1728_v61 = vld [vmem:[%s4063_s10 + $0xc88] sm:$0xff]  ;;  %v1471_v63 = vld [vmem:[%s4063_s10 + $0x480] sm:$0xff]  ;;  %2031 = vmatpush2.msra.mxu1 %v1735_v59  ;;  %1961 = vmatprep.subr.mxu0 %v1472_v60  ;;  %v4213_v11 = vcombine.high %v4199_v3, %v4199_v3  ;;  %v1665_v35 = vld [vmem:[%s4063_s10 + $0xa90] sm:$0xff] }
 0x155   : > { %v1727_v0 = vld [vmem:[%s4063_s10 + $0xc80] sm:$0xff]  ;;  %v1464_v1 = vld [vmem:[%s4063_s10 + $0x448] sm:$0xff]  ;;  %2032 = vmatprep.subr.mxu1 %v1728_v61  ;;  %1962 = vmatpush2.msra.mxu0 %v1471_v63  ;;  %v1402_v36 = vld [vmem:[%s4063_s10 + $0x258] sm:$0xff] }
 0x156   : > { %v1720_v2 = vld [vmem:[%s4063_s10 + $0xc48] sm:$0xff]  ;;  %v1463_v4 = vld [vmem:[%s4063_s10 + $0x440] sm:$0xff]  ;;  %2033 = vmatpush2.msra.mxu1 %v1727_v0  ;;  %1963 = vmatprep.subr.mxu0 %v1464_v1  ;;  %v1658_v37 = vld [vmem:[%s4063_s10 + $0xa58] sm:$0xff] }
 0x157   : > { %v1719_v5 = vld [vmem:[%s4063_s10 + $0xc40] sm:$0xff]  ;;  %v1456_v6 = vld [vmem:[%s4063_s10 + $0x408] sm:$0xff]  ;;  %2034 = vmatprep.subr.mxu1 %v1720_v2  ;;  %1964 = vmatpush2.msra.mxu0 %v1463_v4  ;;  %v1401_v38 = vld [vmem:[%s4063_s10 + $0x250] sm:$0xff] }
 0x158   : > { %v1712_v7 = vld [vmem:[%s4063_s10 + $0xc08] sm:$0xff]  ;;  %v1455_v9 = vld [vmem:[%s4063_s10 + $0x400] sm:$0xff]  ;;  %2035 = vmatpush2.msra.mxu1 %v1719_v5  ;;  %1965 = vmatprep.subr.mxu0 %v1456_v6  ;;  %v1657_v39 = vld [vmem:[%s4063_s10 + $0xa50] sm:$0xff] }
 0x159   : > { %v1711_v10 = vld [vmem:[%s4063_s10 + $0xc00] sm:$0xff]  ;;  %2036 = vmatprep.subr.mxu1 %v1712_v7  ;;  %1966 = vmatpush2.msra.mxu0 %v1455_v9  ;;  %v1394_v40 = vld [vmem:[%s4063_s10 + $0x218] sm:$0xff]  ;;  %v1393_v43 = vld [vmem:[%s4063_s10 + $0x210] sm:$0xff] }
 0x15a   : > { %1967 = vmatprep.mubr.f32.mxu0 %v4207_v8  ;;  %2037 = vmatpush2.msra.mxu1 %v1711_v10  ;;  %v1649_v44 = vld [vmem:[%s4063_s10 + $0xa10] sm:$0xff]  ;;  %v1386_v45 = vld [vmem:[%s4063_s10 + $0x1d8] sm:$0xff] }
 0x15b   : > { %1968 = vmatmul.mubr.f32.vlgmr.msra.gmra.mxu0 %v4192_v62  ;;  %2038 = vmatprep.mubr.f32.mxu1 %v4213_v11  ;;  %v1642_v46 = vld [vmem:[%s4063_s10 + $0x9d8] sm:$0xff]  ;;  %v1385_v47 = vld [vmem:[%s4063_s10 + $0x1d0] sm:$0xff] }
 0x15c   : > { %2045 = vmatprep.subr.mxu0 %v1450_v12  ;;  %2116 = vmatprep.subr.mxu1 %v1706_v13  ;;  %v1641_v48 = vld [vmem:[%s4063_s10 + $0x9d0] sm:$0xff]  ;;  %v1378_v49 = vld [vmem:[%s4063_s10 + $0x198] sm:$0xff] }
 0x15d   : > { %2039 = vmatmul.mubr.f32.vlgmr.msra.gmra.mxu1 %v4199_v3  ;;  %2046 = vmatpush1.msra.mxu0 %v1449_v14  ;;  %v1634_v50 = vld [vmem:[%s4063_s10 + $0x998] sm:$0xff]  ;;  %v1377_v51 = vld [vmem:[%s4063_s10 + $0x190] sm:$0xff] }
 0x15e   : > { %2117 = vmatpush1.msra.mxu1 %v1705_v15  ;;  %2047 = vmatprep.subr.mxu0 %v1442_v16  ;;  %v1633_v53 = vld [vmem:[%s4063_s10 + $0x990] sm:$0xff]  ;;  %v1370_v54 = vld [vmem:[%s4063_s10 + $0x158] sm:$0xff] }
 0x15f   : > { %2118 = vmatprep.subr.mxu1 %v1698_v17  ;;  %2048 = vmatpush1.msra.mxu0 %v1441_v18  ;;  %v1626_v55 = vld [vmem:[%s4063_s10 + $0x958] sm:$0xff]  ;;  %v1369_v56 = vld [vmem:[%s4063_s10 + $0x150] sm:$0xff] }
 0x160   : > { %2119 = vmatpush1.msra.mxu1 %v1697_v19  ;;  %2049 = vmatprep.subr.mxu0 %v1434_v20  ;;  %v1625_v57 = vld [vmem:[%s4063_s10 + $0x950] sm:$0xff]  ;;  %v1362_v58 = vld [vmem:[%s4063_s10 + $0x118] sm:$0xff] }
 0x161   : > { %2120 = vmatprep.subr.mxu1 %v1690_v21  ;;  %2050 = vmatpush1.msra.mxu0 %v1433_v22  ;;  %v1618_v59 = vld [vmem:[%s4063_s10 + $0x918] sm:$0xff]  ;;  %v1361_v60 = vld [vmem:[%s4063_s10 + $0x110] sm:$0xff] }
 0x162   : > { %2121 = vmatpush1.msra.mxu1 %v1689_v23  ;;  %2051 = vmatprep.subr.mxu0 %v1426_v24  ;;  %v1617_v61 = vld [vmem:[%s4063_s10 + $0x910] sm:$0xff]  ;;  %v1354_v63 = vld [vmem:[%s4063_s10 + $0xd8] sm:$0xff] }
 0x163   : > { %2122 = vmatprep.subr.mxu1 %v1682_v25  ;;  %2052 = vmatpush1.msra.mxu0 %v1425_v26  ;;  %v1610_v0 = vld [vmem:[%s4063_s10 + $0x8d8] sm:$0xff]  ;;  %v1353_v1 = vld [vmem:[%s4063_s10 + $0xd0] sm:$0xff] }
 0x164   : > { %2123 = vmatpush1.msra.mxu1 %v1681_v27  ;;  %2053 = vmatprep.subr.mxu0 %v1418_v28  ;;  %v1609_v2 = vld [vmem:[%s4063_s10 + $0x8d0] sm:$0xff]  ;;  %v1346_v4 = vld [vmem:[%s4063_s10 + $0x98] sm:$0xff] }
 0x165   : > { %2124 = vmatprep.subr.mxu1 %v1674_v29  ;;  %2054 = vmatpush1.msra.mxu0 %v1417_v30  ;;  %v1602_v5 = vld [vmem:[%s4063_s10 + $0x898] sm:$0xff]  ;;  %v1345_v6 = vld [vmem:[%s4063_s10 + $0x90] sm:$0xff] }
 0x166   : > { %2125 = vmatpush1.msra.mxu1 %v1673_v31  ;;  %2055 = vmatprep.subr.mxu0 %v1410_v32  ;;  %v1601_v7 = vld [vmem:[%s4063_s10 + $0x890] sm:$0xff]  ;;  %v1338_v9 = vld [vmem:[%s4063_s10 + $0x58] sm:$0xff] }
 0x167   : > { %2126 = vmatprep.subr.mxu1 %v1666_v33  ;;  %2056 = vmatpush1.msra.mxu0 %v1409_v34  ;;  %v1594_v10 = vld [vmem:[%s4063_s10 + $0x858] sm:$0xff]  ;;  %v1337_v12 = vld [vmem:[%s4063_s10 + $0x50] sm:$0xff] }
 0x168   : > { %2127 = vmatpush1.msra.mxu1 %v1665_v35  ;;  %2057 = vmatprep.subr.mxu0 %v1402_v36  ;;  %v1593_v13 = vld [vmem:[%s4063_s10 + $0x850] sm:$0xff]  ;;  %v1330_v14 = vld [vmem:[%s4063_s10 + $0x18] sm:$0xff] }
 0x169   : > { %2128 = vmatprep.subr.mxu1 %v1658_v37  ;;  %2058 = vmatpush1.msra.mxu0 %v1401_v38  ;;  %v1586_v15 = vld [vmem:[%s4063_s10 + $0x818] sm:$0xff]  ;;  %v1329_v16 = vld [vmem:[%s4063_s10 + $0x10] sm:$0xff] }
 0x16a   : > { %2129 = vmatpush1.msra.mxu1 %v1657_v39  ;;  %2059 = vmatprep.subr.mxu0 %v1394_v40  ;;  %v1585_v17 = vld [vmem:[%s4063_s10 + $0x810] sm:$0xff]  ;;  %v1578_v18 = vld [vmem:[%s4063_s10 + $0x7d8] sm:$0xff] }
 0x16b   : > { %2130 = vmatprep.subr.mxu1 %v1650_v42  ;;  %2060 = vmatpush1.msra.mxu0 %v1393_v43  ;;  %v1834_v19 = vld [vmem:[%s4063_s10 + $0xfd8] sm:$0xff]  ;;  %v1577_v20 = vld [vmem:[%s4063_s10 + $0x7d0] sm:$0xff] }
 0x16c   : > { %2131 = vmatpush1.msra.mxu1 %v1649_v44  ;;  %2061 = vmatprep.subr.mxu0 %v1386_v45  ;;  %v1833_v21 = vld [vmem:[%s4063_s10 + $0xfd0] sm:$0xff]  ;;  %v1570_v22 = vld [vmem:[%s4063_s10 + $0x798] sm:$0xff] }
 0x16d   : > { %2132 = vmatprep.subr.mxu1 %v1642_v46  ;;  %2062 = vmatpush1.msra.mxu0 %v1385_v47  ;;  %v1826_v23 = vld [vmem:[%s4063_s10 + $0xf98] sm:$0xff]  ;;  %v1569_v24 = vld [vmem:[%s4063_s10 + $0x790] sm:$0xff] }
 0x16e   : > { %2133 = vmatpush1.msra.mxu1 %v1641_v48  ;;  %2063 = vmatprep.subr.mxu0 %v1378_v49  ;;  %v1825_v25 = vld [vmem:[%s4063_s10 + $0xf90] sm:$0xff]  ;;  %v1562_v26 = vld [vmem:[%s4063_s10 + $0x758] sm:$0xff] }
 0x16f   : > { %2134 = vmatprep.subr.mxu1 %v1634_v50  ;;  %2064 = vmatpush1.msra.mxu0 %v1377_v51  ;;  %v1818_v27 = vld [vmem:[%s4063_s10 + $0xf58] sm:$0xff]  ;;  %v1561_v28 = vld [vmem:[%s4063_s10 + $0x750] sm:$0xff] }
 0x170   : > { %2135 = vmatpush1.msra.mxu1 %v1633_v53  ;;  %2065 = vmatprep.subr.mxu0 %v1370_v54  ;;  %v1817_v29 = vld [vmem:[%s4063_s10 + $0xf50] sm:$0xff]  ;;  %v1554_v30 = vld [vmem:[%s4063_s10 + $0x718] sm:$0xff] }
 0x171   : > { %2136 = vmatprep.subr.mxu1 %v1626_v55  ;;  %2066 = vmatpush1.msra.mxu0 %v1369_v56  ;;  %v1810_v31 = vld [vmem:[%s4063_s10 + $0xf18] sm:$0xff]  ;;  %v1553_v32 = vld [vmem:[%s4063_s10 + $0x710] sm:$0xff] }
 0x172   : > { %2137 = vmatpush1.msra.mxu1 %v1625_v57  ;;  %2067 = vmatprep.subr.mxu0 %v1362_v58  ;;  %v1809_v33 = vld [vmem:[%s4063_s10 + $0xf10] sm:$0xff]  ;;  %v1546_v34 = vld [vmem:[%s4063_s10 + $0x6d8] sm:$0xff] }
 0x173   : > { %2138 = vmatprep.subr.mxu1 %v1618_v59  ;;  %2068 = vmatpush1.msra.mxu0 %v1361_v60  ;;  %v1802_v35 = vld [vmem:[%s4063_s10 + $0xed8] sm:$0xff]  ;;  %v1545_v36 = vld [vmem:[%s4063_s10 + $0x6d0] sm:$0xff] }
 0x174   : > { %2139 = vmatpush1.msra.mxu1 %v1617_v61  ;;  %2069 = vmatprep.subr.mxu0 %v1354_v63  ;;  %v1801_v37 = vld [vmem:[%s4063_s10 + $0xed0] sm:$0xff]  ;;  %v1538_v38 = vld [vmem:[%s4063_s10 + $0x698] sm:$0xff] }
 0x175   : > { %2140 = vmatprep.subr.mxu1 %v1610_v0  ;;  %2070 = vmatpush1.msra.mxu0 %v1353_v1  ;;  %v1794_v39 = vld [vmem:[%s4063_s10 + $0xe98] sm:$0xff]  ;;  %v1537_v40 = vld [vmem:[%s4063_s10 + $0x690] sm:$0xff] }
 0x176   : > { %2141 = vmatpush1.msra.mxu1 %v1609_v2  ;;  %2071 = vmatprep.subr.mxu0 %v1346_v4  ;;  %v1793_v42 = vld [vmem:[%s4063_s10 + $0xe90] sm:$0xff]  ;;  %v1530_v43 = vld [vmem:[%s4063_s10 + $0x658] sm:$0xff] }
 0x177   : > { %2142 = vmatprep.subr.mxu1 %v1602_v5  ;;  %2072 = vmatpush1.msra.mxu0 %v1345_v6  ;;  %v1786_v44 = vld [vmem:[%s4063_s10 + $0xe58] sm:$0xff]  ;;  %v1529_v45 = vld [vmem:[%s4063_s10 + $0x650] sm:$0xff] }
 0x178   : > { %2143 = vmatpush1.msra.mxu1 %v1601_v7  ;;  %2073 = vmatprep.subr.mxu0 %v1338_v9  ;;  %v1785_v46 = vld [vmem:[%s4063_s10 + $0xe50] sm:$0xff]  ;;  %v1522_v47 = vld [vmem:[%s4063_s10 + $0x618] sm:$0xff] }
 0x179   : > { %2144 = vmatprep.subr.mxu1 %v1594_v10  ;;  %2074 = vmatpush1.msra.mxu0 %v1337_v12  ;;  %v1778_v48 = vld [vmem:[%s4063_s10 + $0xe18] sm:$0xff]  ;;  %v1521_v49 = vld [vmem:[%s4063_s10 + $0x610] sm:$0xff] }
 0x17a   : > { %2145 = vmatpush1.msra.mxu1 %v1593_v13  ;;  %2075 = vmatprep.subr.mxu0 %v1330_v14  ;;  %v1777_v50 = vld [vmem:[%s4063_s10 + $0xe10] sm:$0xff]  ;;  %v1514_v51 = vld [vmem:[%s4063_s10 + $0x5d8] sm:$0xff] }
 0x17b   : > { %2146 = vmatprep.subr.mxu1 %v1586_v15  ;;  %2076 = vmatpush1.msra.mxu0 %v1329_v16  ;;  %v1770_v53 = vld [vmem:[%s4063_s10 + $0xdd8] sm:$0xff]  ;;  %v1513_v54 = vld [vmem:[%s4063_s10 + $0x5d0] sm:$0xff] }
 0x17c   : > { %2147 = vmatpush1.msra.mxu1 %v1585_v17  ;;  %2077 = vmatprep.subr.mxu0 %v1578_v18  ;;  %v1769_v55 = vld [vmem:[%s4063_s10 + $0xdd0] sm:$0xff]  ;;  %v1506_v56 = vld [vmem:[%s4063_s10 + $0x598] sm:$0xff] }
 0x17d   : > { %2148 = vmatprep.subr.mxu1 %v1834_v19  ;;  %2078 = vmatpush2.msra.mxu0 %v1577_v20  ;;  %v1762_v57 = vld [vmem:[%s4063_s10 + $0xd98] sm:$0xff]  ;;  %v1505_v58 = vld [vmem:[%s4063_s10 + $0x590] sm:$0xff] }
 0x17e   : > { %2149 = vmatpush2.msra.mxu1 %v1833_v21  ;;  %2079 = vmatprep.subr.mxu0 %v1570_v22  ;;  %v1761_v59 = vld [vmem:[%s4063_s10 + $0xd90] sm:$0xff]  ;;  %v1498_v60 = vld [vmem:[%s4063_s10 + $0x558] sm:$0xff] }
 0x17f   : > { %2150 = vmatprep.subr.mxu1 %v1826_v23  ;;  %2080 = vmatpush2.msra.mxu0 %v1569_v24  ;;  %v1754_v61 = vld [vmem:[%s4063_s10 + $0xd58] sm:$0xff]  ;;  %v1497_v63 = vld [vmem:[%s4063_s10 + $0x550] sm:$0xff]  ;;  %v1452_v24 = vld [vmem:[%s4063_s10 + $0x3e8] sm:$0xff] }
 0x180   : > { %2151 = vmatpush2.msra.mxu1 %v1825_v25  ;;  %2081 = vmatprep.subr.mxu0 %v1562_v26  ;;  %v1753_v0 = vld [vmem:[%s4063_s10 + $0xd50] sm:$0xff]  ;;  %v1490_v1 = vld [vmem:[%s4063_s10 + $0x518] sm:$0xff]  ;;  %v1708_v25 = vld [vmem:[%s4063_s10 + $0xbe8] sm:$0xff] }
 0x181   : > { %2152 = vmatprep.subr.mxu1 %v1818_v27  ;;  %2082 = vmatpush2.msra.mxu0 %v1561_v28  ;;  %v1746_v2 = vld [vmem:[%s4063_s10 + $0xd18] sm:$0xff]  ;;  %v1489_v4 = vld [vmem:[%s4063_s10 + $0x510] sm:$0xff]  ;;  %v1451_v26 = vld [vmem:[%s4063_s10 + $0x3e0] sm:$0xff] }
 0x182   : > { %2153 = vmatpush2.msra.mxu1 %v1817_v29  ;;  %2083 = vmatprep.subr.mxu0 %v1554_v30  ;;  %v1745_v5 = vld [vmem:[%s4063_s10 + $0xd10] sm:$0xff]  ;;  %v1482_v6 = vld [vmem:[%s4063_s10 + $0x4d8] sm:$0xff]  ;;  %v1707_v27 = vld [vmem:[%s4063_s10 + $0xbe0] sm:$0xff] }
 0x183   : > { %2154 = vmatprep.subr.mxu1 %v1810_v31  ;;  %2084 = vmatpush2.msra.mxu0 %v1553_v32  ;;  %v1738_v7 = vld [vmem:[%s4063_s10 + $0xcd8] sm:$0xff]  ;;  %v1481_v9 = vld [vmem:[%s4063_s10 + $0x4d0] sm:$0xff]  ;;  %v1444_v28 = vld [vmem:[%s4063_s10 + $0x3a8] sm:$0xff] }
 0x184   : > { %2155 = vmatpush2.msra.mxu1 %v1809_v33  ;;  %2085 = vmatprep.subr.mxu0 %v1546_v34  ;;  %v1737_v10 = vld [vmem:[%s4063_s10 + $0xcd0] sm:$0xff]  ;;  %v1474_v12 = vld [vmem:[%s4063_s10 + $0x498] sm:$0xff]  ;;  %v1700_v29 = vld [vmem:[%s4063_s10 + $0xba8] sm:$0xff] }
 0x185   : > { %2156 = vmatprep.subr.mxu1 %v1802_v35  ;;  %2086 = vmatpush2.msra.mxu0 %v1545_v36  ;;  %v1730_v13 = vld [vmem:[%s4063_s10 + $0xc98] sm:$0xff]  ;;  %v1473_v14 = vld [vmem:[%s4063_s10 + $0x490] sm:$0xff]  ;;  %v1443_v30 = vld [vmem:[%s4063_s10 + $0x3a0] sm:$0xff] }
 0x186   : > { %2157 = vmatpush2.msra.mxu1 %v1801_v37  ;;  %2087 = vmatprep.subr.mxu0 %v1538_v38  ;;  %v1729_v15 = vld [vmem:[%s4063_s10 + $0xc90] sm:$0xff]  ;;  %v1466_v16 = vld [vmem:[%s4063_s10 + $0x458] sm:$0xff]  ;;  %v1699_v31 = vld [vmem:[%s4063_s10 + $0xba0] sm:$0xff] }
 0x187   : > { %2158 = vmatprep.subr.mxu1 %v1794_v39  ;;  %2088 = vmatpush2.msra.mxu0 %v1537_v40  ;;  %v1722_v17 = vld [vmem:[%s4063_s10 + $0xc58] sm:$0xff]  ;;  %v1465_v18 = vld [vmem:[%s4063_s10 + $0x450] sm:$0xff]  ;;  %v1436_v32 = vld [vmem:[%s4063_s10 + $0x368] sm:$0xff] }
 0x188   : > { %2159 = vmatpush2.msra.mxu1 %v1793_v42  ;;  %2089 = vmatprep.subr.mxu0 %v1530_v43  ;;  %v1721_v19 = vld [vmem:[%s4063_s10 + $0xc50] sm:$0xff]  ;;  %v1458_v20 = vld [vmem:[%s4063_s10 + $0x418] sm:$0xff]  ;;  %v1692_v33 = vld [vmem:[%s4063_s10 + $0xb68] sm:$0xff] }
 0x189   : > { %2160 = vmatprep.subr.mxu1 %v1786_v44  ;;  %2090 = vmatpush2.msra.mxu0 %v1529_v45  ;;  %v1714_v21 = vld [vmem:[%s4063_s10 + $0xc18] sm:$0xff]  ;;  %v1457_v22 = vld [vmem:[%s4063_s10 + $0x410] sm:$0xff]  ;;  %v1435_v34 = vld [vmem:[%s4063_s10 + $0x360] sm:$0xff] }
 0x18a   : > { %2161 = vmatpush2.msra.mxu1 %v1785_v46  ;;  %2091 = vmatprep.subr.mxu0 %v1522_v47  ;;  %v1713_v23 = vld [vmem:[%s4063_s10 + $0xc10] sm:$0xff]  ;;  %v1691_v35 = vld [vmem:[%s4063_s10 + $0xb60] sm:$0xff]  ;;  %v1428_v36 = vld [vmem:[%s4063_s10 + $0x328] sm:$0xff] }
 0x18b   : > { %2162 = vmatprep.subr.mxu1 %v1778_v48  ;;  %2092 = vmatpush2.msra.mxu0 %v1521_v49  ;;  %v1684_v37 = vld [vmem:[%s4063_s10 + $0xb28] sm:$0xff]  ;;  %v1427_v38 = vld [vmem:[%s4063_s10 + $0x320] sm:$0xff] }
 0x18c   : > { %2163 = vmatpush2.msra.mxu1 %v1777_v50  ;;  %2093 = vmatprep.subr.mxu0 %v1514_v51  ;;  %v1683_v39 = vld [vmem:[%s4063_s10 + $0xb20] sm:$0xff]  ;;  %v1420_v40 = vld [vmem:[%s4063_s10 + $0x2e8] sm:$0xff] }
 0x18d   : > { %2164 = vmatprep.subr.mxu1 %v1770_v53  ;;  %2094 = vmatpush2.msra.mxu0 %v1513_v54  ;;  %v1676_v42 = vld [vmem:[%s4063_s10 + $0xae8] sm:$0xff]  ;;  %v1419_v43 = vld [vmem:[%s4063_s10 + $0x2e0] sm:$0xff] }
 0x18e   : > { %2165 = vmatpush2.msra.mxu1 %v1769_v55  ;;  %2095 = vmatprep.subr.mxu0 %v1506_v56  ;;  %v1675_v44 = vld [vmem:[%s4063_s10 + $0xae0] sm:$0xff]  ;;  %v1412_v45 = vld [vmem:[%s4063_s10 + $0x2a8] sm:$0xff] }
 0x18f   : > { %2166 = vmatprep.subr.mxu1 %v1762_v57  ;;  %2096 = vmatpush2.msra.mxu0 %v1505_v58  ;;  %v1668_v46 = vld [vmem:[%s4063_s10 + $0xaa8] sm:$0xff]  ;;  %v1411_v47 = vld [vmem:[%s4063_s10 + $0x2a0] sm:$0xff] }
 0x190   : > { %2167 = vmatpush2.msra.mxu1 %v1761_v59  ;;  %2097 = vmatprep.subr.mxu0 %v1498_v60  ;;  %v1667_v48 = vld [vmem:[%s4063_s10 + $0xaa0] sm:$0xff]  ;;  %v1404_v49 = vld [vmem:[%s4063_s10 + $0x268] sm:$0xff] }
 0x191   : > { %2168 = vmatprep.subr.mxu1 %v1754_v61  ;;  %2098 = vmatpush2.msra.mxu0 %v1497_v63  ;;  %v1660_v50 = vld [vmem:[%s4063_s10 + $0xa68] sm:$0xff]  ;;  %v1403_v51 = vld [vmem:[%s4063_s10 + $0x260] sm:$0xff] }
 0x192   : > { %2169 = vmatpush2.msra.mxu1 %v1753_v0  ;;  %2099 = vmatprep.subr.mxu0 %v1490_v1  ;;  %v1659_v53 = vld [vmem:[%s4063_s10 + $0xa60] sm:$0xff]  ;;  %v1396_v54 = vld [vmem:[%s4063_s10 + $0x228] sm:$0xff] }
 0x193   : > { %2170 = vmatprep.subr.mxu1 %v1746_v2  ;;  %2100 = vmatpush2.msra.mxu0 %v1489_v4  ;;  %v1652_v55 = vld [vmem:[%s4063_s10 + $0xa28] sm:$0xff]  ;;  %v1395_v56 = vld [vmem:[%s4063_s10 + $0x220] sm:$0xff] }
 0x194   : > { %2171 = vmatpush2.msra.mxu1 %v1745_v5  ;;  %2101 = vmatprep.subr.mxu0 %v1482_v6  ;;  %v1651_v57 = vld [vmem:[%s4063_s10 + $0xa20] sm:$0xff]  ;;  %v1388_v58 = vld [vmem:[%s4063_s10 + $0x1e8] sm:$0xff] }
 0x195   : > { %2172 = vmatprep.subr.mxu1 %v1738_v7  ;;  %2102 = vmatpush2.msra.mxu0 %v1481_v9  ;;  %v1644_v59 = vld [vmem:[%s4063_s10 + $0x9e8] sm:$0xff]  ;;  %v1387_v60 = vld [vmem:[%s4063_s10 + $0x1e0] sm:$0xff] }
 0x196   : > { %2173 = vmatpush2.msra.mxu1 %v1737_v10  ;;  %2103 = vmatprep.subr.mxu0 %v1474_v12  ;;  %v1643_v61 = vld [vmem:[%s4063_s10 + $0x9e0] sm:$0xff]  ;;  %v1380_v63 = vld [vmem:[%s4063_s10 + $0x1a8] sm:$0xff] }
 0x197   : > { %2174 = vmatprep.subr.mxu1 %v1730_v13  ;;  %2104 = vmatpush2.msra.mxu0 %v1473_v14  ;;  %v1636_v0 = vld [vmem:[%s4063_s10 + $0x9a8] sm:$0xff]  ;;  %v1379_v1 = vld [vmem:[%s4063_s10 + $0x1a0] sm:$0xff] }
 0x198   : > { %2175 = vmatpush2.msra.mxu1 %v1729_v15  ;;  %2105 = vmatprep.subr.mxu0 %v1466_v16  ;;  %v1635_v2 = vld [vmem:[%s4063_s10 + $0x9a0] sm:$0xff]  ;;  %v1372_v4 = vld [vmem:[%s4063_s10 + $0x168] sm:$0xff] }
 0x199   : > { %2176 = vmatprep.subr.mxu1 %v1722_v17  ;;  %2106 = vmatpush2.msra.mxu0 %v1465_v18  ;;  %v1628_v5 = vld [vmem:[%s4063_s10 + $0x968] sm:$0xff]  ;;  %v1371_v6 = vld [vmem:[%s4063_s10 + $0x160] sm:$0xff] }
 0x19a   : > { %2177 = vmatpush2.msra.mxu1 %v1721_v19  ;;  %2107 = vmatprep.subr.mxu0 %v1458_v20  ;;  %v1627_v7 = vld [vmem:[%s4063_s10 + $0x960] sm:$0xff]  ;;  %v1364_v9 = vld [vmem:[%s4063_s10 + $0x128] sm:$0xff] }
 0x19b   : > { %2178 = vmatprep.subr.mxu1 %v1714_v21  ;;  %2108 = vmatpush2.msra.mxu0 %v1457_v22  ;;  %v1620_v10 = vld [vmem:[%s4063_s10 + $0x928] sm:$0xff]  ;;  %v1363_v12 = vld [vmem:[%s4063_s10 + $0x120] sm:$0xff] }
 0x19c   : > { %2109 = vmatprep.mubr.f32.mxu0 %v4207_v8  ;;  %2179 = vmatpush2.msra.mxu1 %v1713_v23  ;;  %v1619_v13 = vld [vmem:[%s4063_s10 + $0x920] sm:$0xff]  ;;  %v1356_v14 = vld [vmem:[%s4063_s10 + $0xe8] sm:$0xff] }
 0x19d   : > { %2110 = vmatmul.mubr.f32.vlgmr.msra.gmra.mxu0 %v4192_v62  ;;  %2180 = vmatprep.mubr.f32.mxu1 %v4213_v11  ;;  %v1612_v15 = vld [vmem:[%s4063_s10 + $0x8e8] sm:$0xff]  ;;  %v1355_v16 = vld [vmem:[%s4063_s10 + $0xe0] sm:$0xff] }
 0x19e   : > { %2187 = vmatprep.subr.mxu0 %v1452_v24  ;;  %2258 = vmatprep.subr.mxu1 %v1708_v25  ;;  %v1611_v17 = vld [vmem:[%s4063_s10 + $0x8e0] sm:$0xff]  ;;  %v1348_v18 = vld [vmem:[%s4063_s10 + $0xa8] sm:$0xff] }
 0x19f   : > { %2181 = vmatmul.mubr.f32.vlgmr.msra.gmra.mxu1 %v4199_v3  ;;  %2188 = vmatpush1.msra.mxu0 %v1451_v26  ;;  %v1604_v19 = vld [vmem:[%s4063_s10 + $0x8a8] sm:$0xff]  ;;  %v1347_v20 = vld [vmem:[%s4063_s10 + $0xa0] sm:$0xff] }
 0x1a0   : > { %2259 = vmatpush1.msra.mxu1 %v1707_v27  ;;  %2189 = vmatprep.subr.mxu0 %v1444_v28  ;;  %v1603_v21 = vld [vmem:[%s4063_s10 + $0x8a0] sm:$0xff]  ;;  %v1340_v22 = vld [vmem:[%s4063_s10 + $0x68] sm:$0xff] }
 0x1a1   : > { %2260 = vmatprep.subr.mxu1 %v1700_v29  ;;  %2190 = vmatpush1.msra.mxu0 %v1443_v30  ;;  %v1596_v23 = vld [vmem:[%s4063_s10 + $0x868] sm:$0xff]  ;;  %v1339_v24 = vld [vmem:[%s4063_s10 + $0x60] sm:$0xff] }
 0x1a2   : > { %2261 = vmatpush1.msra.mxu1 %v1699_v31  ;;  %2191 = vmatprep.subr.mxu0 %v1436_v32  ;;  %v1595_v25 = vld [vmem:[%s4063_s10 + $0x860] sm:$0xff]  ;;  %v1332_v26 = vld [vmem:[%s4063_s10 + $0x28] sm:$0xff] }
 0x1a3   : > { %2262 = vmatprep.subr.mxu1 %v1692_v33  ;;  %2192 = vmatpush1.msra.mxu0 %v1435_v34  ;;  %v1588_v27 = vld [vmem:[%s4063_s10 + $0x828] sm:$0xff]  ;;  %v1331_v28 = vld [vmem:[%s4063_s10 + $0x20] sm:$0xff] }
 0x1a4   : > { %2263 = vmatpush1.msra.mxu1 %v1691_v35  ;;  %2193 = vmatprep.subr.mxu0 %v1428_v36  ;;  %v1587_v29 = vld [vmem:[%s4063_s10 + $0x820] sm:$0xff]  ;;  %v1580_v30 = vld [vmem:[%s4063_s10 + $0x7e8] sm:$0xff] }
 0x1a5   : > { %2264 = vmatprep.subr.mxu1 %v1684_v37  ;;  %2194 = vmatpush1.msra.mxu0 %v1427_v38  ;;  %v1836_v31 = vld [vmem:[%s4063_s10 + $0xfe8] sm:$0xff]  ;;  %v1579_v32 = vld [vmem:[%s4063_s10 + $0x7e0] sm:$0xff] }
 0x1a6   : > { %2265 = vmatpush1.msra.mxu1 %v1683_v39  ;;  %2195 = vmatprep.subr.mxu0 %v1420_v40  ;;  %v1835_v33 = vld [vmem:[%s4063_s10 + $0xfe0] sm:$0xff]  ;;  %v1572_v34 = vld [vmem:[%s4063_s10 + $0x7a8] sm:$0xff] }
 0x1a7   : > { %2266 = vmatprep.subr.mxu1 %v1676_v42  ;;  %2196 = vmatpush1.msra.mxu0 %v1419_v43  ;;  %v1828_v35 = vld [vmem:[%s4063_s10 + $0xfa8] sm:$0xff]  ;;  %v1571_v36 = vld [vmem:[%s4063_s10 + $0x7a0] sm:$0xff] }
 0x1a8   : > { %2267 = vmatpush1.msra.mxu1 %v1675_v44  ;;  %2197 = vmatprep.subr.mxu0 %v1412_v45  ;;  %v1827_v37 = vld [vmem:[%s4063_s10 + $0xfa0] sm:$0xff]  ;;  %v1564_v38 = vld [vmem:[%s4063_s10 + $0x768] sm:$0xff] }
 0x1a9   : > { %2268 = vmatprep.subr.mxu1 %v1668_v46  ;;  %2198 = vmatpush1.msra.mxu0 %v1411_v47  ;;  %v1820_v39 = vld [vmem:[%s4063_s10 + $0xf68] sm:$0xff]  ;;  %v1563_v40 = vld [vmem:[%s4063_s10 + $0x760] sm:$0xff] }
 0x1aa   : > { %2269 = vmatpush1.msra.mxu1 %v1667_v48  ;;  %2199 = vmatprep.subr.mxu0 %v1404_v49  ;;  %v1819_v42 = vld [vmem:[%s4063_s10 + $0xf60] sm:$0xff]  ;;  %v1556_v43 = vld [vmem:[%s4063_s10 + $0x728] sm:$0xff] }
 0x1ab   : > { %2270 = vmatprep.subr.mxu1 %v1660_v50  ;;  %2200 = vmatpush1.msra.mxu0 %v1403_v51  ;;  %v1812_v44 = vld [vmem:[%s4063_s10 + $0xf28] sm:$0xff]  ;;  %v1555_v45 = vld [vmem:[%s4063_s10 + $0x720] sm:$0xff] }
 0x1ac   : > { %2271 = vmatpush1.msra.mxu1 %v1659_v53  ;;  %2201 = vmatprep.subr.mxu0 %v1396_v54  ;;  %v1811_v46 = vld [vmem:[%s4063_s10 + $0xf20] sm:$0xff]  ;;  %v1548_v47 = vld [vmem:[%s4063_s10 + $0x6e8] sm:$0xff] }
 0x1ad   : > { %2272 = vmatprep.subr.mxu1 %v1652_v55  ;;  %2202 = vmatpush1.msra.mxu0 %v1395_v56  ;;  %v1804_v48 = vld [vmem:[%s4063_s10 + $0xee8] sm:$0xff]  ;;  %v1547_v49 = vld [vmem:[%s4063_s10 + $0x6e0] sm:$0xff] }
 0x1ae   : > { %2273 = vmatpush1.msra.mxu1 %v1651_v57  ;;  %2203 = vmatprep.subr.mxu0 %v1388_v58  ;;  %v1803_v50 = vld [vmem:[%s4063_s10 + $0xee0] sm:$0xff]  ;;  %v1540_v51 = vld [vmem:[%s4063_s10 + $0x6a8] sm:$0xff] }
 0x1af   : > { %2274 = vmatprep.subr.mxu1 %v1644_v59  ;;  %2204 = vmatpush1.msra.mxu0 %v1387_v60  ;;  %v1796_v53 = vld [vmem:[%s4063_s10 + $0xea8] sm:$0xff]  ;;  %v1539_v54 = vld [vmem:[%s4063_s10 + $0x6a0] sm:$0xff] }
 0x1b0   : > { %2275 = vmatpush1.msra.mxu1 %v1643_v61  ;;  %2205 = vmatprep.subr.mxu0 %v1380_v63  ;;  %v1795_v55 = vld [vmem:[%s4063_s10 + $0xea0] sm:$0xff]  ;;  %v1532_v56 = vld [vmem:[%s4063_s10 + $0x668] sm:$0xff] }
 0x1b1   : > { %2276 = vmatprep.subr.mxu1 %v1636_v0  ;;  %2206 = vmatpush1.msra.mxu0 %v1379_v1  ;;  %v1788_v57 = vld [vmem:[%s4063_s10 + $0xe68] sm:$0xff]  ;;  %v1531_v58 = vld [vmem:[%s4063_s10 + $0x660] sm:$0xff] }
 0x1b2   : > { %2277 = vmatpush1.msra.mxu1 %v1635_v2  ;;  %2207 = vmatprep.subr.mxu0 %v1372_v4  ;;  %v1787_v59 = vld [vmem:[%s4063_s10 + $0xe60] sm:$0xff]  ;;  %v1524_v60 = vld [vmem:[%s4063_s10 + $0x628] sm:$0xff] }
 0x1b3   : > { %2278 = vmatprep.subr.mxu1 %v1628_v5  ;;  %2208 = vmatpush1.msra.mxu0 %v1371_v6  ;;  %v1780_v61 = vld [vmem:[%s4063_s10 + $0xe28] sm:$0xff]  ;;  %v1523_v63 = vld [vmem:[%s4063_s10 + $0x620] sm:$0xff] }
 0x1b4   : > { %2279 = vmatpush1.msra.mxu1 %v1627_v7  ;;  %2209 = vmatprep.subr.mxu0 %v1364_v9  ;;  %v1779_v0 = vld [vmem:[%s4063_s10 + $0xe20] sm:$0xff]  ;;  %v1516_v1 = vld [vmem:[%s4063_s10 + $0x5e8] sm:$0xff] }
 0x1b5   : > { %2280 = vmatprep.subr.mxu1 %v1620_v10  ;;  %2210 = vmatpush1.msra.mxu0 %v1363_v12  ;;  %v1772_v2 = vld [vmem:[%s4063_s10 + $0xde8] sm:$0xff]  ;;  %v1515_v4 = vld [vmem:[%s4063_s10 + $0x5e0] sm:$0xff] }
 0x1b6   : > { %2281 = vmatpush1.msra.mxu1 %v1619_v13  ;;  %2211 = vmatprep.subr.mxu0 %v1356_v14  ;;  %v1771_v5 = vld [vmem:[%s4063_s10 + $0xde0] sm:$0xff]  ;;  %v1508_v6 = vld [vmem:[%s4063_s10 + $0x5a8] sm:$0xff] }
 0x1b7   : > { %2282 = vmatprep.subr.mxu1 %v1612_v15  ;;  %2212 = vmatpush1.msra.mxu0 %v1355_v16  ;;  %v1764_v7 = vld [vmem:[%s4063_s10 + $0xda8] sm:$0xff]  ;;  %v1507_v9 = vld [vmem:[%s4063_s10 + $0x5a0] sm:$0xff] }
 0x1b8   : > { %2283 = vmatpush1.msra.mxu1 %v1611_v17  ;;  %2213 = vmatprep.subr.mxu0 %v1348_v18  ;;  %v1763_v10 = vld [vmem:[%s4063_s10 + $0xda0] sm:$0xff]  ;;  %v1500_v12 = vld [vmem:[%s4063_s10 + $0x568] sm:$0xff] }
 0x1b9   : > { %2284 = vmatprep.subr.mxu1 %v1604_v19  ;;  %2214 = vmatpush1.msra.mxu0 %v1347_v20  ;;  %v1756_v13 = vld [vmem:[%s4063_s10 + $0xd68] sm:$0xff]  ;;  %v1499_v14 = vld [vmem:[%s4063_s10 + $0x560] sm:$0xff] }
 0x1ba   : > { %2285 = vmatpush1.msra.mxu1 %v1603_v21  ;;  %2215 = vmatprep.subr.mxu0 %v1340_v22  ;;  %v1755_v15 = vld [vmem:[%s4063_s10 + $0xd60] sm:$0xff]  ;;  %v1492_v16 = vld [vmem:[%s4063_s10 + $0x528] sm:$0xff] }
 0x1bb   : > { %2286 = vmatprep.subr.mxu1 %v1596_v23  ;;  %2216 = vmatpush1.msra.mxu0 %v1339_v24  ;;  %v1748_v17 = vld [vmem:[%s4063_s10 + $0xd28] sm:$0xff]  ;;  %v1491_v18 = vld [vmem:[%s4063_s10 + $0x520] sm:$0xff] }
 0x1bc   : > { %2287 = vmatpush1.msra.mxu1 %v1595_v25  ;;  %2217 = vmatprep.subr.mxu0 %v1332_v26  ;;  %v1747_v19 = vld [vmem:[%s4063_s10 + $0xd20] sm:$0xff]  ;;  %v1484_v20 = vld [vmem:[%s4063_s10 + $0x4e8] sm:$0xff] }
 0x1bd   : > { %2288 = vmatprep.subr.mxu1 %v1588_v27  ;;  %2218 = vmatpush1.msra.mxu0 %v1331_v28  ;;  %v1740_v21 = vld [vmem:[%s4063_s10 + $0xce8] sm:$0xff]  ;;  %v1483_v22 = vld [vmem:[%s4063_s10 + $0x4e0] sm:$0xff] }
 0x1be   : > { %2289 = vmatpush1.msra.mxu1 %v1587_v29  ;;  %2219 = vmatprep.subr.mxu0 %v1580_v30  ;;  %v1739_v23 = vld [vmem:[%s4063_s10 + $0xce0] sm:$0xff]  ;;  %v1476_v24 = vld [vmem:[%s4063_s10 + $0x4a8] sm:$0xff] }
 0x1bf   : > { %2290 = vmatprep.subr.mxu1 %v1836_v31  ;;  %2220 = vmatpush2.msra.mxu0 %v1579_v32  ;;  %v1732_v25 = vld [vmem:[%s4063_s10 + $0xca8] sm:$0xff]  ;;  %v1475_v26 = vld [vmem:[%s4063_s10 + $0x4a0] sm:$0xff] }
 0x1c0   : > { %2291 = vmatpush2.msra.mxu1 %v1835_v33  ;;  %2221 = vmatprep.subr.mxu0 %v1572_v34  ;;  %v1731_v27 = vld [vmem:[%s4063_s10 + $0xca0] sm:$0xff]  ;;  %v1468_v28 = vld [vmem:[%s4063_s10 + $0x468] sm:$0xff] }
 0x1c1   : > { %2292 = vmatprep.subr.mxu1 %v1828_v35  ;;  %2222 = vmatpush2.msra.mxu0 %v1571_v36  ;;  %v1724_v29 = vld [vmem:[%s4063_s10 + $0xc68] sm:$0xff]  ;;  %v1467_v30 = vld [vmem:[%s4063_s10 + $0x460] sm:$0xff]  ;;  %v1454_v36 = vld [vmem:[%s4063_s10 + $0x3f8] sm:$0xff] }
 0x1c2   : > { %2293 = vmatpush2.msra.mxu1 %v1827_v37  ;;  %2223 = vmatprep.subr.mxu0 %v1564_v38  ;;  %v1723_v31 = vld [vmem:[%s4063_s10 + $0xc60] sm:$0xff]  ;;  %v1460_v32 = vld [vmem:[%s4063_s10 + $0x428] sm:$0xff]  ;;  %v1710_v37 = vld [vmem:[%s4063_s10 + $0xbf8] sm:$0xff] }
 0x1c3   : > { %2294 = vmatprep.subr.mxu1 %v1820_v39  ;;  %2224 = vmatpush2.msra.mxu0 %v1563_v40  ;;  %v1716_v33 = vld [vmem:[%s4063_s10 + $0xc28] sm:$0xff]  ;;  %v1459_v34 = vld [vmem:[%s4063_s10 + $0x420] sm:$0xff]  ;;  %v1453_v38 = vld [vmem:[%s4063_s10 + $0x3f0] sm:$0xff] }
 0x1c4   : > { %2295 = vmatpush2.msra.mxu1 %v1819_v42  ;;  %2225 = vmatprep.subr.mxu0 %v1556_v43  ;;  %v1715_v35 = vld [vmem:[%s4063_s10 + $0xc20] sm:$0xff]  ;;  %v1709_v39 = vld [vmem:[%s4063_s10 + $0xbf0] sm:$0xff]  ;;  %v1446_v40 = vld [vmem:[%s4063_s10 + $0x3b8] sm:$0xff] }
 0x1c5   : > { %2296 = vmatprep.subr.mxu1 %v1812_v44  ;;  %2226 = vmatpush2.msra.mxu0 %v1555_v45  ;;  %v1702_v42 = vld [vmem:[%s4063_s10 + $0xbb8] sm:$0xff]  ;;  %v1445_v43 = vld [vmem:[%s4063_s10 + $0x3b0] sm:$0xff] }
 0x1c6   : > { %2297 = vmatpush2.msra.mxu1 %v1811_v46  ;;  %2227 = vmatprep.subr.mxu0 %v1548_v47  ;;  %v1701_v44 = vld [vmem:[%s4063_s10 + $0xbb0] sm:$0xff]  ;;  %v1438_v45 = vld [vmem:[%s4063_s10 + $0x378] sm:$0xff] }
 0x1c7   : > { %2298 = vmatprep.subr.mxu1 %v1804_v48  ;;  %2228 = vmatpush2.msra.mxu0 %v1547_v49  ;;  %v1694_v46 = vld [vmem:[%s4063_s10 + $0xb78] sm:$0xff]  ;;  %v1437_v47 = vld [vmem:[%s4063_s10 + $0x370] sm:$0xff] }
 0x1c8   : > { %2299 = vmatpush2.msra.mxu1 %v1803_v50  ;;  %2229 = vmatprep.subr.mxu0 %v1540_v51  ;;  %v1693_v48 = vld [vmem:[%s4063_s10 + $0xb70] sm:$0xff]  ;;  %v1430_v49 = vld [vmem:[%s4063_s10 + $0x338] sm:$0xff] }
 0x1c9   : > { %2300 = vmatprep.subr.mxu1 %v1796_v53  ;;  %2230 = vmatpush2.msra.mxu0 %v1539_v54  ;;  %v1686_v50 = vld [vmem:[%s4063_s10 + $0xb38] sm:$0xff]  ;;  %v1429_v51 = vld [vmem:[%s4063_s10 + $0x330] sm:$0xff] }
 0x1ca   : > { %2301 = vmatpush2.msra.mxu1 %v1795_v55  ;;  %2231 = vmatprep.subr.mxu0 %v1532_v56  ;;  %v1685_v53 = vld [vmem:[%s4063_s10 + $0xb30] sm:$0xff]  ;;  %v1422_v54 = vld [vmem:[%s4063_s10 + $0x2f8] sm:$0xff] }
 0x1cb   : > { %2302 = vmatprep.subr.mxu1 %v1788_v57  ;;  %2232 = vmatpush2.msra.mxu0 %v1531_v58  ;;  %v1678_v55 = vld [vmem:[%s4063_s10 + $0xaf8] sm:$0xff]  ;;  %v1421_v56 = vld [vmem:[%s4063_s10 + $0x2f0] sm:$0xff] }
 0x1cc   : > { %2303 = vmatpush2.msra.mxu1 %v1787_v59  ;;  %2233 = vmatprep.subr.mxu0 %v1524_v60  ;;  %v1677_v57 = vld [vmem:[%s4063_s10 + $0xaf0] sm:$0xff]  ;;  %v1414_v58 = vld [vmem:[%s4063_s10 + $0x2b8] sm:$0xff] }
 0x1cd   : > { %2304 = vmatprep.subr.mxu1 %v1780_v61  ;;  %2234 = vmatpush2.msra.mxu0 %v1523_v63  ;;  %v1670_v59 = vld [vmem:[%s4063_s10 + $0xab8] sm:$0xff]  ;;  %v1413_v60 = vld [vmem:[%s4063_s10 + $0x2b0] sm:$0xff] }
 0x1ce   : > { %2305 = vmatpush2.msra.mxu1 %v1779_v0  ;;  %2235 = vmatprep.subr.mxu0 %v1516_v1  ;;  %v1669_v61 = vld [vmem:[%s4063_s10 + $0xab0] sm:$0xff]  ;;  %v1406_v63 = vld [vmem:[%s4063_s10 + $0x278] sm:$0xff] }
 0x1cf   : > { %2306 = vmatprep.subr.mxu1 %v1772_v2  ;;  %2236 = vmatpush2.msra.mxu0 %v1515_v4  ;;  %v1662_v0 = vld [vmem:[%s4063_s10 + $0xa78] sm:$0xff]  ;;  %v1405_v1 = vld [vmem:[%s4063_s10 + $0x270] sm:$0xff] }
 0x1d0   : > { %2307 = vmatpush2.msra.mxu1 %v1771_v5  ;;  %2237 = vmatprep.subr.mxu0 %v1508_v6  ;;  %v1661_v2 = vld [vmem:[%s4063_s10 + $0xa70] sm:$0xff]  ;;  %v1398_v4 = vld [vmem:[%s4063_s10 + $0x238] sm:$0xff] }
 0x1d1   : > { %2308 = vmatprep.subr.mxu1 %v1764_v7  ;;  %2238 = vmatpush2.msra.mxu0 %v1507_v9  ;;  %v1654_v5 = vld [vmem:[%s4063_s10 + $0xa38] sm:$0xff]  ;;  %v1397_v6 = vld [vmem:[%s4063_s10 + $0x230] sm:$0xff] }
 0x1d2   : > { %2309 = vmatpush2.msra.mxu1 %v1763_v10  ;;  %2239 = vmatprep.subr.mxu0 %v1500_v12  ;;  %v1653_v7 = vld [vmem:[%s4063_s10 + $0xa30] sm:$0xff]  ;;  %v1390_v9 = vld [vmem:[%s4063_s10 + $0x1f8] sm:$0xff] }
 0x1d3   : > { %2310 = vmatprep.subr.mxu1 %v1756_v13  ;;  %2240 = vmatpush2.msra.mxu0 %v1499_v14  ;;  %v1646_v10 = vld [vmem:[%s4063_s10 + $0x9f8] sm:$0xff]  ;;  %v1389_v12 = vld [vmem:[%s4063_s10 + $0x1f0] sm:$0xff] }
 0x1d4   : > { %2311 = vmatpush2.msra.mxu1 %v1755_v15  ;;  %2241 = vmatprep.subr.mxu0 %v1492_v16  ;;  %v1645_v13 = vld [vmem:[%s4063_s10 + $0x9f0] sm:$0xff]  ;;  %v1382_v14 = vld [vmem:[%s4063_s10 + $0x1b8] sm:$0xff] }
 0x1d5   : > { %2312 = vmatprep.subr.mxu1 %v1748_v17  ;;  %2242 = vmatpush2.msra.mxu0 %v1491_v18  ;;  %v1638_v15 = vld [vmem:[%s4063_s10 + $0x9b8] sm:$0xff]  ;;  %v1381_v16 = vld [vmem:[%s4063_s10 + $0x1b0] sm:$0xff] }
 0x1d6   : > { %2313 = vmatpush2.msra.mxu1 %v1747_v19  ;;  %2243 = vmatprep.subr.mxu0 %v1484_v20  ;;  %v1637_v17 = vld [vmem:[%s4063_s10 + $0x9b0] sm:$0xff]  ;;  %v1374_v18 = vld [vmem:[%s4063_s10 + $0x178] sm:$0xff] }
 0x1d7   : > { %2314 = vmatprep.subr.mxu1 %v1740_v21  ;;  %2244 = vmatpush2.msra.mxu0 %v1483_v22  ;;  %v1630_v19 = vld [vmem:[%s4063_s10 + $0x978] sm:$0xff]  ;;  %v1373_v20 = vld [vmem:[%s4063_s10 + $0x170] sm:$0xff] }
 0x1d8   : > { %2315 = vmatpush2.msra.mxu1 %v1739_v23  ;;  %2245 = vmatprep.subr.mxu0 %v1476_v24  ;;  %v1629_v21 = vld [vmem:[%s4063_s10 + $0x970] sm:$0xff]  ;;  %v1366_v22 = vld [vmem:[%s4063_s10 + $0x138] sm:$0xff] }
 0x1d9   : > { %2316 = vmatprep.subr.mxu1 %v1732_v25  ;;  %2246 = vmatpush2.msra.mxu0 %v1475_v26  ;;  %v1622_v23 = vld [vmem:[%s4063_s10 + $0x938] sm:$0xff]  ;;  %v1365_v24 = vld [vmem:[%s4063_s10 + $0x130] sm:$0xff] }
 0x1da   : > { %2317 = vmatpush2.msra.mxu1 %v1731_v27  ;;  %2247 = vmatprep.subr.mxu0 %v1468_v28  ;;  %v1621_v25 = vld [vmem:[%s4063_s10 + $0x930] sm:$0xff]  ;;  %v1358_v26 = vld [vmem:[%s4063_s10 + $0xf8] sm:$0xff] }
 0x1db   : > { %2318 = vmatprep.subr.mxu1 %v1724_v29  ;;  %2248 = vmatpush2.msra.mxu0 %v1467_v30  ;;  %v1614_v27 = vld [vmem:[%s4063_s10 + $0x8f8] sm:$0xff]  ;;  %v1357_v28 = vld [vmem:[%s4063_s10 + $0xf0] sm:$0xff] }
 0x1dc   : > { %2319 = vmatpush2.msra.mxu1 %v1723_v31  ;;  %2249 = vmatprep.subr.mxu0 %v1460_v32  ;;  %v1613_v29 = vld [vmem:[%s4063_s10 + $0x8f0] sm:$0xff]  ;;  %v1350_v30 = vld [vmem:[%s4063_s10 + $0xb8] sm:$0xff] }
 0x1dd   : > { %2320 = vmatprep.subr.mxu1 %v1716_v33  ;;  %2250 = vmatpush2.msra.mxu0 %v1459_v34  ;;  %v1606_v31 = vld [vmem:[%s4063_s10 + $0x8b8] sm:$0xff]  ;;  %v1349_v32 = vld [vmem:[%s4063_s10 + $0xb0] sm:$0xff] }
 0x1de   : > { %2251 = vmatprep.mubr.f32.mxu0 %v4207_v8  ;;  %2321 = vmatpush2.msra.mxu1 %v1715_v35  ;;  %v1605_v33 = vld [vmem:[%s4063_s10 + $0x8b0] sm:$0xff]  ;;  %v1342_v34 = vld [vmem:[%s4063_s10 + $0x78] sm:$0xff] }
 0x1df   : > { %2252 = vmatmul.mubr.f32.vlgmr.msra.gmra.mxu0 %v4192_v62  ;;  %2322 = vmatprep.mubr.f32.mxu1 %v4213_v11  ;;  %v1598_v35 = vld [vmem:[%s4063_s10 + $0x878] sm:$0xff] }
 0x1e0   : > { %2329 = vmatprep.subr.mxu0 %v1454_v36  ;;  %2400 = vmatprep.subr.mxu1 %v1710_v37  ;;  %v1341_v36 = vld [vmem:[%s4063_s10 + $0x70] sm:$0xff] }
 0x1e1   : > { %2323 = vmatmul.mubr.f32.vlgmr.msra.gmra.mxu1 %v4199_v3  ;;  %2330 = vmatpush1.msra.mxu0 %v1453_v38  ;;  %v1597_v37 = vld [vmem:[%s4063_s10 + $0x870] sm:$0xff]  ;;  %v1334_v38 = vld [vmem:[%s4063_s10 + $0x38] sm:$0xff] }
 0x1e2   : > { %2401 = vmatpush1.msra.mxu1 %v1709_v39  ;;  %2331 = vmatprep.subr.mxu0 %v1446_v40  ;;  %v1590_v39 = vld [vmem:[%s4063_s10 + $0x838] sm:$0xff]  ;;  %v1333_v40 = vld [vmem:[%s4063_s10 + $0x30] sm:$0xff] }
 0x1e3   : > { %2402 = vmatprep.subr.mxu1 %v1702_v42  ;;  %2332 = vmatpush1.msra.mxu0 %v1445_v43  ;;  %v1589_v42 = vld [vmem:[%s4063_s10 + $0x830] sm:$0xff]  ;;  %v1582_v43 = vld [vmem:[%s4063_s10 + $0x7f8] sm:$0xff] }
 0x1e4   : > { %2403 = vmatpush1.msra.mxu1 %v1701_v44  ;;  %2333 = vmatprep.subr.mxu0 %v1438_v45  ;;  %v1838_v44 = vld [vmem:[%s4063_s10 + $0xff8] sm:$0xff]  ;;  %v1581_v45 = vld [vmem:[%s4063_s10 + $0x7f0] sm:$0xff] }
 0x1e5   : > { %2404 = vmatprep.subr.mxu1 %v1694_v46  ;;  %2334 = vmatpush1.msra.mxu0 %v1437_v47  ;;  %v1837_v46 = vld [vmem:[%s4063_s10 + $0xff0] sm:$0xff]  ;;  %v1574_v47 = vld [vmem:[%s4063_s10 + $0x7b8] sm:$0xff] }
 0x1e6   : > { %2405 = vmatpush1.msra.mxu1 %v1693_v48  ;;  %2335 = vmatprep.subr.mxu0 %v1430_v49  ;;  %v1830_v48 = vld [vmem:[%s4063_s10 + $0xfb8] sm:$0xff]  ;;  %v1573_v49 = vld [vmem:[%s4063_s10 + $0x7b0] sm:$0xff] }
 0x1e7   : > { %2406 = vmatprep.subr.mxu1 %v1686_v50  ;;  %2336 = vmatpush1.msra.mxu0 %v1429_v51  ;;  %v1829_v50 = vld [vmem:[%s4063_s10 + $0xfb0] sm:$0xff]  ;;  %v1566_v51 = vld [vmem:[%s4063_s10 + $0x778] sm:$0xff] }
 0x1e8   : > { %2407 = vmatpush1.msra.mxu1 %v1685_v53  ;;  %2337 = vmatprep.subr.mxu0 %v1422_v54  ;;  %v1822_v53 = vld [vmem:[%s4063_s10 + $0xf78] sm:$0xff]  ;;  %v1565_v54 = vld [vmem:[%s4063_s10 + $0x770] sm:$0xff] }
 0x1e9   : > { %2408 = vmatprep.subr.mxu1 %v1678_v55  ;;  %2338 = vmatpush1.msra.mxu0 %v1421_v56  ;;  %v1821_v55 = vld [vmem:[%s4063_s10 + $0xf70] sm:$0xff]  ;;  %v1558_v56 = vld [vmem:[%s4063_s10 + $0x738] sm:$0xff] }
 0x1ea   : > { %2409 = vmatpush1.msra.mxu1 %v1677_v57  ;;  %2339 = vmatprep.subr.mxu0 %v1414_v58  ;;  %v1814_v57 = vld [vmem:[%s4063_s10 + $0xf38] sm:$0xff]  ;;  %v1557_v58 = vld [vmem:[%s4063_s10 + $0x730] sm:$0xff] }
 0x1eb   : > { %2410 = vmatprep.subr.mxu1 %v1670_v59  ;;  %2340 = vmatpush1.msra.mxu0 %v1413_v60  ;;  %v1813_v59 = vld [vmem:[%s4063_s10 + $0xf30] sm:$0xff]  ;;  %v1550_v60 = vld [vmem:[%s4063_s10 + $0x6f8] sm:$0xff] }
 0x1ec   : > { %2411 = vmatpush1.msra.mxu1 %v1669_v61  ;;  %2341 = vmatprep.subr.mxu0 %v1406_v63  ;;  %v1806_v61 = vld [vmem:[%s4063_s10 + $0xef8] sm:$0xff]  ;;  %v1549_v63 = vld [vmem:[%s4063_s10 + $0x6f0] sm:$0xff] }
 0x1ed   : > { %2412 = vmatprep.subr.mxu1 %v1662_v0  ;;  %2342 = vmatpush1.msra.mxu0 %v1405_v1  ;;  %v1805_v0 = vld [vmem:[%s4063_s10 + $0xef0] sm:$0xff]  ;;  %v1542_v1 = vld [vmem:[%s4063_s10 + $0x6b8] sm:$0xff] }
 0x1ee   : > { %2413 = vmatpush1.msra.mxu1 %v1661_v2  ;;  %2343 = vmatprep.subr.mxu0 %v1398_v4  ;;  %v1798_v2 = vld [vmem:[%s4063_s10 + $0xeb8] sm:$0xff]  ;;  %v1541_v4 = vld [vmem:[%s4063_s10 + $0x6b0] sm:$0xff] }
 0x1ef   : > { %2414 = vmatprep.subr.mxu1 %v1654_v5  ;;  %2344 = vmatpush1.msra.mxu0 %v1397_v6  ;;  %v1797_v5 = vld [vmem:[%s4063_s10 + $0xeb0] sm:$0xff]  ;;  %v1534_v6 = vld [vmem:[%s4063_s10 + $0x678] sm:$0xff] }
 0x1f0   : > { %2415 = vmatpush1.msra.mxu1 %v1653_v7  ;;  %2345 = vmatprep.subr.mxu0 %v1390_v9  ;;  %v1790_v7 = vld [vmem:[%s4063_s10 + $0xe78] sm:$0xff]  ;;  %v1533_v9 = vld [vmem:[%s4063_s10 + $0x670] sm:$0xff] }
 0x1f1   : > { %2416 = vmatprep.subr.mxu1 %v1646_v10  ;;  %2346 = vmatpush1.msra.mxu0 %v1389_v12  ;;  %v1789_v10 = vld [vmem:[%s4063_s10 + $0xe70] sm:$0xff]  ;;  %v1526_v12 = vld [vmem:[%s4063_s10 + $0x638] sm:$0xff] }
 0x1f2   : > { %2417 = vmatpush1.msra.mxu1 %v1645_v13  ;;  %2347 = vmatprep.subr.mxu0 %v1382_v14  ;;  %v1782_v13 = vld [vmem:[%s4063_s10 + $0xe38] sm:$0xff]  ;;  %v1525_v14 = vld [vmem:[%s4063_s10 + $0x630] sm:$0xff] }
 0x1f3   : > { %2418 = vmatprep.subr.mxu1 %v1638_v15  ;;  %2348 = vmatpush1.msra.mxu0 %v1381_v16  ;;  %v1781_v15 = vld [vmem:[%s4063_s10 + $0xe30] sm:$0xff]  ;;  %v1518_v16 = vld [vmem:[%s4063_s10 + $0x5f8] sm:$0xff] }
 0x1f4   : > { %2419 = vmatpush1.msra.mxu1 %v1637_v17  ;;  %2349 = vmatprep.subr.mxu0 %v1374_v18  ;;  %v1774_v17 = vld [vmem:[%s4063_s10 + $0xdf8] sm:$0xff]  ;;  %v1517_v18 = vld [vmem:[%s4063_s10 + $0x5f0] sm:$0xff] }
 0x1f5   : > { %2420 = vmatprep.subr.mxu1 %v1630_v19  ;;  %2350 = vmatpush1.msra.mxu0 %v1373_v20  ;;  %v1773_v19 = vld [vmem:[%s4063_s10 + $0xdf0] sm:$0xff]  ;;  %v1510_v20 = vld [vmem:[%s4063_s10 + $0x5b8] sm:$0xff] }
 0x1f6   : > { %2421 = vmatpush1.msra.mxu1 %v1629_v21  ;;  %2351 = vmatprep.subr.mxu0 %v1366_v22  ;;  %v1766_v21 = vld [vmem:[%s4063_s10 + $0xdb8] sm:$0xff]  ;;  %v1509_v22 = vld [vmem:[%s4063_s10 + $0x5b0] sm:$0xff] }
 0x1f7   : > { %2422 = vmatprep.subr.mxu1 %v1622_v23  ;;  %2352 = vmatpush1.msra.mxu0 %v1365_v24  ;;  %v1765_v23 = vld [vmem:[%s4063_s10 + $0xdb0] sm:$0xff]  ;;  %v1502_v24 = vld [vmem:[%s4063_s10 + $0x578] sm:$0xff] }
 0x1f8   : > { %2423 = vmatpush1.msra.mxu1 %v1621_v25  ;;  %2353 = vmatprep.subr.mxu0 %v1358_v26  ;;  %v1758_v25 = vld [vmem:[%s4063_s10 + $0xd78] sm:$0xff]  ;;  %v1501_v26 = vld [vmem:[%s4063_s10 + $0x570] sm:$0xff] }
 0x1f9   : > { %2424 = vmatprep.subr.mxu1 %v1614_v27  ;;  %2354 = vmatpush1.msra.mxu0 %v1357_v28  ;;  %v1757_v27 = vld [vmem:[%s4063_s10 + $0xd70] sm:$0xff]  ;;  %v1494_v28 = vld [vmem:[%s4063_s10 + $0x538] sm:$0xff] }
 0x1fa   : > { %2425 = vmatpush1.msra.mxu1 %v1613_v29  ;;  %2355 = vmatprep.subr.mxu0 %v1350_v30  ;;  %v1750_v29 = vld [vmem:[%s4063_s10 + $0xd38] sm:$0xff]  ;;  %v1493_v30 = vld [vmem:[%s4063_s10 + $0x530] sm:$0xff] }
 0x1fb   : > { %2426 = vmatprep.subr.mxu1 %v1606_v31  ;;  %2356 = vmatpush1.msra.mxu0 %v1349_v32  ;;  %v1749_v31 = vld [vmem:[%s4063_s10 + $0xd30] sm:$0xff]  ;;  %v1486_v32 = vld [vmem:[%s4063_s10 + $0x4f8] sm:$0xff] }
 0x1fc   : > { %2427 = vmatpush1.msra.mxu1 %v1605_v33  ;;  %2357 = vmatprep.subr.mxu0 %v1342_v34  ;;  %v1742_v33 = vld [vmem:[%s4063_s10 + $0xcf8] sm:$0xff]  ;;  %v1485_v34 = vld [vmem:[%s4063_s10 + $0x4f0] sm:$0xff] }
 0x1fd   : > { %2428 = vmatprep.subr.mxu1 %v1598_v35  ;;  %2358 = vmatpush1.msra.mxu0 %v1341_v36  ;;  %v1741_v35 = vld [vmem:[%s4063_s10 + $0xcf0] sm:$0xff]  ;;  %v1478_v36 = vld [vmem:[%s4063_s10 + $0x4b8] sm:$0xff] }
 0x1fe   : > { %2429 = vmatpush1.msra.mxu1 %v1597_v37  ;;  %2359 = vmatprep.subr.mxu0 %v1334_v38  ;;  %v1734_v37 = vld [vmem:[%s4063_s10 + $0xcb8] sm:$0xff]  ;;  %v1477_v38 = vld [vmem:[%s4063_s10 + $0x4b0] sm:$0xff] }
 0x1ff   : > { %2430 = vmatprep.subr.mxu1 %v1590_v39  ;;  %2360 = vmatpush1.msra.mxu0 %v1333_v40  ;;  %v1733_v39 = vld [vmem:[%s4063_s10 + $0xcb0] sm:$0xff]  ;;  %v1470_v40 = vld [vmem:[%s4063_s10 + $0x478] sm:$0xff] }
 0x200   : > { %2431 = vmatpush1.msra.mxu1 %v1589_v42  ;;  %2361 = vmatprep.subr.mxu0 %v1582_v43  ;;  %v1726_v42 = vld [vmem:[%s4063_s10 + $0xc78] sm:$0xff]  ;;  %v1469_v43 = vld [vmem:[%s4063_s10 + $0x470] sm:$0xff] }
 0x201   : > { %2432 = vmatprep.subr.mxu1 %v1838_v44  ;;  %2362 = vmatpush2.msra.mxu0 %v1581_v45  ;;  %v1725_v44 = vld [vmem:[%s4063_s10 + $0xc70] sm:$0xff]  ;;  %v1462_v45 = vld [vmem:[%s4063_s10 + $0x438] sm:$0xff] }
 0x202   : > { %2433 = vmatpush2.msra.mxu1 %v1837_v46  ;;  %2363 = vmatprep.subr.mxu0 %v1574_v47  ;;  %v1718_v46 = vld [vmem:[%s4063_s10 + $0xc38] sm:$0xff]  ;;  %v1461_v47 = vld [vmem:[%s4063_s10 + $0x430] sm:$0xff] }
 0x203   : > { %2434 = vmatprep.subr.mxu1 %v1830_v48  ;;  %2364 = vmatpush2.msra.mxu0 %v1573_v49  ;;  %v1717_v48 = vld [vmem:[%s4063_s10 + $0xc30] sm:$0xff]  ;;  %v4625_v49 = vsub.s32 1, %v4167_v41 }
 0x204   : > { %2435 = vmatpush2.msra.mxu1 %v1829_v50  ;;  %2365 = vmatprep.subr.mxu0 %v1566_v51  ;;  %v4628_v51 = vsub.s32 0, %v4167_v41 }
 0x205   : > { %2436 = vmatprep.subr.mxu1 %v1822_v53  ;;  %2366 = vmatpush2.msra.mxu0 %v1565_v54  ;;  %v4630_v53 = vld [vmem:[%s1308_s16] sm:$0xff] }
 0x206   : > { %2437 = vmatpush2.msra.mxu1 %v1821_v55  ;;  %2367 = vmatprep.subr.mxu0 %v1558_v56  ;;  %v1844_v55 = vrot.slane %v4630_v53, %v4628_v51 }
 0x207   : > { %2438 = vmatprep.subr.mxu1 %v1814_v57  ;;  %2368 = vmatpush2.msra.mxu0 %v1557_v58 }
 0x208   : > { %2439 = vmatpush2.msra.mxu1 %v1813_v59  ;;  %2369 = vmatprep.subr.mxu0 %v1550_v60 }
 0x209   : > { %2440 = vmatprep.subr.mxu1 %v1806_v61  ;;  %2370 = vmatpush2.msra.mxu0 %v1549_v63 }
 0x20a   : > { %2441 = vmatpush2.msra.mxu1 %v1805_v0  ;;  %2371 = vmatprep.subr.mxu0 %v1542_v1 }
 0x20b   : > { %2442 = vmatprep.subr.mxu1 %v1798_v2  ;;  %2372 = vmatpush2.msra.mxu0 %v1541_v4 }
 0x20c   : > { %2443 = vmatpush2.msra.mxu1 %v1797_v5  ;;  %2373 = vmatprep.subr.mxu0 %v1534_v6 }
 0x20d   : > { %2444 = vmatprep.subr.mxu1 %v1790_v7  ;;  %2374 = vmatpush2.msra.mxu0 %v1533_v9 }
 0x20e   : > { %2445 = vmatpush2.msra.mxu1 %v1789_v10  ;;  %2375 = vmatprep.subr.mxu0 %v1526_v12 }
 0x20f   : > { %2446 = vmatprep.subr.mxu1 %v1782_v13  ;;  %2376 = vmatpush2.msra.mxu0 %v1525_v14 }
 0x210   : > { %2447 = vmatpush2.msra.mxu1 %v1781_v15  ;;  %2377 = vmatprep.subr.mxu0 %v1518_v16 }
 0x211   : > { %2448 = vmatprep.subr.mxu1 %v1774_v17  ;;  %2378 = vmatpush2.msra.mxu0 %v1517_v18  ;;  %v4645_v18 = vsub.s32 2, %v4167_v41 }
 0x212   : > { %2449 = vmatpush2.msra.mxu1 %v1773_v19  ;;  %2379 = vmatprep.subr.mxu0 %v1510_v20  ;;  %v4650_v20 = vsub.s32 3, %v4167_v41 }
 0x213   : > { %2450 = vmatprep.subr.mxu1 %v1766_v21  ;;  %2380 = vmatpush2.msra.mxu0 %v1509_v22  ;;  %v1852_v22 = vrot.slane %v4630_v53, %v4645_v18 }
 0x214   : > { %2451 = vmatpush2.msra.mxu1 %v1765_v23  ;;  %2381 = vmatprep.subr.mxu0 %v1502_v24 }
 0x215   : > { %2452 = vmatprep.subr.mxu1 %v1758_v25  ;;  %2382 = vmatpush2.msra.mxu0 %v1501_v26  ;;  %v1856_v25 = vrot.slane %v4630_v53, %v4650_v20 }
 0x216   : > { %2453 = vmatpush2.msra.mxu1 %v1757_v27  ;;  %2383 = vmatprep.subr.mxu0 %v1494_v28 }
 0x217   : > { %2454 = vmatprep.subr.mxu1 %v1750_v29  ;;  %2384 = vmatpush2.msra.mxu0 %v1493_v30 }
 0x218   : > { %2455 = vmatpush2.msra.mxu1 %v1749_v31  ;;  %2385 = vmatprep.subr.mxu0 %v1486_v32 }
 0x219   : > { %2456 = vmatprep.subr.mxu1 %v1742_v33  ;;  %2386 = vmatpush2.msra.mxu0 %v1485_v34 }
 0x21a   : > { %2457 = vmatpush2.msra.mxu1 %v1741_v35  ;;  %2387 = vmatprep.subr.mxu0 %v1478_v36 }
 0x21b   : > { %2458 = vmatprep.subr.mxu1 %v1734_v37  ;;  %2388 = vmatpush2.msra.mxu0 %v1477_v38  ;;  %v1969_v50 = vpop.f32.mrf.mxu0 }
 0x21c   : > { %2459 = vmatpush2.msra.mxu1 %v1733_v39  ;;  %2389 = vmatprep.subr.mxu0 %v1470_v40 }
 0x21d   : > { %2460 = vmatprep.subr.mxu1 %v1726_v42  ;;  %2390 = vmatpush2.msra.mxu0 %v1469_v43  ;;  %v1971_v54 = vpop.f32.mrf.mxu0 }
 0x21e   : > { %2461 = vmatpush2.msra.mxu1 %v1725_v44  ;;  %2391 = vmatprep.subr.mxu0 %v1462_v45 }
 0x21f   : > { %2462 = vmatprep.subr.mxu1 %v1718_v46  ;;  %2392 = vmatpush2.msra.mxu0 %v1461_v47 }
 0x220   : > { %2393 = vmatprep.mubr.f32.mxu0 %v4207_v8  ;;  %2463 = vmatpush2.msra.mxu1 %v1717_v48  ;;  %v1848_v8 = vrot.slane %v4630_v53, %v4625_v49 }
 0x221   : > { %2464 = vmatprep.mubr.f32.mxu1 %v4213_v11  ;;  %2394 = vmatmul.mubr.f32.vlgmr.msra.gmra.mxu0 %v4192_v62  ;;  %v2040_v11 = vpop.f32.mrf.mxu1 }
 0x222   : > { %2465 = vmatmul.mubr.f32.vlgmr.msra.gmra.mxu1 %v4199_v3  ;;  %v1972_v62 = vadd.f32 %v1971_v54, %v1848_v8  ;;  %v1970_v3 = vadd.f32 %v1969_v50, %v1844_v55 }
 0x223   : > { %v2042_v56 = vpop.f32.mrf.mxu1 }
 0x224   : > { %v2043_v57 = vadd.f32 %v2042_v56, %v1972_v62  ;;  %v2041_v58 = vadd.f32 %v2040_v11, %v1970_v3 }
 0x226   : > { %v2479_v59 = vsel %vm2471_vm0, %v2043_v57, 0.0  ;;  %v2472_v60 = vsel %vm2471_vm0, %v2041_v58, 0.0 }
 0x227   : > { %v2480_v61 = vrot.slane %v2479_v59, 4  ;;  %v2473_v63 = vrot.slane %v2472_v60, 4 }
 0x229   : > { %v2481_v0 = vadd.f32 %v2480_v61, %v2479_v59  ;;  %v2474_v1 = vadd.f32 %v2473_v63, %v2472_v60 }
 0x22b   : > { %v2482_v2 = vrot.slane %v2481_v0, 2  ;;  %v2475_v4 = vrot.slane %v2474_v1, 2 }
 0x22d   : > { %v2483_v5 = vadd.f32 %v2482_v2, %v2481_v0  ;;  %v2476_v6 = vadd.f32 %v2475_v4, %v2474_v1 }
 0x22f   : > { %v2484_v7 = vrot.slane %v2483_v5, 1  ;;  %v2477_v9 = vrot.slane %v2476_v6, 1 }
 0x231   : > { %v2485_v10 = vadd.f32 %v2484_v7, %v2483_v5  ;;  %v2478_v12 = vadd.f32 %v2477_v9, %v2476_v6 }
 0x233   : > { %v2530_v13 = vmul.f32 0.5, %v2485_v10  ;;  %v2529_v14 = vmul.f32 0.5, %v2478_v12 }
 0x235   : > { %v4638_v15 = vsub.f32 %v2043_v57, %v2530_v13  ;;  %v4640_v16 = vsub.f32 %v2041_v58, %v2529_v14 }
 0x237   : > { %v2546_v17 = vmul.f32 %v4638_v15, %v4638_v15  ;;  %v2545_v19 = vmul.f32 %v4640_v16, %v4640_v16 }
 0x239   : > { %v2560_v21 = vsel %vm2471_vm0, %v2546_v17, 0.0  ;;  %v2553_v23 = vsel %vm2471_vm0, %v2545_v19, 0.0 }
 0x23a   : > { %v2561_v24 = vrot.slane %v2560_v21, 4  ;;  %v2554_v27 = vrot.slane %v2553_v23, 4 }
 0x23c   : > { %v2562_v31 = vadd.f32 %v2561_v24, %v2560_v21  ;;  %v2555_v35 = vadd.f32 %v2554_v27, %v2553_v23 }
 0x23e   : > { %v2563_v39 = vrot.slane %v2562_v31, 2  ;;  %v2556_v44 = vrot.slane %v2555_v35, 2 }
 0x240   : > { %v2564_v47 = vadd.f32 %v2563_v39, %v2562_v31  ;;  %v2557_v8 = vadd.f32 %v2556_v44, %v2555_v35  ;;  %v4678_v39 = vld [vmem:[%s1318_s24] sm:$0xff] }
 0x241   : > { %v2696_v44 = vrot.slane %v4678_v39, %v4628_v51 }
 0x242   : > { %v2565_v55 = vrot.slane %v2564_v47, 1  ;;  %v2558_v3 = vrot.slane %v2557_v8, 1 }
 0x244   : > { %v2566_v59 = vadd.f32 %v2565_v55, %v2564_v47  ;;  %v2559_v63 = vadd.f32 %v2558_v3, %v2557_v8 }
 0x246   : > { %v2610_v2 = vmul.f32 0.5, %v2566_v59  ;;  %v2609_v6 = vmul.f32 0.5, %v2559_v63  ;;  %v4702_v63 = vsub.s32 5, %v4167_v41 }
 0x248   : > { %v2618_v10 = vadd.f32 1e-05, %v2610_v2  ;;  %v2617_v14 = vadd.f32 1e-05, %v2609_v6  ;;  %v1864_v2 = vrot.slane %v4630_v53, %v4702_v63 }
 0x24a   : > { %2927 = vrsqrt.f32 %v2618_v10 }
 0x24b   : > { %2929 = vrsqrt.f32 %v2617_v14 }
 0x25d   : > { %v2111_v26 = vpop.f32.mrf.mxu0 }
 0x25e   : > { %v2112_v28 = vadd.f32 %v2111_v26, %v1852_v22 }
 0x25f   : > { %v2182_v29 = vpop.f32.mrf.mxu1  ;;  %v2113_v30 = vpop.f32.mrf.mxu0 }
 0x260   : > { %v2183_v32 = vadd.f32 %v2182_v29, %v2112_v28  ;;  %v2114_v33 = vadd.f32 %v2113_v30, %v1856_v25 }
 0x261   : > { %v2184_v34 = vpop.f32.mrf.mxu1 }
 0x262   : > { %v2486_v36 = vsel %vm2471_vm0, %v2183_v32, 0.0  ;;  %v2185_v37 = vadd.f32 %v2184_v34, %v2114_v33  ;;  %v4666_v34 = vld [vmem:[%s1313_s20] sm:$0xff] }
 0x263   : > { %v2487_v38 = vrot.slane %v2486_v36, 4 }
 0x264   : > { %v2493_v40 = vsel %vm2471_vm0, %v2185_v37, 0.0 }
 0x265   : > { %v2488_v42 = vadd.f32 %v2487_v38, %v2486_v36  ;;  %v2494_v43 = vrot.slane %v2493_v40, 4  ;;  %v2650_v36 = vrot.slane %v4666_v34, %v4625_v49  ;;  %v2646_v38 = vrot.slane %v4666_v34, %v4628_v51 }
 0x266   : > { %v2708_v51 = vrot.slane %v4678_v39, %v4650_v20 }
 0x267   : > { %v2489_v45 = vrot.slane %v2488_v42, 2  ;;  %v2495_v46 = vadd.f32 %v2494_v43, %v2493_v40 }
 0x269   : > { %v2490_v48 = vadd.f32 %v2489_v45, %v2488_v42  ;;  %v2496_v50 = vrot.slane %v2495_v46, 2  ;;  %v2700_v42 = vrot.slane %v4678_v39, %v4625_v49 }
 0x26b   : > { %v2491_v11 = vrot.slane %v2490_v48, 1  ;;  %v2497_v54 = vadd.f32 %v2496_v50, %v2495_v46 }
 0x26d   : > { %v2492_v62 = vadd.f32 %v2491_v11, %v2490_v48  ;;  %v2498_v56 = vrot.slane %v2497_v54, 1  ;;  %v2658_v48 = vrot.slane %v4666_v34, %v4650_v20 }
 0x26f   : > { %v2531_v57 = vmul.f32 0.5, %v2492_v62  ;;  %v2499_v58 = vadd.f32 %v2498_v56, %v2497_v54 }
 0x271   : > { %v2539_v60 = vsub.f32 %v2183_v32, %v2531_v57  ;;  %v2532_v61 = vmul.f32 0.5, %v2499_v58  ;;  %v2928_v32 = vpop.eup %2927 }
 0x272   : > { %v2930_v33 = vpop.eup %2929  ;;  %v2634_v35 = vmul.f32 %v2928_v32, %v4638_v15  ;;  %v2654_v15 = vrot.slane %v4666_v34, %v4645_v18 }
 0x273   : > { %v2547_v0 = vmul.f32 %v2539_v60, %v2539_v60  ;;  %v2540_v1 = vsub.f32 %v2185_v37, %v2532_v61  ;;  %v2633_v37 = vmul.f32 %v2930_v33, %v4640_v16  ;;  %v2704_v16 = vrot.slane %v4678_v39, %v4645_v18 }
 0x274   : > { %v2684_v40 = vmul.f32 %v2650_v36, %v2634_v35 }
 0x275   : > { %v2567_v4 = vsel %vm2471_vm0, %v2547_v0, 0.0  ;;  %v2548_v5 = vmul.f32 %v2540_v1, %v2540_v1  ;;  %v2683_v43 = vmul.f32 %v2646_v38, %v2633_v37  ;;  %v4720_v38 = vsub.s32 6, %v4167_v41 }
 0x276   : > { %v2568_v7 = vrot.slane %v2567_v4, 4  ;;  %v2734_v46 = vadd.f32 %v2700_v42, %v2684_v40  ;;  %v4725_v42 = vsub.s32 7, %v4167_v41 }
 0x277   : > { %v2574_v9 = vsel %vm2471_vm0, %v2548_v5, 0.0  ;;  %v2733_v8 = vadd.f32 %v2696_v44, %v2683_v43  ;;  %v1868_v44 = vrot.slane %v4630_v53, %v4720_v38 }
 0x278   : > { %v2569_v12 = vadd.f32 %v2568_v7, %v2567_v4  ;;  %v2575_v13 = vrot.slane %v2574_v9, 4  ;;  %v2742_v54 = vmax.f32 %v2734_v46, 0.0  ;;  %v1872_v46 = vrot.slane %v4630_v53, %v4725_v42 }
 0x279   : > { %v2741_v56 = vmax.f32 %v2733_v8, 0.0 }
 0x27a   : > { %v2570_v17 = vrot.slane %v2569_v12, 2  ;;  %v2576_v19 = vadd.f32 %v2575_v13, %v2574_v9 }
 0x27b   : > { %v2757_v57 = vcombine.low %v2741_v56, %v2742_v54 }
 0x27c   : > { %v2571_v21 = vadd.f32 %v2570_v17, %v2569_v12  ;;  %v2577_v22 = vrot.slane %v2576_v19, 2 }
 0x27e   : > { %v2572_v23 = vrot.slane %v2571_v21, 1  ;;  %v2578_v24 = vadd.f32 %v2577_v22, %v2576_v19 }
 0x280   : > { %v2573_v25 = vadd.f32 %v2572_v23, %v2571_v21  ;;  %v2579_v26 = vrot.slane %v2578_v24, 1 }
 0x282   : > { %v2611_v27 = vmul.f32 0.5, %v2573_v25  ;;  %v2580_v28 = vadd.f32 %v2579_v26, %v2578_v24 }
 0x284   : > { %v2619_v29 = vadd.f32 1e-05, %v2611_v27  ;;  %v2612_v30 = vmul.f32 0.5, %v2580_v28 }
 0x286   : > { %2931 = vrsqrt.f32 %v2619_v29  ;;  %v2620_v31 = vadd.f32 1e-05, %v2612_v30 }
 0x288   : > { %2933 = vrsqrt.f32 %v2620_v31 }
 0x293   : > { %v2932_v45 = vpop.eup %2931 }
 0x294   : > { %v2635_v47 = vmul.f32 %v2932_v45, %v2539_v60  ;;  %v2765_v60 = vrot.slane %v2757_v57, %v4181_v52 }
 0x295   : > { %v2934_v50 = vpop.eup %2933 }
 0x296   : > { %v2685_v49 = vmul.f32 %v2654_v15, %v2635_v47  ;;  %v2636_v11 = vmul.f32 %v2934_v50, %v2540_v1  ;;  %v4705_v1 = vsub.s32 4, %v4167_v41 }
 0x298   : > { %v2735_v55 = vadd.f32 %v2704_v16, %v2685_v49  ;;  %v2686_v62 = vmul.f32 %v2658_v48, %v2636_v11  ;;  %v1860_v6 = vrot.slane %v4630_v53, %v4705_v1 }
 0x29a   : > { %v2736_v3 = vadd.f32 %v2708_v51, %v2686_v62  ;;  %v2743_v58 = vmax.f32 %v2735_v55, 0.0 }
 0x29c   : > { %v2744_v59 = vmax.f32 %v2736_v3, 0.0 }
 0x29e   : > { %v2758_v18 = vcombine.low %v2743_v58, %v2744_v59 }
 0x29f   : > { %v2253_v0 = vpop.f32.mrf.mxu0 }
 0x2a0   : > { %v2772_v61 = vrot.slane %v2758_v18, %v4181_v52  ;;  %v2254_v10 = vadd.f32 %v2253_v0, %v1860_v6 }
 0x2a1   : > { %v2324_v4 = vpop.f32.mrf.mxu1  ;;  %v2255_v5 = vpop.f32.mrf.mxu0 }
 0x2a2   : > { %v2773_v20 = vcombine.low %v2765_v60, %v2772_v61  ;;  %v2256_v7 = vadd.f32 %v2255_v5, %v1864_v2  ;;  %v2325_v13 = vadd.f32 %v2324_v4, %v2254_v10 }
 0x2a3   : > { %v2326_v9 = vpop.f32.mrf.mxu1 }
 0x2a4   : > { %2793 = vst [vmem:[%s4698_s29] sm:$0xff] %v2773_v20  ;;  %v2327_v12 = vadd.f32 %v2326_v9, %v2256_v7  ;;  %v2500_v17 = vsel %vm2471_vm0, %v2325_v13, 0.0 }
 0x2a5   : > { %v2501_v21 = vrot.slane %v2500_v17, 4 }
 0x2a6   : > { %v2507_v14 = vsel %vm2471_vm0, %v2327_v12, 0.0 }
 0x2a7   : > { %v2508_v19 = vrot.slane %v2507_v14, 4  ;;  %v2502_v23 = vadd.f32 %v2501_v21, %v2500_v17 }
 0x2a9   : > { %v2509_v22 = vadd.f32 %v2508_v19, %v2507_v14  ;;  %v2503_v25 = vrot.slane %v2502_v23, 2 }
 0x2ab   : > { %v2510_v24 = vrot.slane %v2509_v22, 2  ;;  %v2504_v27 = vadd.f32 %v2503_v25, %v2502_v23 }
 0x2ad   : > { %v2511_v26 = vadd.f32 %v2510_v24, %v2509_v22  ;;  %v2505_v29 = vrot.slane %v2504_v27, 1 }
 0x2af   : > { %v2512_v28 = vrot.slane %v2511_v26, 1  ;;  %v2506_v31 = vadd.f32 %v2505_v29, %v2504_v27 }
 0x2b1   : > { %v2513_v30 = vadd.f32 %v2512_v28, %v2511_v26  ;;  %v2533_v33 = vmul.f32 0.5, %v2506_v31 }
 0x2b3   : > { %v2534_v32 = vmul.f32 0.5, %v2513_v30  ;;  %v4715_v36 = vsub.f32 %v2325_v13, %v2533_v33 }
 0x2b5   : > { %v4713_v35 = vsub.f32 %v2327_v12, %v2534_v32  ;;  %v2549_v40 = vmul.f32 %v4715_v36, %v4715_v36 }
 0x2b7   : > { %v2550_v37 = vmul.f32 %v4713_v35, %v4713_v35  ;;  %v2581_v15 = vsel %vm2471_vm0, %v2549_v40, 0.0 }
 0x2b8   : > { %v2582_v48 = vrot.slane %v2581_v15, 4 }
 0x2b9   : > { %v2588_v43 = vsel %vm2471_vm0, %v2550_v37, 0.0 }
 0x2ba   : > { %v2589_v45 = vrot.slane %v2588_v43, 4  ;;  %v2583_v54 = vadd.f32 %v2582_v48, %v2581_v15 }
 0x2bc   : > { %v2590_v49 = vadd.f32 %v2589_v45, %v2588_v43  ;;  %v2584_v53 = vrot.slane %v2583_v54, 2 }
 0x2be   : > { %v2591_v3 = vrot.slane %v2590_v49, 2  ;;  %v2585_v2 = vadd.f32 %v2584_v53, %v2583_v54  ;;  %v2666_v54 = vrot.slane %v4666_v34, %v4702_v63 }
 0x2c0   : > { %v2592_v61 = vadd.f32 %v2591_v3, %v2590_v49  ;;  %v2586_v10 = vrot.slane %v2585_v2, 1  ;;  %v2716_v3 = vrot.slane %v4678_v39, %v4702_v63 }
 0x2c2   : > { %v2593_v6 = vrot.slane %v2592_v61, 1  ;;  %v2587_v21 = vadd.f32 %v2586_v10, %v2585_v2 }
 0x2c4   : > { %v2594_v14 = vadd.f32 %v2593_v6, %v2592_v61  ;;  %v2613_v27 = vmul.f32 0.5, %v2587_v21 }
 0x2c6   : > { %v2614_v24 = vmul.f32 0.5, %v2594_v14  ;;  %v2621_v33 = vadd.f32 1e-05, %v2613_v27 }
 0x2c8   : > { %v2622_v30 = vadd.f32 1e-05, %v2614_v24 }
 0x2ca   : > { %2935 = vrsqrt.f32 %v2622_v30 }
 0x2cb   : > { %2937 = vrsqrt.f32 %v2621_v33 }
 0x2e1   : > { %v2395_v47 = vpop.f32.mrf.mxu0 }
 0x2e2   : > { %v2466_v16 = vpop.f32.mrf.mxu1  ;;  %v2396_v50 = vadd.f32 %v2395_v47, %v1868_v44 }
 0x2e3   : > { %v2397_v8 = vpop.f32.mrf.mxu0 }
 0x2e4   : > { %v2467_v11 = vadd.f32 %v2466_v16, %v2396_v50  ;;  %v2398_v41 = vadd.f32 %v2397_v8, %v1872_v46  ;;  %v2468_v51 = vpop.f32.mrf.mxu1 }
 0x2e6   : > { %v2514_v55 = vsel %vm2471_vm0, %v2467_v11, 0.0  ;;  %v2469_v62 = vadd.f32 %v2468_v51, %v2398_v41 }
 0x2e7   : > { %v2515_v56 = vrot.slane %v2514_v55, 4 }
 0x2e8   : > { %v2521_v57 = vsel %vm2471_vm0, %v2469_v62, 0.0 }
 0x2e9   : > { %v2516_v58 = vadd.f32 %v2515_v56, %v2514_v55  ;;  %v2522_v59 = vrot.slane %v2521_v57, 4 }
 0x2eb   : > { %v2517_v18 = vrot.slane %v2516_v58, 2  ;;  %v2523_v60 = vadd.f32 %v2522_v59, %v2521_v57  ;;  %v2670_v59 = vrot.slane %v4666_v34, %v4720_v38 }
 0x2ed   : > { %v2518_v20 = vadd.f32 %v2517_v18, %v2516_v58  ;;  %v2524_v0 = vrot.slane %v2523_v60, 2  ;;  %v2712_v58 = vrot.slane %v4678_v39, %v4705_v1 }
 0x2ef   : > { %v2519_v4 = vrot.slane %v2518_v20, 1  ;;  %v2525_v5 = vadd.f32 %v2524_v0, %v2523_v60  ;;  %v2674_v60 = vrot.slane %v4666_v34, %v4725_v42 }
 0x2f1   : > { %v2520_v7 = vadd.f32 %v2519_v4, %v2518_v20  ;;  %v2526_v9 = vrot.slane %v2525_v5, 1 }
 0x2f3   : > { %v2535_v12 = vmul.f32 0.5, %v2520_v7  ;;  %v2527_v13 = vadd.f32 %v2526_v9, %v2525_v5 }
 0x2f5   : > { %v2543_v17 = vsub.f32 %v2467_v11, %v2535_v12  ;;  %v2536_v19 = vmul.f32 0.5, %v2527_v13  ;;  %v2936_v11 = vpop.eup %2935 }
 0x2f6   : > { %v2938_v41 = vpop.eup %2937  ;;  %v2638_v51 = vmul.f32 %v2936_v11, %v4713_v35 }
 0x2f7   : > { %v2551_v22 = vmul.f32 %v2543_v17, %v2543_v17  ;;  %v2544_v23 = vsub.f32 %v2469_v62, %v2536_v19  ;;  %v2637_v55 = vmul.f32 %v2938_v41, %v4715_v36  ;;  %v2662_v62 = vrot.slane %v4666_v34, %v4705_v1 }
 0x2f8   : > { %v2688_v56 = vmul.f32 %v2666_v54, %v2638_v51  ;;  %v2720_v36 = vrot.slane %v4678_v39, %v4720_v38  ;;  %v2724_v1 = vrot.slane %v4678_v39, %v4725_v42 }
 0x2f9   : > { %v2595_v25 = vsel %vm2471_vm0, %v2551_v22, 0.0  ;;  %v2552_v26 = vmul.f32 %v2544_v23, %v2544_v23  ;;  %v2687_v57 = vmul.f32 %v2662_v62, %v2637_v55 }
 0x2fa   : > { %v2596_v28 = vrot.slane %v2595_v25, 4  ;;  %v2738_v53 = vadd.f32 %v2716_v3, %v2688_v56 }
 0x2fb   : > { %v2602_v29 = vsel %vm2471_vm0, %v2552_v26, 0.0  ;;  %v2737_v20 = vadd.f32 %v2712_v58, %v2687_v57 }
 0x2fc   : > { %v2597_v31 = vadd.f32 %v2596_v28, %v2595_v25  ;;  %v2603_v32 = vrot.slane %v2602_v29, 4  ;;  %v2746_v2 = vmax.f32 %v2738_v53, 0.0 }
 0x2fd   : > { %v2745_v6 = vmax.f32 %v2737_v20, 0.0 }
 0x2fe   : > { %v2598_v37 = vrot.slane %v2597_v31, 2  ;;  %v2604_v40 = vadd.f32 %v2603_v32, %v2602_v29 }
 0x2ff   : > { %v2774_v9 = vcombine.low %v2745_v6, %v2746_v2 }
 0x300   : > { %v2599_v43 = vadd.f32 %v2598_v37, %v2597_v31  ;;  %v2605_v44 = vrot.slane %v2604_v40, 2 }
 0x301   : > { %v2782_v13 = vrot.slane %v2774_v9, %v4181_v52 }
 0x302   : > { %v2600_v15 = vrot.slane %v2599_v43, 1  ;;  %v2606_v45 = vadd.f32 %v2605_v44, %v2604_v40 }
 0x304   : > { %v2601_v46 = vadd.f32 %v2600_v15, %v2599_v43  ;;  %v2607_v47 = vrot.slane %v2606_v45, 1 }
 0x306   : > { %v2615_v16 = vmul.f32 0.5, %v2601_v46  ;;  %v2608_v48 = vadd.f32 %v2607_v47, %v2606_v45 }
 0x308   : > { %v2623_v50 = vadd.f32 1e-05, %v2615_v16  ;;  %v2616_v8 = vmul.f32 0.5, %v2608_v48 }
 0x30a   : > { %2939 = vrsqrt.f32 %v2623_v50  ;;  %v2624_v49 = vadd.f32 1e-05, %v2616_v8 }
 0x30c   : > { %2941 = vrsqrt.f32 %v2624_v49 }
 0x317   : > { %v2940_v35 = vpop.eup %2939 }
 0x318   : > { %v2639_v18 = vmul.f32 %v2940_v35, %v2543_v17 }
 0x319   : > { %v2942_v61 = vpop.eup %2941 }
 0x31a   : > { %v2689_v63 = vmul.f32 %v2670_v59, %v2639_v18  ;;  %v2640_v0 = vmul.f32 %v2942_v61, %v2544_v23 }
 0x31c   : > { %v2739_v4 = vadd.f32 %v2720_v36, %v2689_v63  ;;  %v2690_v5 = vmul.f32 %v2674_v60, %v2640_v0 }
 0x31e   : > { %v2740_v7 = vadd.f32 %v2724_v1, %v2690_v5  ;;  %v2747_v10 = vmax.f32 %v2739_v4, 0.0 }
 0x320   : > { %v2748_v12 = vmax.f32 %v2740_v7, 0.0 }
 0x322   : > { %v2775_v38 = vcombine.low %v2747_v10, %v2748_v12 }
 0x324   : > { %v2789_v34 = vrot.slane %v2775_v38, %v4181_v52 }
 0x326   : > { %v2790_v14 = vcombine.low %v2782_v13, %v2789_v34 }
 0x328   : > { %2794 = vst [vmem:[%s4698_s29 + $0x8] sm:$0xff] %v2790_v14 }
 0x329 PF: > { %p12_p9 = scmp.ge.s32.totalorder %s3015_s22, 4   ;;  %s4774_s18 = smov %s2961_s19 }
 0x32a   : > { %s4775_s19 = smov %s3024_s25  ;;  %s4776_s20 = smov %s3015_s22 }
 0x32b   :  { %14 = sbr.rel (!%p12_p9) target bundleno = 2 (0x2), region = 107 }

// kernel: tile.18
= control target key start
LH: loop header
LB: loop body
LE: loop exit
PB: predicated region body
PF: predicated region fallthrough
CT: control target
= control target key end

     0   :  { %s22_s0 = inlined_call_operand.vmem [shape: f32[32], index: 0, kind: input, shape index: {}]   ;;  %s23_s1 = inlined_call_operand.vmem [shape: f32[4,32], index: 1, kind: output, shape index: {}]  }
   0x1   :  { %v4_v0 = vld [vmem:[%s22_s0] ss:$0 sm:$0xff] }
   0x2   :  { %5 = vst [vmem:[%s23_s1] sm:$0xf] %v4_v0 }

// kernel: tile.27
= control target key start
LH: loop header
LB: loop body
LE: loop exit
PB: predicated region body
PF: predicated region fallthrough
CT: control target
= control target key end

     0   :  { %vm8_vm0 = vcmask 261120   ;;  %s40_s8 = smov 32   ;;  %s41_s9 = smov 64   ;;  %vm14_vm1 = vcmask 1048320   ;;  %vm20_vm2 = vcmask 785920   ;;  %vm26_vm3 = vcmask 523520   ;;  %s58_s0 = inlined_call_operand.vmem [shape: f32[4,32], index: 0, kind: input, shape index: {}]   ;;  %s59_s1 = inlined_call_operand.vmem [shape: f32[1,128], index: 1, kind: output, shape index: {}]  }
   0x1   :  { %v5_v0 = vld [vmem:[%s58_s0] sm:$0xf]  ;;  %s39_s0 = smov 96  }
   0x2   :  { %6 = vst [vmem:[#allocation1] sm:$0xf] %v5_v0 }
   0x9   :  { %v11_v1 = vld [vmem:[#allocation1 + $0x3] sm:$0x1]   ;;  %v23_v2 = vld [vmem:[#allocation1 + $0x1] sm:$0x1]   ;;  %v7_v3 = vld [vmem:[#allocation1] sm:$0x1]  }
   0xa   :  { %12 = vrot.lane.b32.xlu0 %v11_v1, %s39_s0  ;;  %24 = vrot.lane.b32.xlu1 %v23_v2, %s40_s8  ;;  %v17_v4 = vld [vmem:[#allocation1 + $0x2] sm:$0x1]   ;;  %9 = vst.msk [vmem:[#allocation0] sm:$0x1] %vm8_vm0, %v7_v3  }
   0xe   :  { %18 = vrot.lane.b32.xlu0 %v17_v4, %s41_s9 }
  0x7c   :  { %v13_v5 = vpop.permute.xlu0 %12   ;;  %v25_v6 = vpop.permute.xlu1 %24  }
  0x7d   :  { %15 = vst.msk [vmem:[#allocation0] sm:$0x1] %vm14_vm1, %v13_v5  }
  0x80   :  { %v19_v7 = vpop.permute.xlu0 %18  }
  0x81   :  { %21 = vst.msk [vmem:[#allocation0] sm:$0x1] %vm20_vm2, %v19_v7  }
  0x82   :  { %27 = vst.msk [vmem:[#allocation0] sm:$0x1] %vm26_vm3, %v25_v6  }
  0x89   :  { %v32_v8 = vld [vmem:[#allocation0] sm:$0x1] }
  0x8a   :  { %35 = vst [vmem:[%s59_s1] sm:$0x1] %v32_v8 }

// kernel: decoder_vae_forward.6
= control target key start
LH: loop header
LB: loop body
LE: loop exit
PB: predicated region body
PF: predicated region fallthrough
CT: control target
= control target key end

     0   :  { %s2530_s1 = inlined_call_operand.vmem [shape: f32[1152,128], index: 1, kind: input, shape index: {}]   ;;  %s2531_s0 = inlined_call_operand.vmem [shape: f32[32,1152], index: 0, kind: input, shape index: {}]   ;;  %s2532_s2 = inlined_call_operand.vmem [shape: f32[1,128], index: 2, kind: input, shape index: {}]   ;;  %s2533_s3 = inlined_call_operand.vmem [shape: f32[1,128], index: 3, kind: input, shape index: {}]   ;;  %s2534_s4 = inlined_call_operand.vmem [shape: f32[1,128], index: 4, kind: input, shape index: {}]   ;;  %s2535_s5 = inlined_call_operand.vmem [shape: f32[32,128], index: 5, kind: output, shape index: {}]  }
   0x1   :  { %v87_v0 = vld [vmem:[%s2530_s1 + $0xf8] sm:$0xff]  ;;  %v86_v2 = vld [vmem:[%s2530_s1 + $0xf0] sm:$0xff]  ;;  %v85_v6 = vld [vmem:[%s2530_s1 + $0xe8] sm:$0xff] }
   0x2   :  { %v71_v1 = vld [vmem:[%s2530_s1 + $0x78] sm:$0xff]  ;;  %1289 = vmatprep.subr.mxu0 %v87_v0  ;;  %v70_v4 = vld [vmem:[%s2530_s1 + $0x70] sm:$0xff]  ;;  %v69_v8 = vld [vmem:[%s2530_s1 + $0x68] sm:$0xff] }
   0x3   :  { %v119_v3 = vld [vmem:[%s2530_s1 + $0x1f8] sm:$0xff]  ;;  %1290 = vmatpush3.msra.mxu0 %v71_v1  ;;  %v118_v7 = vld [vmem:[%s2530_s1 + $0x1f0] sm:$0xff]  ;;  %v117_v10 = vld [vmem:[%s2530_s1 + $0x1e8] sm:$0xff] }
   0x4   :  { %v103_v5 = vld [vmem:[%s2530_s1 + $0x178] sm:$0xff]  ;;  %1333 = vmatprep.subr.mxu1 %v119_v3  ;;  %1291 = vmatprep.subr.mxu0 %v86_v2  ;;  %v102_v9 = vld [vmem:[%s2530_s1 + $0x170] sm:$0xff]  ;;  %v84_v11 = vld [vmem:[%s2530_s1 + $0xe0] sm:$0xff] }
   0x5   :  { %1334 = vmatpush3.msra.mxu1 %v103_v5  ;;  %1292 = vmatpush3.msra.mxu0 %v70_v4  ;;  %v101_v12 = vld [vmem:[%s2530_s1 + $0x168] sm:$0xff]  ;;  %v68_v13 = vld [vmem:[%s2530_s1 + $0x60] sm:$0xff]  ;;  %v83_v15 = vld [vmem:[%s2530_s1 + $0xd8] sm:$0xff] }
   0x6   :  { %1335 = vmatprep.subr.mxu1 %v118_v7  ;;  %1293 = vmatprep.subr.mxu0 %v85_v6  ;;  %v116_v14 = vld [vmem:[%s2530_s1 + $0x1e0] sm:$0xff]  ;;  %v67_v17 = vld [vmem:[%s2530_s1 + $0x58] sm:$0xff]  ;;  %v82_v19 = vld [vmem:[%s2530_s1 + $0xd0] sm:$0xff] }
   0x7   :  { %1336 = vmatpush3.msra.mxu1 %v102_v9  ;;  %1294 = vmatpush3.msra.mxu0 %v69_v8  ;;  %v100_v16 = vld [vmem:[%s2530_s1 + $0x160] sm:$0xff]  ;;  %v115_v18 = vld [vmem:[%s2530_s1 + $0x1d8] sm:$0xff]  ;;  %v66_v21 = vld [vmem:[%s2530_s1 + $0x50] sm:$0xff] }
   0x8   :  { %1337 = vmatprep.subr.mxu1 %v117_v10  ;;  %1295 = vmatprep.subr.mxu0 %v84_v11  ;;  %v99_v20 = vld [vmem:[%s2530_s1 + $0x158] sm:$0xff]  ;;  %v114_v22 = vld [vmem:[%s2530_s1 + $0x1d0] sm:$0xff]  ;;  %v81_v23 = vld [vmem:[%s2530_s1 + $0xc8] sm:$0xff] }
   0x9   :  { %1338 = vmatpush3.msra.mxu1 %v101_v12  ;;  %1296 = vmatpush3.msra.mxu0 %v68_v13  ;;  %v98_v24 = vld [vmem:[%s2530_s1 + $0x150] sm:$0xff]  ;;  %v65_v25 = vld [vmem:[%s2530_s1 + $0x48] sm:$0xff]  ;;  %v80_v27 = vld [vmem:[%s2530_s1 + $0xc0] sm:$0xff] }
   0xa   :  { %1339 = vmatprep.subr.mxu1 %v116_v14  ;;  %1297 = vmatprep.subr.mxu0 %v83_v15  ;;  %v113_v26 = vld [vmem:[%s2530_s1 + $0x1c8] sm:$0xff]  ;;  %v64_v29 = vld [vmem:[%s2530_s1 + $0x40] sm:$0xff]  ;;  %v79_v31 = vld [vmem:[%s2530_s1 + $0xb8] sm:$0xff] }
   0xb   :  { %1340 = vmatpush3.msra.mxu1 %v100_v16  ;;  %1298 = vmatpush3.msra.mxu0 %v67_v17  ;;  %v97_v28 = vld [vmem:[%s2530_s1 + $0x148] sm:$0xff]  ;;  %v112_v30 = vld [vmem:[%s2530_s1 + $0x1c0] sm:$0xff]  ;;  %v63_v33 = vld [vmem:[%s2530_s1 + $0x38] sm:$0xff] }
   0xc   :  { %1341 = vmatprep.subr.mxu1 %v115_v18  ;;  %1299 = vmatprep.subr.mxu0 %v82_v19  ;;  %v96_v32 = vld [vmem:[%s2530_s1 + $0x140] sm:$0xff]  ;;  %v111_v34 = vld [vmem:[%s2530_s1 + $0x1b8] sm:$0xff]  ;;  %v78_v35 = vld [vmem:[%s2530_s1 + $0xb0] sm:$0xff] }
   0xd   :  { %1342 = vmatpush3.msra.mxu1 %v99_v20  ;;  %1300 = vmatpush3.msra.mxu0 %v66_v21  ;;  %v95_v36 = vld [vmem:[%s2530_s1 + $0x138] sm:$0xff]  ;;  %v62_v37 = vld [vmem:[%s2530_s1 + $0x30] sm:$0xff]  ;;  %v77_v39 = vld [vmem:[%s2530_s1 + $0xa8] sm:$0xff] }
   0xe   :  { %1343 = vmatprep.subr.mxu1 %v114_v22  ;;  %1301 = vmatprep.subr.mxu0 %v81_v23  ;;  %v110_v38 = vld [vmem:[%s2530_s1 + $0x1b0] sm:$0xff]  ;;  %v61_v41 = vld [vmem:[%s2530_s1 + $0x28] sm:$0xff]  ;;  %v76_v43 = vld [vmem:[%s2530_s1 + $0xa0] sm:$0xff] }
   0xf   :  { %1344 = vmatpush3.msra.mxu1 %v98_v24  ;;  %1302 = vmatpush3.msra.mxu0 %v65_v25  ;;  %v94_v40 = vld [vmem:[%s2530_s1 + $0x130] sm:$0xff]  ;;  %v109_v42 = vld [vmem:[%s2530_s1 + $0x1a8] sm:$0xff]  ;;  %v60_v45 = vld [vmem:[%s2530_s1 + $0x20] sm:$0xff] }
  0x10   :  { %1345 = vmatprep.subr.mxu1 %v113_v26  ;;  %1303 = vmatprep.subr.mxu0 %v80_v27  ;;  %v93_v44 = vld [vmem:[%s2530_s1 + $0x128] sm:$0xff]  ;;  %v108_v46 = vld [vmem:[%s2530_s1 + $0x1a0] sm:$0xff]  ;;  %v75_v47 = vld [vmem:[%s2530_s1 + $0x98] sm:$0xff] }
  0x11   :  { %1346 = vmatpush3.msra.mxu1 %v97_v28  ;;  %1304 = vmatpush3.msra.mxu0 %v64_v29  ;;  %v92_v48 = vld [vmem:[%s2530_s1 + $0x120] sm:$0xff]  ;;  %v59_v49 = vld [vmem:[%s2530_s1 + $0x18] sm:$0xff]  ;;  %v74_v51 = vld [vmem:[%s2530_s1 + $0x90] sm:$0xff] }
  0x12   :  { %1347 = vmatprep.subr.mxu1 %v112_v30  ;;  %1305 = vmatprep.subr.mxu0 %v79_v31  ;;  %v107_v50 = vld [vmem:[%s2530_s1 + $0x198] sm:$0xff]  ;;  %v58_v53 = vld [vmem:[%s2530_s1 + $0x10] sm:$0xff]  ;;  %v73_v55 = vld [vmem:[%s2530_s1 + $0x88] sm:$0xff] }
  0x13   :  { %1348 = vmatpush3.msra.mxu1 %v96_v32  ;;  %1306 = vmatpush3.msra.mxu0 %v63_v33  ;;  %v91_v52 = vld [vmem:[%s2530_s1 + $0x118] sm:$0xff]  ;;  %v106_v54 = vld [vmem:[%s2530_s1 + $0x190] sm:$0xff]  ;;  %v57_v57 = vld [vmem:[%s2530_s1 + $0x8] sm:$0xff] }
  0x14   :  { %1349 = vmatprep.subr.mxu1 %v111_v34  ;;  %1307 = vmatprep.subr.mxu0 %v78_v35  ;;  %v90_v56 = vld [vmem:[%s2530_s1 + $0x110] sm:$0xff]  ;;  %v105_v58 = vld [vmem:[%s2530_s1 + $0x188] sm:$0xff]  ;;  %v72_v59 = vld [vmem:[%s2530_s1 + $0x80] sm:$0xff] }
  0x15   :  { %1350 = vmatpush3.msra.mxu1 %v95_v36  ;;  %1308 = vmatpush3.msra.mxu0 %v62_v37  ;;  %v21_v60 = vld [vmem:[%s2531_s0 + $0x8] sm:$0xff]  ;;  %v56_v61 = vld [vmem:[%s2530_s1] sm:$0xff]  ;;  %v151_v1 = vld [vmem:[%s2530_s1 + $0x2f8] sm:$0xff] }
  0x16   :  { %1351 = vmatprep.subr.mxu1 %v110_v38  ;;  %1309 = vmatprep.subr.mxu0 %v77_v39  ;;  %v89_v62 = vld [vmem:[%s2530_s1 + $0x108] sm:$0xff]  ;;  %v20_v63 = vld [vmem:[%s2531_s0] sm:$0xff]  ;;  %v23_v3 = vld [vmem:[%s2531_s0 + $0x18] sm:$0xff] }
  0x17   :  { %1352 = vmatpush3.msra.mxu1 %v94_v40  ;;  %1310 = vmatpush3.msra.mxu0 %v61_v41  ;;  %v104_v0 = vld [vmem:[%s2530_s1 + $0x180] sm:$0xff]  ;;  %v135_v4 = vld [vmem:[%s2530_s1 + $0x278] sm:$0xff]  ;;  %v22_v5 = vld [vmem:[%s2531_s0 + $0x10] sm:$0xff] }
  0x18   :  { %1353 = vmatprep.subr.mxu1 %v109_v42  ;;  %1311 = vmatprep.subr.mxu0 %v76_v43  ;;  %v88_v2 = vld [vmem:[%s2530_s1 + $0x100] sm:$0xff]  ;;  %v150_v6 = vld [vmem:[%s2530_s1 + $0x2f0] sm:$0xff]  ;;  %v183_v7 = vld [vmem:[%s2530_s1 + $0x3f8] sm:$0xff] }
  0x19   :  { %1354 = vmatpush3.msra.mxu1 %v93_v44  ;;  %1312 = vmatpush3.msra.mxu0 %v60_v45  ;;  %v134_v8 = vld [vmem:[%s2530_s1 + $0x270] sm:$0xff]  ;;  %v167_v9 = vld [vmem:[%s2530_s1 + $0x378] sm:$0xff]  ;;  %v149_v10 = vld [vmem:[%s2530_s1 + $0x2e8] sm:$0xff] }
  0x1a   :  { %1355 = vmatprep.subr.mxu1 %v108_v46  ;;  %1313 = vmatprep.subr.mxu0 %v75_v47  ;;  %v182_v11 = vld [vmem:[%s2530_s1 + $0x3f0] sm:$0xff]  ;;  %v133_v12 = vld [vmem:[%s2530_s1 + $0x268] sm:$0xff]  ;;  %v148_v14 = vld [vmem:[%s2530_s1 + $0x2e0] sm:$0xff] }
  0x1b   :  { %1356 = vmatpush3.msra.mxu1 %v92_v48  ;;  %1314 = vmatpush3.msra.mxu0 %v59_v49  ;;  %v166_v13 = vld [vmem:[%s2530_s1 + $0x370] sm:$0xff]  ;;  %v181_v15 = vld [vmem:[%s2530_s1 + $0x3e8] sm:$0xff]  ;;  %v132_v16 = vld [vmem:[%s2530_s1 + $0x260] sm:$0xff] }
  0x1c   :  { %1357 = vmatprep.subr.mxu1 %v107_v50  ;;  %1315 = vmatprep.subr.mxu0 %v74_v51  ;;  %v165_v17 = vld [vmem:[%s2530_s1 + $0x368] sm:$0xff]  ;;  %v147_v18 = vld [vmem:[%s2530_s1 + $0x2d8] sm:$0xff]  ;;  %v180_v19 = vld [vmem:[%s2530_s1 + $0x3e0] sm:$0xff] }
  0x1d   :  { %1358 = vmatpush3.msra.mxu1 %v91_v52  ;;  %1316 = vmatpush3.msra.mxu0 %v58_v53  ;;  %v131_v20 = vld [vmem:[%s2530_s1 + $0x258] sm:$0xff]  ;;  %v164_v21 = vld [vmem:[%s2530_s1 + $0x360] sm:$0xff]  ;;  %v146_v22 = vld [vmem:[%s2530_s1 + $0x2d0] sm:$0xff] }
  0x1e   :  { %1359 = vmatprep.subr.mxu1 %v106_v54  ;;  %1317 = vmatprep.subr.mxu0 %v73_v55  ;;  %v179_v23 = vld [vmem:[%s2530_s1 + $0x3d8] sm:$0xff]  ;;  %v130_v24 = vld [vmem:[%s2530_s1 + $0x250] sm:$0xff]  ;;  %v145_v26 = vld [vmem:[%s2530_s1 + $0x2c8] sm:$0xff] }
  0x1f   :  { %1360 = vmatpush3.msra.mxu1 %v90_v56  ;;  %1318 = vmatpush3.msra.mxu0 %v57_v57  ;;  %v163_v25 = vld [vmem:[%s2530_s1 + $0x358] sm:$0xff]  ;;  %v178_v27 = vld [vmem:[%s2530_s1 + $0x3d0] sm:$0xff]  ;;  %v129_v28 = vld [vmem:[%s2530_s1 + $0x248] sm:$0xff] }
  0x20   :  { %1361 = vmatprep.subr.mxu1 %v105_v58  ;;  %1319 = vmatprep.subr.mxu0 %v72_v59  ;;  %v162_v29 = vld [vmem:[%s2530_s1 + $0x350] sm:$0xff]  ;;  %v144_v30 = vld [vmem:[%s2530_s1 + $0x2c0] sm:$0xff]  ;;  %v177_v31 = vld [vmem:[%s2530_s1 + $0x3c8] sm:$0xff] }
  0x21   :  { %271 = vmatprep.mubr.f32.mxu0 %v21_v60  ;;  %1320 = vmatpush3.msra.mxu0 %v56_v61  ;;  %v128_v32 = vld [vmem:[%s2530_s1 + $0x240] sm:$0xff]  ;;  %v161_v33 = vld [vmem:[%s2530_s1 + $0x348] sm:$0xff]  ;;  %v143_v34 = vld [vmem:[%s2530_s1 + $0x2b8] sm:$0xff] }
  0x22   :  { %1362 = vmatpush3.msra.mxu1 %v89_v62  ;;  %272 = vmatmul.mubr.f32.vlgmr.msra.gmra.mxu0 %v20_v63  ;;  %v176_v35 = vld [vmem:[%s2530_s1 + $0x3c0] sm:$0xff]  ;;  %v127_v36 = vld [vmem:[%s2530_s1 + $0x238] sm:$0xff]  ;;  %v30_v38 = vld [vmem:[%s2531_s0 + $0x50] sm:$0xff] }
  0x23   :  { %1363 = vmatprep.subr.mxu1 %v104_v0  ;;  %1377 = vmatprep.subr.mxu0 %v151_v1  ;;  %v160_v37 = vld [vmem:[%s2530_s1 + $0x340] sm:$0xff]  ;;  %v142_v39 = vld [vmem:[%s2530_s1 + $0x2b0] sm:$0xff]  ;;  %v175_v40 = vld [vmem:[%s2530_s1 + $0x3b8] sm:$0xff] }
  0x24   :  { %1364 = vmatpush3.msra.mxu1 %v88_v2  ;;  %356 = vmatprep.mubr.f32.mxu1 %v23_v3  ;;  %v29_v41 = vld [vmem:[%s2531_s0 + $0x48] sm:$0xff]  ;;  %v159_v42 = vld [vmem:[%s2530_s1 + $0x338] sm:$0xff]  ;;  %v126_v43 = vld [vmem:[%s2530_s1 + $0x230] sm:$0xff] }
  0x25   :  { %1378 = vmatpush3.msra.mxu0 %v135_v4  ;;  %357 = vmatmul.mubr.f32.vlgmr.msra.gmra.mxu1 %v22_v5  ;;  %v32_v44 = vld [vmem:[%s2531_s0 + $0x60] sm:$0xff]  ;;  %v141_v45 = vld [vmem:[%s2530_s1 + $0x2a8] sm:$0xff]  ;;  %v174_v46 = vld [vmem:[%s2530_s1 + $0x3b0] sm:$0xff] }
  0x26   :  { %1379 = vmatprep.subr.mxu0 %v150_v6  ;;  %1421 = vmatprep.subr.mxu1 %v183_v7  ;;  %v31_v47 = vld [vmem:[%s2531_s0 + $0x58] sm:$0xff]  ;;  %v125_v48 = vld [vmem:[%s2530_s1 + $0x228] sm:$0xff]  ;;  %v158_v49 = vld [vmem:[%s2530_s1 + $0x330] sm:$0xff] }
  0x27   :  { %1380 = vmatpush3.msra.mxu0 %v134_v8  ;;  %1422 = vmatpush3.msra.mxu1 %v167_v9  ;;  %v39_v50 = vld [vmem:[%s2531_s0 + $0x98] sm:$0xff]  ;;  %v140_v51 = vld [vmem:[%s2530_s1 + $0x2a0] sm:$0xff]  ;;  %v173_v52 = vld [vmem:[%s2530_s1 + $0x3a8] sm:$0xff] }
  0x28   :  { %1381 = vmatprep.subr.mxu0 %v149_v10  ;;  %1423 = vmatprep.subr.mxu1 %v182_v11  ;;  %v38_v53 = vld [vmem:[%s2531_s0 + $0x90] sm:$0xff]  ;;  %v157_v54 = vld [vmem:[%s2530_s1 + $0x328] sm:$0xff]  ;;  %v124_v55 = vld [vmem:[%s2530_s1 + $0x220] sm:$0xff] }
  0x29   :  { %1382 = vmatpush3.msra.mxu0 %v133_v12  ;;  %1424 = vmatpush3.msra.mxu1 %v166_v13  ;;  %v41_v56 = vld [vmem:[%s2531_s0 + $0xa8] sm:$0xff]  ;;  %v139_v57 = vld [vmem:[%s2530_s1 + $0x298] sm:$0xff]  ;;  %v172_v58 = vld [vmem:[%s2530_s1 + $0x3a0] sm:$0xff] }
  0x2a   :  { %1383 = vmatprep.subr.mxu0 %v148_v14  ;;  %1425 = vmatprep.subr.mxu1 %v181_v15  ;;  %v40_v59 = vld [vmem:[%s2531_s0 + $0xa0] sm:$0xff]  ;;  %v123_v60 = vld [vmem:[%s2530_s1 + $0x218] sm:$0xff]  ;;  %v138_v63 = vld [vmem:[%s2530_s1 + $0x290] sm:$0xff] }
  0x2b   :  { %1384 = vmatpush3.msra.mxu0 %v132_v16  ;;  %1426 = vmatpush3.msra.mxu1 %v165_v17  ;;  %v156_v61 = vld [vmem:[%s2530_s1 + $0x320] sm:$0xff]  ;;  %v171_v0 = vld [vmem:[%s2530_s1 + $0x398] sm:$0xff]  ;;  %v122_v3 = vld [vmem:[%s2530_s1 + $0x210] sm:$0xff] }
  0x2c   :  { %1385 = vmatprep.subr.mxu0 %v147_v18  ;;  %1427 = vmatprep.subr.mxu1 %v180_v19  ;;  %v48_v62 = vld [vmem:[%s2531_s0 + $0xe0] sm:$0xff]  ;;  %v47_v1 = vld [vmem:[%s2531_s0 + $0xd8] sm:$0xff]  ;;  %v50_v4 = vld [vmem:[%s2531_s0 + $0xf0] sm:$0xff] }
  0x2d   :  { %1386 = vmatpush3.msra.mxu0 %v131_v20  ;;  %1428 = vmatpush3.msra.mxu1 %v164_v21  ;;  %v155_v2 = vld [vmem:[%s2530_s1 + $0x318] sm:$0xff]  ;;  %v137_v5 = vld [vmem:[%s2530_s1 + $0x288] sm:$0xff]  ;;  %v170_v6 = vld [vmem:[%s2530_s1 + $0x390] sm:$0xff] }
  0x2e   :  { %1387 = vmatprep.subr.mxu0 %v146_v22  ;;  %1429 = vmatprep.subr.mxu1 %v179_v23  ;;  %v49_v7 = vld [vmem:[%s2531_s0 + $0xe8] sm:$0xff]  ;;  %v154_v9 = vld [vmem:[%s2530_s1 + $0x310] sm:$0xff]  ;;  %v136_v10 = vld [vmem:[%s2530_s1 + $0x280] sm:$0xff] }
  0x2f   :  { %1388 = vmatpush3.msra.mxu0 %v130_v24  ;;  %1430 = vmatpush3.msra.mxu1 %v163_v25  ;;  %v121_v8 = vld [vmem:[%s2530_s1 + $0x208] sm:$0xff]  ;;  %v120_v12 = vld [vmem:[%s2530_s1 + $0x200] sm:$0xff]  ;;  %v199_v17 = vld [vmem:[%s2530_s1 + $0x478] sm:$0xff] }
  0x30   :  { %1389 = vmatprep.subr.mxu0 %v145_v26  ;;  %1431 = vmatprep.subr.mxu1 %v178_v27  ;;  %v169_v11 = vld [vmem:[%s2530_s1 + $0x388] sm:$0xff]  ;;  %v24_v15 = vld [vmem:[%s2531_s0 + $0x20] sm:$0xff]  ;;  %v27_v19 = vld [vmem:[%s2531_s0 + $0x38] sm:$0xff] }
  0x31   :  { %1390 = vmatpush3.msra.mxu0 %v129_v28  ;;  %1432 = vmatpush3.msra.mxu1 %v162_v29  ;;  %v25_v13 = vld [vmem:[%s2531_s0 + $0x28] sm:$0xff]  ;;  %v168_v16 = vld [vmem:[%s2530_s1 + $0x380] sm:$0xff]  ;;  %v26_v20 = vld [vmem:[%s2531_s0 + $0x30] sm:$0xff] }
  0x32   :  { %1391 = vmatprep.subr.mxu0 %v144_v30  ;;  %1433 = vmatprep.subr.mxu1 %v177_v31  ;;  %v153_v14 = vld [vmem:[%s2530_s1 + $0x308] sm:$0xff]  ;;  %v152_v18 = vld [vmem:[%s2530_s1 + $0x300] sm:$0xff]  ;;  %v198_v21 = vld [vmem:[%s2530_s1 + $0x470] sm:$0xff] }
  0x33   :  { %1392 = vmatpush3.msra.mxu0 %v128_v32  ;;  %1434 = vmatpush3.msra.mxu1 %v161_v33  ;;  %v34_v22 = vld [vmem:[%s2531_s0 + $0x70] sm:$0xff]  ;;  %v33_v23 = vld [vmem:[%s2531_s0 + $0x68] sm:$0xff]  ;;  %v36_v25 = vld [vmem:[%s2531_s0 + $0x80] sm:$0xff] }
  0x34   :  { %1393 = vmatprep.subr.mxu0 %v143_v34  ;;  %1435 = vmatprep.subr.mxu1 %v176_v35  ;;  %v197_v24 = vld [vmem:[%s2530_s1 + $0x468] sm:$0xff]  ;;  %v35_v26 = vld [vmem:[%s2531_s0 + $0x78] sm:$0xff]  ;;  %v196_v27 = vld [vmem:[%s2530_s1 + $0x460] sm:$0xff] }
  0x35   :  { %1394 = vmatpush3.msra.mxu0 %v127_v36  ;;  %1436 = vmatpush3.msra.mxu1 %v160_v37  ;;  %v43_v28 = vld [vmem:[%s2531_s0 + $0xb8] sm:$0xff]  ;;  %v42_v29 = vld [vmem:[%s2531_s0 + $0xb0] sm:$0xff]  ;;  %v45_v31 = vld [vmem:[%s2531_s0 + $0xc8] sm:$0xff] }
  0x36   :  { %276 = vmatprep.mubr.f32.mxu0 %v30_v38  ;;  %1395 = vmatprep.subr.mxu0 %v142_v39  ;;  %v195_v30 = vld [vmem:[%s2530_s1 + $0x458] sm:$0xff]  ;;  %v44_v32 = vld [vmem:[%s2531_s0 + $0xc0] sm:$0xff]  ;;  %v194_v33 = vld [vmem:[%s2530_s1 + $0x450] sm:$0xff] }
  0x37   :  { %1437 = vmatprep.subr.mxu1 %v175_v40  ;;  %277 = vmatmul.mubr.f32.gmra.mxu0 %v29_v41  ;;  %v52_v34 = vld [vmem:[%s2531_s0 + $0x100] sm:$0xff]  ;;  %v51_v35 = vld [vmem:[%s2531_s0 + $0xf8] sm:$0xff]  ;;  %v193_v36 = vld [vmem:[%s2530_s1 + $0x448] sm:$0xff] }
  0x38   :  { %1438 = vmatpush3.msra.mxu1 %v159_v42  ;;  %1396 = vmatpush3.msra.mxu0 %v126_v43  ;;  %v54_v37 = vld [vmem:[%s2531_s0 + $0x110] sm:$0xff]  ;;  %v53_v38 = vld [vmem:[%s2531_s0 + $0x108] sm:$0xff]  ;;  %v192_v39 = vld [vmem:[%s2530_s1 + $0x440] sm:$0xff] }
  0x39   :  { %361 = vmatprep.mubr.f32.mxu1 %v32_v44  ;;  %1397 = vmatprep.subr.mxu0 %v141_v45  ;;  %v28_v40 = vld [vmem:[%s2531_s0 + $0x40] sm:$0xff]  ;;  %v191_v41 = vld [vmem:[%s2530_s1 + $0x438] sm:$0xff]  ;;  %v190_v42 = vld [vmem:[%s2530_s1 + $0x430] sm:$0xff] }
  0x3a   :  { %1439 = vmatprep.subr.mxu1 %v174_v46  ;;  %362 = vmatmul.mubr.f32.gmra.mxu1 %v31_v47  ;;  %v189_v43 = vld [vmem:[%s2530_s1 + $0x428] sm:$0xff]  ;;  %v188_v44 = vld [vmem:[%s2530_s1 + $0x420] sm:$0xff]  ;;  %v187_v45 = vld [vmem:[%s2530_s1 + $0x418] sm:$0xff] }
  0x3b   :  { %1398 = vmatpush3.msra.mxu0 %v125_v48  ;;  %1440 = vmatpush3.msra.mxu1 %v158_v49  ;;  %v186_v46 = vld [vmem:[%s2530_s1 + $0x410] sm:$0xff]  ;;  %v185_v47 = vld [vmem:[%s2530_s1 + $0x408] sm:$0xff]  ;;  %v184_v48 = vld [vmem:[%s2530_s1 + $0x400] sm:$0xff] }
  0x3c   :  { %281 = vmatprep.mubr.f32.mxu0 %v39_v50  ;;  %1399 = vmatprep.subr.mxu0 %v140_v51  ;;  %v37_v49 = vld [vmem:[%s2531_s0 + $0x88] sm:$0xff]  ;;  %v46_v50 = vld [vmem:[%s2531_s0 + $0xd0] sm:$0xff]  ;;  %v55_v51 = vld [vmem:[%s2531_s0 + $0x118] sm:$0xff] }
  0x3d   :  { %1441 = vmatprep.subr.mxu1 %v173_v52  ;;  %282 = vmatmul.mubr.f32.gmra.mxu0 %v38_v53  ;;  %v668_v52 = vlaneseq }
  0x3e   :  { %1442 = vmatpush3.msra.mxu1 %v157_v54  ;;  %1400 = vmatpush3.msra.mxu0 %v124_v55 }
  0x3f   :  { %366 = vmatprep.mubr.f32.mxu1 %v41_v56  ;;  %1401 = vmatprep.subr.mxu0 %v139_v57  ;;  %v2237_v53 = vshrl.u32 %v668_v52, 7  ;;  %v2239_v54 = vand.u32 127, %v668_v52 }
  0x40   :  { %1443 = vmatprep.subr.mxu1 %v172_v58  ;;  %367 = vmatmul.mubr.f32.gmra.mxu1 %v40_v59 }
  0x41   :  { %1402 = vmatpush3.msra.mxu0 %v123_v60  ;;  %1444 = vmatpush3.msra.mxu1 %v156_v61  ;;  %v684_v55 = vadd.s32 120, %v2237_v53  ;;  %v2243_v56 = vadd.s32 32, %v2239_v54  ;;  %v2246_v57 = vadd.s32 64, %v2239_v54  ;;  %v769_v58 = vadd.s32 96, %v2239_v54 }
  0x42   :  { %286 = vmatprep.mubr.f32.mxu0 %v48_v62  ;;  %1403 = vmatprep.subr.mxu0 %v138_v63  ;;  %v683_v59 = vadd.s32 112, %v2237_v53  ;;  %v1664_v60 = vmov 0.0   ;;  %v682_v61 = vadd.s32 104, %v2237_v53  ;;  %v1665_v62 = vmov 1.0  }
  0x43   :  { %1445 = vmatprep.subr.mxu1 %v171_v0  ;;  %287 = vmatmul.mubr.f32.gmra.mxu0 %v47_v1  ;;  %vm702_vm0 = vcmp.eq.s32.totalorder %v684_v55, %v2239_v54  ;;  %vm719_vm1 = vcmp.eq.s32.totalorder %v684_v55, %v2243_v56  ;;  %vm752_vm3 = vcmp.eq.s32.totalorder %v684_v55, %v2246_v57  ;;  %v2262_v63 = vadd.s32 96, %v2237_v53 }
  0x44   :  { %1446 = vmatpush3.msra.mxu1 %v155_v2  ;;  %1404 = vmatpush3.msra.mxu0 %v122_v3  ;;  %vm735_vm2 = vmor %vm702_vm0, %vm719_vm1  ;;  %vm785_vm5 = vcmp.eq.s32.totalorder %v684_v55, %v769_v58  ;;  %vm701_vm6 = vcmp.eq.s32.totalorder %v683_v59, %v2239_v54  ;;  %vm718_vm7 = vcmp.eq.s32.totalorder %v683_v59, %v2243_v56  ;;  %v680_v0 = vadd.s32 88, %v2237_v53 }
  0x45   :  { %371 = vmatprep.mubr.f32.mxu1 %v50_v4  ;;  %1405 = vmatprep.subr.mxu0 %v137_v5  ;;  %vm768_vm4 = vmor %vm735_vm2, %vm752_vm3  ;;  %vm751_vm9 = vcmp.eq.s32.totalorder %v683_v59, %v2246_v57  ;;  %vm784_vm11 = vcmp.eq.s32.totalorder %v683_v59, %v769_v58  ;;  %vm700_vm13 = vcmp.eq.s32.totalorder %v682_v61, %v2239_v54  ;;  %v679_v1 = vadd.s32 80, %v2237_v53 }
  0x46   :  { %1447 = vmatprep.subr.mxu1 %v170_v6  ;;  %372 = vmatmul.mubr.f32.gmra.mxu1 %v49_v7  ;;  %vm801_vm8 = vmor %vm768_vm4, %vm785_vm5  ;;  %vm717_vm14 = vcmp.eq.s32.totalorder %v682_v61, %v2243_v56  ;;  %vm750_vm15 = vcmp.eq.s32.totalorder %v682_v61, %v2246_v57  ;;  %vm783_vm1 = vcmp.eq.s32.totalorder %v682_v61, %v769_v58  ;;  %v678_v2 = vadd.s32 72, %v2237_v53 }
  0x47   :  { %1406 = vmatpush3.msra.mxu0 %v121_v8  ;;  %1448 = vmatpush3.msra.mxu1 %v154_v9  ;;  %vm734_vm10 = vmor %vm701_vm6, %vm718_vm7  ;;  %vm699_vm3 = vcmp.eq.s32.totalorder %v2262_v63, %v2239_v54  ;;  %vm716_vm4 = vcmp.eq.s32.totalorder %v2262_v63, %v2243_v56  ;;  %vm749_vm6 = vcmp.eq.s32.totalorder %v2262_v63, %v2246_v57  ;;  %v2296_v3 = vadd.s32 64, %v2237_v53 }
  0x48   :  { %1407 = vmatprep.subr.mxu0 %v136_v10  ;;  %1449 = vmatprep.subr.mxu1 %v169_v11  ;;  %vm767_vm12 = vmor %vm734_vm10, %vm751_vm9  ;;  %vm698_vm10 = vcmp.eq.s32.totalorder %v680_v0, %v2239_v54  ;;  %v676_v4 = vadd.s32 56, %v2237_v53  ;;  %v675_v5 = vadd.s32 48, %v2237_v53  ;;  %v674_v6 = vadd.s32 40, %v2237_v53 }
  0x49   :  { %1408 = vmatpush3.msra.mxu0 %v120_v12  ;;  %441 = vmatprep.mubr.f32.mxu0 %v25_v13  ;;  %vm800_vm0 = vmor %vm767_vm12, %vm784_vm11  ;;  %vm715_vm11 = vcmp.eq.s32.totalorder %v680_v0, %v2243_v56  ;;  %v2330_v7 = vadd.s32 32, %v2237_v53  ;;  %v2352_v8 = vadd.s32 24, %v2237_v53  ;;  %v2359_v9 = vadd.s32 16, %v2237_v53 }
  0x4a   :  { %1450 = vmatpush3.msra.mxu1 %v153_v14  ;;  %442 = vmatmul.mubr.f32.vlgmr.msra.gmra.mxu0 %v24_v15  ;;  %vm733_vm2 = vmor %vm700_vm13, %vm717_vm14  ;;  %vm748_vm13 = vcmp.eq.s32.totalorder %v680_v0, %v2246_v57  ;;  %v2368_v10 = vadd.s32 8, %v2237_v53 }
  0x4b   :  { %1451 = vmatprep.subr.mxu1 %v168_v16  ;;  %1529 = vmatprep.subr.mxu0 %v199_v17  ;;  %vm766_vm5 = vmor %vm733_vm2, %vm750_vm15  ;;  %vm697_vm15 = vcmp.eq.s32.totalorder %v679_v1, %v2239_v54  ;;  %vm747_vm2 = vcmp.eq.s32.totalorder %v679_v1, %v2246_v57 }
  0x4c   :  { %1452 = vmatpush3.msra.mxu1 %v152_v18  ;;  %526 = vmatprep.mubr.f32.mxu1 %v27_v19  ;;  %vm799_vm7 = vmor %vm766_vm5, %vm783_vm1  ;;  %vm713_vm5 = vcmp.eq.s32.totalorder %v678_v2, %v2243_v56 }
  0x4d   :  { %1530 = vmatpush3.msra.mxu0 %v199_v17  ;;  %527 = vmatmul.mubr.f32.vlgmr.msra.gmra.mxu1 %v26_v20  ;;  %vm732_vm9 = vmor %vm699_vm3, %vm716_vm4  ;;  %vm696_vm4 = vcmp.eq.s32.totalorder %v678_v2, %v2239_v54 }
  0x4e   :  { %1531 = vmatprep.subr.mxu0 %v198_v21  ;;  %446 = vmatprep.mubr.f32.mxu0 %v34_v22  ;;  %vm765_vm12 = vmor %vm732_vm9, %vm749_vm6  ;;  %vm695_vm9 = vcmp.eq.s32.totalorder %v2296_v3, %v2239_v54 }
  0x4f   :  { %1532 = vmatpush3.msra.mxu0 %v198_v21  ;;  %531 = vmatprep.mubr.f32.mxu1 %v36_v25  ;;  %vm731_vm1 = vmor %vm698_vm10, %vm715_vm11  ;;  %vm712_vm10 = vcmp.eq.s32.totalorder %v2296_v3, %v2243_v56 }
  0x50   :  { %447 = vmatmul.mubr.f32.gmra.mxu0 %v33_v23  ;;  %1533 = vmatprep.subr.mxu0 %v197_v24  ;;  %vm764_vm3 = vmor %vm731_vm1, %vm748_vm13  ;;  %vm693_vm1 = vcmp.eq.s32.totalorder %v675_v5, %v2239_v54 }
  0x51   :  { %1534 = vmatpush3.msra.mxu0 %v197_v24  ;;  %532 = vmatmul.mubr.f32.gmra.mxu1 %v35_v26  ;;  %vm729_vm11 = vmor %vm696_vm4, %vm713_vm5  ;;  %vm692_vm5 = vcmp.eq.s32.totalorder %v674_v6, %v2239_v54 }
  0x52   :  { %1535 = vmatprep.subr.mxu0 %v196_v27  ;;  %451 = vmatprep.mubr.f32.mxu0 %v43_v28 }
  0x53   :  { %1536 = vmatpush3.msra.mxu0 %v196_v27  ;;  %536 = vmatprep.mubr.f32.mxu1 %v45_v31 }
  0x54   :  { %452 = vmatmul.mubr.f32.gmra.mxu0 %v42_v29  ;;  %1537 = vmatprep.subr.mxu0 %v195_v30 }
  0x55   :  { %1538 = vmatpush3.msra.mxu0 %v195_v30  ;;  %537 = vmatmul.mubr.f32.gmra.mxu1 %v44_v32 }
  0x56   :  { %1539 = vmatprep.subr.mxu0 %v194_v33  ;;  %456 = vmatprep.mubr.f32.mxu0 %v52_v34 }
  0x57   :  { %1540 = vmatpush3.msra.mxu0 %v194_v33  ;;  %541 = vmatprep.mubr.f32.mxu1 %v54_v37 }
  0x58   :  { %457 = vmatmul.mubr.f32.gmra.mxu0 %v51_v35  ;;  %1541 = vmatprep.subr.mxu0 %v193_v36 }
  0x59   :  { %1542 = vmatpush3.msra.mxu0 %v193_v36  ;;  %542 = vmatmul.mubr.f32.gmra.mxu1 %v53_v38 }
  0x5a   :  { %1543 = vmatprep.subr.mxu0 %v192_v39  ;;  %1561 = vmatprep.mubr.f32.mxu0 %v28_v40  ;;  %v1224_v40 = vld [vmem:[%s2532_s2] ss:$0 sm:$0xff] }
  0x5b   :  { %1544 = vmatpush3.msra.mxu0 %v192_v39  ;;  %1567 = vmatprep.subr.mxu1 %v1664_v60 }
  0x5c   :  { %1545 = vmatprep.subr.mxu0 %v191_v41  ;;  %1568 = vmatpush3.msk.msra.mxu1 %vm801_vm8, %v1665_v62 }
  0x5d   :  { %1546 = vmatpush3.msra.mxu0 %v191_v41  ;;  %1569 = vmatprep.subr.mxu1 %v1664_v60 }
  0x5e   :  { %1547 = vmatprep.subr.mxu0 %v190_v42  ;;  %1570 = vmatpush3.msk.msra.mxu1 %vm800_vm0, %v1665_v62 }
  0x5f   :  { %1548 = vmatpush3.msra.mxu0 %v190_v42  ;;  %1571 = vmatprep.subr.mxu1 %v1664_v60 }
  0x60   :  { %1549 = vmatprep.subr.mxu0 %v189_v43  ;;  %1572 = vmatpush3.msk.msra.mxu1 %vm799_vm7, %v1665_v62 }
  0x61   :  { %1550 = vmatpush3.msra.mxu0 %v189_v43  ;;  %1573 = vmatprep.subr.mxu1 %v1664_v60 }
  0x62   :  { %1551 = vmatprep.subr.mxu0 %v188_v44 }
  0x63   :  { %1552 = vmatpush3.msra.mxu0 %v188_v44 }
  0x64   :  { %1553 = vmatprep.subr.mxu0 %v187_v45 }
  0x65   :  { %1554 = vmatpush3.msra.mxu0 %v187_v45 }
  0x66   :  { %1555 = vmatprep.subr.mxu0 %v186_v46 }
  0x67   :  { %1556 = vmatpush3.msra.mxu0 %v186_v46 }
  0x68   :  { %1557 = vmatprep.subr.mxu0 %v185_v47 }
  0x69   :  { %1558 = vmatpush3.msra.mxu0 %v185_v47 }
  0x6a   :  { %1559 = vmatprep.subr.mxu0 %v184_v48 }
  0x6b   :  { %1560 = vmatpush3.msra.mxu0 %v184_v48 }
  0x6c   :  { %1562 = vmatmul.mubr.f32.vlgmr.msra.gmra.mxu0 %v37_v49  ;;  %1602 = vmatprep.subr.mxu0 %v1664_v60 }
  0x6d   :  { %1564 = vmatprep.mubr.f32.mxu0 %v46_v50  ;;  %1603 = vmatpush3.msk.msra.mxu0 %vm801_vm8, %v1665_v62  ;;  %vm782_vm8 = vcmp.eq.s32.totalorder %v2262_v63, %v769_v58 }
  0x6e   :  { %1604 = vmatprep.subr.mxu0 %v1664_v60  ;;  %vm798_vm14 = vmor %vm765_vm12, %vm782_vm8  ;;  %vm745_vm12 = vcmp.eq.s32.totalorder %v2296_v3, %v2246_v57 }
  0x6f   :  { %1605 = vmatpush3.msk.msra.mxu0 %vm800_vm0, %v1665_v62  ;;  %vm714_vm0 = vcmp.eq.s32.totalorder %v679_v1, %v2243_v56  ;;  %1574 = vmatpush3.msk.msra.mxu1 %vm798_vm14, %v1665_v62 }
  0x70   :  { %1565 = vmatmul.mubr.f32.gmra.mxu0 %v55_v51  ;;  %1606 = vmatprep.subr.mxu0 %v1664_v60  ;;  %vm730_vm6 = vmor %vm697_vm15, %vm714_vm0  ;;  %vm711_vm15 = vcmp.eq.s32.totalorder %v676_v4, %v2243_v56 }
  0x71   :  { %1607 = vmatpush3.msk.msra.mxu0 %vm799_vm7, %v1665_v62  ;;  %1575 = vmatprep.subr.mxu1 %v1664_v60  ;;  %vm746_vm7 = vcmp.eq.s32.totalorder %v678_v2, %v2246_v57  ;;  %vm763_vm8 = vmor %vm730_vm6, %vm747_vm2  ;;  %vm710_vm2 = vcmp.eq.s32.totalorder %v675_v5, %v2243_v56  ;;  %vm709_vm6 = vcmp.eq.s32.totalorder %v674_v6, %v2243_v56 }
  0x72   :  { %1608 = vmatprep.subr.mxu0 %v1664_v60  ;;  %1576 = vmatpush3.msk.msra.mxu1 %vm764_vm3, %v1665_v62  ;;  %vm762_vm13 = vmor %vm729_vm11, %vm746_vm7 }
  0x73   :  { %1609 = vmatpush3.msk.msra.mxu0 %vm798_vm14, %v1665_v62  ;;  %1577 = vmatprep.subr.mxu1 %v1664_v60  ;;  %vm694_vm14 = vcmp.eq.s32.totalorder %v676_v4, %v2239_v54  ;;  %vm728_vm0 = vmor %vm695_vm9, %vm712_vm10  ;;  %vm708_vm9 = vcmp.eq.s32.totalorder %v2330_v7, %v2243_v56 }
  0x74   :  { %1610 = vmatprep.subr.mxu0 %v1664_v60  ;;  %1578 = vmatpush3.msk.msra.mxu1 %vm763_vm8, %v1665_v62  ;;  %vm727_vm4 = vmor %vm694_vm14, %vm711_vm15  ;;  %vm688_vm14 = vcmp.eq.s32.totalorder %v2368_v10, %v2239_v54  ;;  %vm687_vm15 = vcmp.eq.s32.totalorder %v2237_v53, %v2239_v54 }
  0x75   :  { %1611 = vmatpush3.msk.msra.mxu0 %vm764_vm3, %v1665_v62  ;;  %1579 = vmatprep.subr.mxu1 %v1664_v60  ;;  %vm761_vm3 = vmor %vm728_vm0, %vm745_vm12  ;;  %vm690_vm12 = vcmp.eq.s32.totalorder %v2352_v8, %v2239_v54  ;;  %vm1666_vm0 = vmmov 0  }
  0x76   :  { %1612 = vmatprep.subr.mxu0 %v1664_v60  ;;  %1580 = vmatpush3.msk.msra.mxu1 %vm762_vm13, %v1665_v62  ;;  %vm726_vm7 = vmor %vm693_vm1, %vm710_vm2  ;;  %vm837_vm1 = vcmp.eq.s32.totalorder %v2239_v54, %v2352_v8 }
  0x77   :  { %1613 = vmatpush3.msk.msra.mxu0 %vm763_vm8, %v1665_v62  ;;  %1581 = vmatprep.subr.mxu1 %v1664_v60  ;;  %vm691_vm8 = vcmp.eq.s32.totalorder %v2330_v7, %v2239_v54  ;;  %vm725_vm10 = vmor %vm692_vm5, %vm709_vm6 }
  0x78   :  { %1614 = vmatprep.subr.mxu0 %v1664_v60  ;;  %1582 = vmatpush3.msk.msra.mxu1 %vm761_vm3, %v1665_v62  ;;  %vm724_vm11 = vmor %vm691_vm8, %vm708_vm9 }
  0x79   :  { %1615 = vmatpush3.msk.msra.mxu0 %vm762_vm13, %v1665_v62  ;;  %1583 = vmatprep.subr.mxu1 %v1664_v60  ;;  %vm689_vm13 = vcmp.eq.s32.totalorder %v2359_v9, %v2239_v54 }
  0x7a   :  { %1616 = vmatprep.subr.mxu0 %v1664_v60  ;;  %1584 = vmatpush3.msk.msra.mxu1 %vm727_vm4, %v1665_v62 }
  0x7b   :  { %1617 = vmatpush3.msk.msra.mxu0 %vm761_vm3, %v1665_v62  ;;  %1585 = vmatprep.subr.mxu1 %v1664_v60  ;;  %vm836_vm3 = vcmp.eq.s32.totalorder %v2239_v54, %v2359_v9 }
  0x7c   :  { %1618 = vmatprep.subr.mxu0 %v1664_v60  ;;  %1586 = vmatpush3.msk.msra.mxu1 %vm726_vm7, %v1665_v62 }
  0x7d   :  { %1619 = vmatpush3.msk.msra.mxu0 %vm727_vm4, %v1665_v62  ;;  %1587 = vmatprep.subr.mxu1 %v1664_v60 }
  0x7e   :  { %1620 = vmatprep.subr.mxu0 %v1664_v60  ;;  %1588 = vmatpush3.msk.msra.mxu1 %vm725_vm10, %v1665_v62 }
  0x7f   :  { %1621 = vmatpush3.msk.msra.mxu0 %vm726_vm7, %v1665_v62  ;;  %1589 = vmatprep.subr.mxu1 %v1664_v60 }
  0x80   :  { %1622 = vmatprep.subr.mxu0 %v1664_v60  ;;  %1590 = vmatpush3.msk.msra.mxu1 %vm724_vm11, %v1665_v62 }
  0x81   :  { %1623 = vmatpush3.msk.msra.mxu0 %vm725_vm10, %v1665_v62  ;;  %1591 = vmatprep.subr.mxu1 %v1664_v60 }
  0x82   :  { %1624 = vmatprep.subr.mxu0 %v1664_v60  ;;  %1592 = vmatpush3.msk.msra.mxu1 %vm690_vm12, %v1665_v62 }
  0x83   :  { %1625 = vmatpush3.msk.msra.mxu0 %vm724_vm11, %v1665_v62  ;;  %1593 = vmatprep.subr.mxu1 %v1664_v60 }
  0x84   :  { %1626 = vmatprep.subr.mxu0 %v1664_v60  ;;  %1594 = vmatpush3.msk.msra.mxu1 %vm689_vm13, %v1665_v62 }
  0x85   :  { %1627 = vmatpush3.msk.msra.mxu0 %vm690_vm12, %v1665_v62  ;;  %1595 = vmatprep.subr.mxu1 %v1664_v60 }
  0x86   :  { %1628 = vmatprep.subr.mxu0 %v1664_v60  ;;  %1596 = vmatpush3.msk.msra.mxu1 %vm688_vm14, %v1665_v62 }
  0x87   :  { %1629 = vmatpush3.msk.msra.mxu0 %vm689_vm13, %v1665_v62  ;;  %1599 = vmatprep.mubr.msk.f32.mxu1 %vm1666_vm0, %v1664_v60 }
  0x88   :  { %1630 = vmatprep.subr.mxu0 %v1664_v60  ;;  %1597 = vmatprep.subr.mxu1 %v1664_v60 }
  0x89   :  { %1631 = vmatpush3.msk.msra.mxu0 %vm688_vm14, %v1665_v62  ;;  %1598 = vmatpush3.msk.msra.mxu1 %vm687_vm15, %v1665_v62 }
  0x8a   :  { %1632 = vmatprep.subr.mxu0 %v1664_v60  ;;  %1634 = vmatprep.mubr.msk.f32.mxu0 %vm1666_vm0, %v1664_v60 }
  0x8b   :  { %1633 = vmatpush3.msk.msra.mxu0 %vm687_vm15, %v1665_v62  ;;  %1637 = vmatprep.subr.mxu1 %v1664_v60  ;;  %vm835_vm15 = vcmp.eq.s32.totalorder %v2239_v54, %v2368_v10 }
  0xe2   :  { %v1321_v11 = vpop.f32.mrf.mxu0 }
  0xe4   :  { %v1322_v13 = vpop.f32.mrf.mxu0 }
  0xe5   :  { %v1365_v12 = vpop.f32.mrf.mxu1  ;;  %v1323_v36 = vadd.f32 %v1322_v13, %v1321_v11 }
  0xe7   :  { %v1366_v15 = vpop.f32.mrf.mxu1  ;;  %v274_v41 = vadd.f32 %v1323_v36, %v1224_v40  ;;  %v840_v36 = vadd.s32 32, %v2352_v8 }
  0xe8   :  { %v1367_v42 = vadd.f32 %v1366_v15, %v1365_v12 }
  0xe9   :  { %vm844_vm2 = vcmp.eq.s32.totalorder %v2239_v54, %v840_v36 }
  0xea   :  { %v359_v51 = vadd.f32 %v1367_v42, %v274_v41  ;;  %vm848_vm5 = vmor %vm837_vm1, %vm844_vm2 }
  0xf7   :  { %v1324_v14 = vpop.f32.mrf.mxu0 }
  0xf9   :  { %v1325_v16 = vpop.f32.mrf.mxu0 }
  0xfa   :  { %v1368_v17 = vpop.f32.mrf.mxu1  ;;  %v1326_v37 = vadd.f32 %v1325_v16, %v1324_v14 }
  0xfc   :  { %v1369_v18 = vpop.f32.mrf.mxu1  ;;  %v279_v43 = vadd.f32 %v1326_v37, %v1224_v40 }
  0xfd   :  { %v1327_v19 = vpop.f32.mrf.mxu0  ;;  %v1370_v44 = vadd.f32 %v1369_v18, %v1368_v17 }
  0xff   :  { %v1328_v20 = vpop.f32.mrf.mxu0  ;;  %v364_v52 = vadd.f32 %v1370_v44, %v279_v43  ;;  %v851_v43 = vadd.s32 64, %v2352_v8 }
 0x100   :  { %v1371_v21 = vpop.f32.mrf.mxu1  ;;  %v1329_v47 = vadd.f32 %v1328_v20, %v1327_v19 }
 0x101   :  { %vm855_vm6 = vcmp.eq.s32.totalorder %v2239_v54, %v851_v43 }
 0x102   :  { %v1372_v22 = vpop.f32.mrf.mxu1  ;;  %v284_v57 = vadd.f32 %v1329_v47, %v1224_v40  ;;  %v862_v47 = vadd.s32 96, %v2352_v8  ;;  %vm859_vm9 = vmor %vm848_vm5, %vm855_vm6  ;;  %vm834_vm6 = vcmp.eq.s32.totalorder %v2239_v54, %v2237_v53 }
 0x103   :  { %v1330_v23 = vpop.f32.mrf.mxu0  ;;  %v1373_v58 = vadd.f32 %v1372_v22, %v1371_v21 }
 0x104   :  { %vm866_vm10 = vcmp.eq.s32.totalorder %v2239_v54, %v862_v47 }
 0x105   :  { %v1331_v24 = vpop.f32.mrf.mxu0  ;;  %v369_v12 = vadd.f32 %v1373_v58, %v284_v57  ;;  %vm2438_vm13 = vmor %vm859_vm9, %vm866_vm10  ;;  %vm852_vm9 = vcmp.eq.s32.totalorder %v2239_v54, %v2296_v3 }
 0x106   :  { %v1374_v25 = vpop.f32.mrf.mxu1  ;;  %v1332_v48 = vadd.f32 %v1331_v24, %v1330_v23 }
 0x108   :  { %v1375_v26 = vpop.f32.mrf.mxu1  ;;  %v289_v59 = vadd.f32 %v1332_v48, %v1224_v40  ;;  %v839_v40 = vadd.s32 32, %v2359_v9 }
 0x109   :  { %v1376_v61 = vadd.f32 %v1375_v26, %v1374_v25 }
 0x10a   :  { %v1409_v27 = vpop.f32.mrf.mxu0  ;;  %vm843_vm4 = vcmp.eq.s32.totalorder %v2239_v54, %v839_v40 }
 0x10b   :  { %v374_v13 = vadd.f32 %v1376_v61, %v289_v59  ;;  %vm847_vm7 = vmor %vm836_vm3, %vm843_vm4  ;;  %v838_v61 = vadd.s32 32, %v2368_v10 }
 0x10c   :  { %v1410_v28 = vpop.f32.mrf.mxu0 }
 0x10d   :  { %v1453_v29 = vpop.f32.mrf.mxu1  ;;  %v1411_v49 = vadd.f32 %v1410_v28, %v1409_v27  ;;  %vm842_vm1 = vcmp.eq.s32.totalorder %v2239_v54, %v838_v61 }
 0x10e   :  { %vm846_vm2 = vmor %vm835_vm15, %vm842_vm1  ;;  %vm1027_vm1 = vcmask 261120  }
 0x10f   :  { %v1454_v31 = vpop.f32.mrf.mxu1  ;;  %v444_v0 = vadd.f32 %v1411_v49, %v359_v51 }
 0x110   :  { %v1412_v30 = vpop.f32.mrf.mxu0  ;;  %v1455_v1 = vadd.f32 %v1454_v31, %v1453_v29 }
 0x111   :  { %v1456_v33 = vpop.f32.mrf.mxu1 }
 0x112   :  { %v1413_v32 = vpop.f32.mrf.mxu0  ;;  %v529_v16 = vadd.f32 %v1455_v1, %v444_v0  ;;  %v849_v0 = vadd.s32 64, %v2368_v10  ;;  %v860_v1 = vadd.s32 96, %v2368_v10 }
 0x113   :  { %v1457_v35 = vpop.f32.mrf.mxu1  ;;  %v1414_v50 = vadd.f32 %v1413_v32, %v1412_v30 }
 0x114   :  { %v1415_v34 = vpop.f32.mrf.mxu0  ;;  %v1458_v4 = vadd.f32 %v1457_v35, %v1456_v33  ;;  %vm853_vm3 = vcmp.eq.s32.totalorder %v2239_v54, %v849_v0  ;;  %vm864_vm5 = vcmp.eq.s32.totalorder %v2239_v54, %v860_v1 }
 0x115   :  { %v1459_v39 = vpop.f32.mrf.mxu1  ;;  %v449_v2 = vadd.f32 %v1414_v50, %v364_v52  ;;  %v861_v50 = vadd.s32 96, %v2359_v9  ;;  %vm857_vm4 = vmor %vm846_vm2, %vm853_vm3 }
 0x116   :  { %v1416_v38 = vpop.f32.mrf.mxu0 }
 0x117   :  { %v1460_v46 = vpop.f32.mrf.mxu1  ;;  %v1417_v5 = vadd.f32 %v1416_v38, %v1415_v34  ;;  %v534_v14 = vadd.f32 %v1458_v4, %v449_v2  ;;  %vm865_vm12 = vcmp.eq.s32.totalorder %v2239_v54, %v861_v50 }
 0x118   :  { %v1418_v45 = vpop.f32.mrf.mxu0  ;;  %v1461_v18 = vadd.f32 %v1460_v46, %v1459_v39  ;;  %v850_v46 = vadd.s32 64, %v2359_v9 }
 0x119   :  { %v1462_v56 = vpop.f32.mrf.mxu1  ;;  %v454_v17 = vadd.f32 %v1417_v5, %v369_v12 }
 0x11a   :  { %v1419_v55 = vpop.f32.mrf.mxu0  ;;  %vm854_vm8 = vcmp.eq.s32.totalorder %v2239_v54, %v850_v46 }
 0x11b   :  { %v1420_v6 = vadd.f32 %v1419_v55, %v1418_v45  ;;  %v1463_v11 = vpop.f32.mrf.mxu1  ;;  %v539_v26 = vadd.f32 %v1461_v18, %v454_v17  ;;  %vm858_vm11 = vmor %vm847_vm7, %vm854_vm8  ;;  %vm841_vm7 = vcmp.eq.s32.totalorder %v2239_v54, %v2330_v7  ;;  %v1176_v17 = vsub.s32 0, %v2237_v53 }
 0x11c   :  { %v1464_v20 = vadd.f32 %v1463_v11, %v1462_v56  ;;  %vm2442_vm14 = vmor %vm858_vm11, %vm865_vm12  ;;  %vm863_vm11 = vcmp.eq.s32.totalorder %v2239_v54, %v2262_v63 }
 0x11d   :  { %v459_v19 = vadd.f32 %v1420_v6, %v374_v13  ;;  %vm2468_vm8 = vmor %vm857_vm4, %vm864_vm5 }
 0x11e   :  { %vm845_vm10 = vmor %vm834_vm6, %vm841_vm7 }
 0x11f   :  { %v544_v25 = vadd.f32 %v1464_v20, %v459_v19  ;;  %vm856_vm12 = vmor %vm845_vm10, %vm852_vm9 }
 0x120   :  { %vm2480_vm15 = vmor %vm856_vm12, %vm863_vm11 }
 0x12c   :  { %v1563_v15 = vpop.f32.mrf.mxu0 }
 0x12d   :  { %v2402_v21 = vadd.f32 %v1563_v15, %v534_v14 }
 0x12e   :  { %v613_v23 = vpop.f32.mrf.mxu0 }
 0x12f   :  { %v2404_v22 = vadd.f32 %v613_v23, %v529_v16  ;;  %v656_v32 = vmul.f32 %v2402_v21, %v2402_v21 }
 0x130   :  { %v1566_v24 = vpop.f32.mrf.mxu0 }
 0x131   :  { %v655_v27 = vmul.f32 %v2404_v22, %v2404_v22  ;;  %v2408_v29 = vadd.f32 %v1566_v24, %v544_v25  ;;  %v646_v31 = vadd.f32 %v2402_v21, %v2404_v22 }
 0x132   :  { %v623_v28 = vpop.f32.mrf.mxu0 }
 0x133   :  { %v2410_v30 = vadd.f32 %v623_v28, %v539_v26  ;;  %v659_v35 = vadd.f32 %v656_v32, %v655_v27  ;;  %v658_v38 = vmul.f32 %v2408_v29, %v2408_v29 }
 0x135   :  { %v647_v33 = vadd.f32 %v646_v31, %v2410_v30  ;;  %v657_v34 = vmul.f32 %v2410_v30, %v2410_v30 }
 0x137   :  { %v648_v37 = vadd.f32 %v647_v33, %v2408_v29  ;;  %v660_v39 = vadd.f32 %v659_v35, %v657_v34 }
 0x139   :  { %v649_v41 = vrot.slane %v648_v37, 4  ;;  %v661_v42 = vadd.f32 %v660_v39, %v658_v38 }
 0x13b   :  { %v650_v44 = vadd.f32 %v649_v41, %v648_v37  ;;  %v662_v45 = vrot.slane %v661_v42, 4 }
 0x13d   :  { %v651_v48 = vrot.slane %v650_v44, 2  ;;  %v663_v49 = vadd.f32 %v662_v45, %v661_v42 }
 0x13f   :  { %v652_v51 = vadd.f32 %v651_v48, %v650_v44  ;;  %v664_v52 = vrot.slane %v663_v49, 2 }
 0x141   :  { %v653_v8 = vrot.slane %v652_v51, 1  ;;  %v665_v55 = vadd.f32 %v664_v52, %v663_v49 }
 0x143   :  { %v654_v56 = vadd.f32 %v653_v8, %v652_v51  ;;  %v666_v57 = vrot.slane %v665_v55, 1 }
 0x145   :  { %1600 = vmatmul.mubr.f32.vlgmr.msra.gmra.mxu1 %v654_v56  ;;  %v667_v9 = vadd.f32 %v666_v57, %v665_v55 }
 0x146   :  { %1638 = vmatpush3.msk.msra.mxu1 %vm2438_vm13, %v1665_v62  ;;  %1645 = vmatprep.mubr.msk.f32.mxu1 %vm1666_vm0, %v1664_v60 }
 0x147   :  { %1635 = vmatmul.mubr.f32.vlgmr.msra.gmra.mxu0 %v667_v9  ;;  %1639 = vmatprep.subr.mxu1 %v1664_v60 }
 0x148   :  { %1640 = vmatpush3.msk.msra.mxu1 %vm2442_vm14, %v1665_v62 }
 0x149   :  { %1641 = vmatprep.subr.mxu1 %v1664_v60 }
 0x14a   :  { %1642 = vmatpush3.msk.msra.mxu1 %vm2468_vm8, %v1665_v62 }
 0x14b   :  { %1643 = vmatprep.subr.mxu1 %v1664_v60 }
 0x14c   :  { %1644 = vmatpush3.msk.msra.mxu1 %vm2480_vm15, %v1665_v62 }
 0x14d   :  { %1648 = vmatprep.subr.mxu1 %v1664_v60 }
 0x205   :  { %v945_v3 = vpop.f32.mrf.mxu1 }
 0x206   :  { %v1020_v10 = vmul.f32 0.0078125, %v945_v3 }
 0x207   :  { %v1601_v4 = vpop.f32.mrf.mxu1  ;;  %v1015_v5 = vpop.f32.mrf.mxu0 }
 0x208   :  { %v1022_v6 = vmul.f32 %v1020_v10, %v1020_v10  ;;  %v1021_v54 = vmul.f32 0.0078125, %v1015_v5  ;;  %1646 = vmatmul.mubr.msk.f32.vlgmr.msra.gmra.mxu1 %vm1027_vm1, %v1020_v10 }
 0x209   :  { %v1636_v63 = vpop.f32.mrf.mxu0  ;;  %1649 = vmatpush3.msk.msra.mxu1 %vm2438_vm13, %v1665_v62  ;;  %1656 = vmatprep.mubr.msk.f32.mxu1 %vm1666_vm0, %v1664_v60 }
 0x20a   :  { %v1023_v11 = vsub.f32 %v1021_v54, %v1022_v6  ;;  %1650 = vmatprep.subr.mxu1 %v1664_v60 }
 0x20b   :  { %1651 = vmatpush3.msk.msra.mxu1 %vm2442_vm14, %v1665_v62 }
 0x20c   :  { %v1024_v12 = vmax.f32 %v1023_v11, 0.0  ;;  %1652 = vmatprep.subr.mxu1 %v1664_v60 }
 0x20d   :  { %1653 = vmatpush3.msk.msra.mxu1 %vm2468_vm8, %v1665_v62 }
 0x20e   :  { %v1025_v13 = vadd.f32 1e-05, %v1024_v12  ;;  %1654 = vmatprep.subr.mxu1 %v1664_v60 }
 0x20f   :  { %1655 = vmatpush3.msk.msra.mxu1 %vm2480_vm15, %v1665_v62  ;;  %v1287_v62 = vld [vmem:[%s2533_s3] ss:$0 sm:$0xff] }
 0x210   :  { %1662 = vrsqrt.f32 %v1025_v13 }
 0x21d   :  { %v1663_v14 = vpop.eup %1662 }
 0x21e   :  { %1657 = vmatmul.mubr.msk.f32.vlgmr.msra.gmra.mxu1 %vm1027_vm1, %v1663_v14 }
 0x2c8   :  { %v1097_v15 = vpop.f32.mrf.mxu1 }
 0x2c9   :  { %v1177_v18 = vrot.slane %v1097_v15, %v1176_v17 }
 0x2ca   :  { %v1647_v16 = vpop.f32.mrf.mxu1 }
 0x2cb   :  { %v1178_v19 = vsub.f32 %v2404_v22, %v1177_v18  ;;  %v1179_v23 = vsub.f32 %v2402_v21, %v1177_v18  ;;  %v1180_v60 = vsub.f32 %v2410_v30, %v1177_v18  ;;  %v1181_v24 = vsub.f32 %v2408_v29, %v1177_v18  ;;  %v1288_v22 = vld [vmem:[%s2534_s4] ss:$0 sm:$0xff] }
 0x2de   :  { %v1170_v20 = vpop.f32.mrf.mxu1 }
 0x2df   :  { %v1185_v25 = vrot.slane %v1170_v20, %v1176_v17 }
 0x2e0   :  { %v1658_v26 = vpop.f32.mrf.mxu1 }
 0x2e1   :  { %v1186_v27 = vmul.f32 %v1185_v25, %v1178_v19  ;;  %v1187_v28 = vmul.f32 %v1185_v25, %v1179_v23  ;;  %v1188_v31 = vmul.f32 %v1185_v25, %v1180_v60  ;;  %v1189_v53 = vmul.f32 %v1185_v25, %v1181_v24 }
 0x2e3   :  { %v1197_v32 = vmul.f32 %v1287_v62, %v1186_v27  ;;  %v1198_v21 = vmul.f32 %v1287_v62, %v1187_v28  ;;  %v1199_v33 = vmul.f32 %v1287_v62, %v1188_v31  ;;  %v1200_v30 = vmul.f32 %v1287_v62, %v1189_v53 }
 0x2e5   :  { %v1208_v34 = vadd.f32 %v1288_v22, %v1197_v32  ;;  %v1209_v29 = vadd.f32 %v1288_v22, %v1198_v21  ;;  %v1210_v35 = vadd.f32 %v1288_v22, %v1199_v33  ;;  %v1211_v36 = vadd.f32 %v1288_v22, %v1200_v30 }
 0x2e7   :  { %v1212_v37 = vmax.f32 %v1208_v34, 0.0  ;;  %v1213_v38 = vmax.f32 %v1209_v29, 0.0  ;;  %v1214_v39 = vmax.f32 %v1210_v35, 0.0  ;;  %v1215_v40 = vmax.f32 %v1211_v36, 0.0 }
 0x2e9   :  { %1216 = vst [vmem:[%s2535_s5] sm:$0xff] %v1212_v37  ;;  %1217 = vst [vmem:[%s2535_s5 + $0x8] sm:$0xff] %v1213_v38 }
 0x2ea   :  { %1218 = vst [vmem:[%s2535_s5 + $0x10] sm:$0xff] %v1214_v39  ;;  %1219 = vst [vmem:[%s2535_s5 + $0x18] sm:$0xff] %v1215_v40 }

// kernel: decoder_vae_forward.7
= control target key start
LH: loop header
LB: loop body
LE: loop exit
PB: predicated region body
PF: predicated region fallthrough
CT: control target
= control target key end

     0   :  { %v273_v3 = vmov 0.0   ;;  %vm274_vm0 = vmmov 0   ;;  %vm59_vm1 = vcmask 261120   ;;  %s415_s1 = inlined_call_operand.vmem [shape: f32[288,128], index: 1, kind: input, shape index: {}]   ;;  %s416_s0 = inlined_call_operand.vmem [shape: f32[4,288], index: 0, kind: input, shape index: {}]   ;;  %s417_s2 = inlined_call_operand.<no memory space> [shape: f32[1,1], index: 2, kind: input, shape index: {}]   ;;  %s418_s3 = inlined_call_operand.vmem [shape: f32[4,128], index: 3, kind: output, shape index: {}]  }
   0x1   :  { %v49_v0 = vld [vmem:[%s415_s1 + $0xf8] sm:$0xff]  ;;  %v48_v2 = vld [vmem:[%s415_s1 + $0xf0] sm:$0xff]  ;;  %255 = vmatprep.subr.mxu1 %v273_v3  ;;  %263 = vmatprep.mubr.msk.f32.mxu1 %vm274_vm0, %v273_v3  ;;  %v47_v5 = vld [vmem:[%s415_s1 + $0xe8] sm:$0xff]  ;;  %v54_v44 = vstv %s417_s2 }
   0x2   :  { %v33_v1 = vld [vmem:[%s415_s1 + $0x78] sm:$0xff]  ;;  %215 = vmatprep.subr.mxu0 %v49_v0  ;;  %v32_v4 = vld [vmem:[%s415_s1 + $0x70] sm:$0xff]  ;;  %v31_v6 = vld [vmem:[%s415_s1 + $0x68] sm:$0xff] }
   0x3   :  { %216 = vmatpush3.msra.mxu0 %v33_v1  ;;  %v46_v7 = vld [vmem:[%s415_s1 + $0xe0] sm:$0xff]  ;;  %v45_v9 = vld [vmem:[%s415_s1 + $0xd8] sm:$0xff]  ;;  %v44_v11 = vld [vmem:[%s415_s1 + $0xd0] sm:$0xff] }
   0x4   :  { %217 = vmatprep.subr.mxu0 %v48_v2  ;;  %v30_v8 = vld [vmem:[%s415_s1 + $0x60] sm:$0xff]  ;;  %v29_v10 = vld [vmem:[%s415_s1 + $0x58] sm:$0xff]  ;;  %v28_v12 = vld [vmem:[%s415_s1 + $0x50] sm:$0xff] }
   0x5   :  { %218 = vmatpush3.msra.mxu0 %v32_v4  ;;  %v43_v13 = vld [vmem:[%s415_s1 + $0xc8] sm:$0xff]  ;;  %v53_v14 = vld [vmem:[%s415_s1 + $0x118] sm:$0xff]  ;;  %v16_v16 = vld [vmem:[%s416_s0] sm:$0xff] }
   0x6   :  { %219 = vmatprep.subr.mxu0 %v47_v5  ;;  %v27_v15 = vld [vmem:[%s415_s1 + $0x48] sm:$0xff]  ;;  %256 = vmatpush3.msra.mxu1 %v53_v14  ;;  %v52_v17 = vld [vmem:[%s415_s1 + $0x110] sm:$0xff]  ;;  %v42_v18 = vld [vmem:[%s415_s1 + $0xc0] sm:$0xff]  ;;  %v57_v19 = vcombine.high %v16_v16, %v16_v16 }
   0x7   :  { %220 = vmatpush3.msra.mxu0 %v31_v6  ;;  %257 = vmatprep.subr.mxu1 %v273_v3  ;;  %v26_v20 = vld [vmem:[%s415_s1 + $0x40] sm:$0xff]  ;;  %v51_v21 = vld [vmem:[%s415_s1 + $0x108] sm:$0xff]  ;;  %v41_v22 = vld [vmem:[%s415_s1 + $0xb8] sm:$0xff] }
   0x8   :  { %221 = vmatprep.subr.mxu0 %v46_v7  ;;  %258 = vmatpush3.msra.mxu1 %v52_v17  ;;  %v25_v23 = vld [vmem:[%s415_s1 + $0x38] sm:$0xff]  ;;  %v50_v24 = vld [vmem:[%s415_s1 + $0x100] sm:$0xff]  ;;  %v40_v25 = vld [vmem:[%s415_s1 + $0xb0] sm:$0xff] }
   0x9   :  { %222 = vmatpush3.msra.mxu0 %v30_v8  ;;  %126 = vmatprep.mubr.f32.mxu0 %v57_v19  ;;  %v17_v26 = vld [vmem:[%s416_s0 + $0x8] sm:$0xf]  ;;  %v24_v27 = vld [vmem:[%s415_s1 + $0x30] sm:$0xff]  ;;  %v38_v30 = vld [vmem:[%s415_s1 + $0xa0] sm:$0xff] }
   0xa   :  { %223 = vmatprep.subr.mxu0 %v45_v9  ;;  %259 = vmatprep.subr.mxu1 %v273_v3  ;;  %v39_v28 = vld [vmem:[%s415_s1 + $0xa8] sm:$0xff]  ;;  %v22_v31 = vld [vmem:[%s415_s1 + $0x20] sm:$0xff]  ;;  %v37_v32 = vld [vmem:[%s415_s1 + $0x98] sm:$0xff] }
   0xb   :  { %224 = vmatpush3.msra.mxu0 %v29_v10  ;;  %260 = vmatpush3.msra.mxu1 %v51_v21  ;;  %v23_v29 = vld [vmem:[%s415_s1 + $0x28] sm:$0xff]  ;;  %v21_v33 = vld [vmem:[%s415_s1 + $0x18] sm:$0xff]  ;;  %v36_v34 = vld [vmem:[%s415_s1 + $0x90] sm:$0xff] }
   0xc   :  { %225 = vmatprep.subr.mxu0 %v44_v11  ;;  %261 = vmatprep.subr.mxu1 %v273_v3  ;;  %v20_v35 = vld [vmem:[%s415_s1 + $0x10] sm:$0xff]  ;;  %v35_v36 = vld [vmem:[%s415_s1 + $0x88] sm:$0xff]  ;;  %v34_v38 = vld [vmem:[%s415_s1 + $0x80] sm:$0xff] }
   0xd   :  { %226 = vmatpush3.msra.mxu0 %v28_v12  ;;  %262 = vmatpush3.msra.mxu1 %v50_v24  ;;  %v19_v37 = vld [vmem:[%s415_s1 + $0x8] sm:$0xff]  ;;  %v18_v39 = vld [vmem:[%s415_s1] sm:$0xff] }
   0xe   :  { %227 = vmatprep.subr.mxu0 %v43_v13  ;;  %264 = vmatmul.mubr.msk.f32.vlgmr.msra.gmra.mxu1 %vm59_vm1, %v17_v26 }
   0xf   :  { %228 = vmatpush3.msra.mxu0 %v27_v15 }
  0x10   :  { %229 = vmatprep.subr.mxu0 %v42_v18 }
  0x11   :  { %230 = vmatpush3.msra.mxu0 %v26_v20 }
  0x12   :  { %231 = vmatprep.subr.mxu0 %v41_v22 }
  0x13   :  { %232 = vmatpush3.msra.mxu0 %v25_v23 }
  0x14   :  { %233 = vmatprep.subr.mxu0 %v40_v25 }
  0x15   :  { %234 = vmatpush3.msra.mxu0 %v24_v27 }
  0x16   :  { %235 = vmatprep.subr.mxu0 %v39_v28 }
  0x17   :  { %236 = vmatpush3.msra.mxu0 %v23_v29 }
  0x18   :  { %237 = vmatprep.subr.mxu0 %v38_v30 }
  0x19   :  { %238 = vmatpush3.msra.mxu0 %v22_v31 }
  0x1a   :  { %239 = vmatprep.subr.mxu0 %v37_v32 }
  0x1b   :  { %240 = vmatpush3.msra.mxu0 %v21_v33 }
  0x1c   :  { %241 = vmatprep.subr.mxu0 %v36_v34 }
  0x1d   :  { %242 = vmatpush3.msra.mxu0 %v20_v35 }
  0x1e   :  { %243 = vmatprep.subr.mxu0 %v35_v36 }
  0x1f   :  { %244 = vmatpush3.msra.mxu0 %v19_v37 }
  0x20   :  { %245 = vmatprep.subr.mxu0 %v34_v38 }
  0x21   :  { %246 = vmatpush3.msra.mxu0 %v18_v39 }
  0x22   :  { %127 = vmatmul.mubr.f32.vlgmr.msra.gmra.mxu0 %v16_v16 }
  0xce   :  { %v198_v40 = vpop.f32.mrf.mxu1 }
  0xd0   :  { %v265_v41 = vpop.f32.mrf.mxu1 }
  0xe2   :  { %v247_v42 = vpop.f32.mrf.mxu0 }
  0xe4   :  { %v248_v43 = vpop.f32.mrf.mxu0 }
  0xe5   :  { %v249_v45 = vadd.f32 %v248_v43, %v247_v42 }
  0xe7   :  { %v129_v46 = vadd.f32 %v249_v45, %v54_v44 }
  0xe9   :  { %v199_v47 = vadd.f32 %v198_v40, %v129_v46 }
  0xeb   :  { %v214_v48 = vmul.f32 -1.442695, %v199_v47 }
  0xed   :  { %269 = vpow2.f32 %v214_v48 }
  0xfa   :  { %v270_v49 = vpop.eup %269 }
  0xfb   :  { %v205_v50 = vadd.f32 1.0, %v270_v49 }
  0xfd   :  { %271 = vrcp.f32 %v205_v50 }
 0x10a   :  { %v272_v51 = vpop.eup %271 }
 0x10b   :  { %208 = vst [vmem:[%s418_s3] sm:$0xf] %v272_v51 }

</bundles_post_ra>
